<compile_context>
chip_gen: v5e
topology: v5e:2x2
jax: 0.10.0
libtpu: 0.0.40
codegen_flags: <defaults>
</compile_context>

<pallas_src>
import jax
import jax.numpy as jnp
from jax.experimental import pallas as pl
from jax.experimental.pallas import tpu as pltpu

EPS = 1e-6  # GeM eps (fixed in GeM.__init__)


def _vmem_capacity_bytes():
    """Physical VMEM per core (128 MiB v5e/v6e, 64 MiB v7x); conservative fallback."""
    try:
        cap = getattr(pltpu.get_tpu_info(), "vmem_capacity_bytes", None)
        if cap:
            return int(cap)
    except Exception:
        pass
    return 64 << 20


def _make_kernel(inv_hw, static_p, p_int):
    """Build the kernel body; static_p/p_int specialize the GeM power path."""

    def kernel(p_ref, x_ref, w1_ref, b1_ref, w2_ref, b2_ref, o_ref, h_acc):
        # p_ref  : SMEM (1,)                GeM exponent (unused on static path)
        # x_ref  : VMEM (TB, CC, HW)        native-NCHW feature chunk
        # w1_ref : VMEM (CC, HID)  bf16     head.0 weight chunk (streamed over C)
        # b1_ref : VMEM (1, HID)   f32
        # w2_ref : VMEM (HID, NCLS_PAD) bf16
        # b2_ref : VMEM (1, NCLS_PAD)   f32
        # o_ref  : VMEM (TB, NCLS_PAD)  f32 logits (padded class dim)
        # h_acc  : VMEM (TB, HID)       f32 first-matmul accumulator
        c = pl.program_id(1)

        @pl.when(c == 0)
        def _init():
            h_acc[...] = jnp.zeros_like(h_acc)

        # --- GeM numerator for this chunk: mean_HW clamp(x, eps)^p ---
        x = x_ref[...].astype(jnp.float32)      # upcast after load; pow/accum in f32
        xc = jnp.maximum(x, EPS)
        if p_int is not None:                    # static integer p: VPU multiplies only
            xp = xc
            for _ in range(p_int - 1):
                xp = xp * xc
        elif static_p is not None:               # static non-integer p
            xp = jnp.exp(jnp.float32(static_p) * jnp.log(xc))
        else:                                    # traced p fallback (EUP exp/log)
            xp = jnp.exp(p_ref[0] * jnp.log(xc))
        pooled = jnp.sum(xp, axis=-1) * inv_hw   # (TB, CC): cross-lane reduce (XLU slot)

        # --- ^(1/p) only on the tiny pooled chunk, then partial first matmul ---
        inv_p = (1.0 / static_p) if static_p is not None else (1.0 / p_ref[0])
        pooled = jnp.exp(inv_p * jnp.log(pooled))
        h_acc[...] += jnp.dot(pooled.astype(jnp.bfloat16), w1_ref[...],
                              preferred_element_type=jnp.float32)

        # --- head finalize: bias -> SiLU -> (Dropout eval: identity) -> Linear ---
        @pl.when(c == pl.num_programs(1) - 1)
        def _fin():
            h = h_acc[...] + b1_ref[...]
            h = h * jax.nn.sigmoid(h)
            o_ref[...] = jnp.dot(h.astype(jnp.bfloat16), w2_ref[...],
                                 preferred_element_type=jnp.float32) + b2_ref[...]

    return kernel


def netclassifier_forward(feat_nchw, p, w1, b1, w2, b2, *, tb=None, cc=None):
    """feat_nchw: (B, C, H, W) backbone output. Returns (B, num_classes) f32 logits."""
    B, C, H, W = feat_nchw.shape
    HW = H * W
    hidden = w1.shape[1]
    ncls = w2.shape[1]

    # Free collapse of contiguous trailing dims (row-major) -> (B, C, HW).
    # No transpose / cast / pad of the dominant tensor in the wrapper.
    x = feat_nchw.reshape(B, C, HW)
    itemsize = x.dtype.itemsize

    # Small parameters: bf16 weights (native MXU path, half the VMEM), f32 biases,
    # class dim zero-padded to a lane-dense multiple of 128.
    ncls_pad = ((ncls + 127) // 128) * 128
    w1b = w1.astype(jnp.bfloat16)
    w2p = jnp.zeros((hidden, ncls_pad), jnp.bfloat16).at[:, :ncls].set(w2.astype(jnp.bfloat16))
    b1r = jnp.asarray(b1, jnp.float32).reshape(1, hidden)
    b2p = jnp.zeros((1, ncls_pad), jnp.float32).at[0, :ncls].set(b2.astype(jnp.float32))
    p_arr = jnp.asarray(p, jnp.float32).reshape(1)

    # Static-p specialization (concrete at trace time -> no EUP on the big tensor).
    try:
        static_p = float(jnp.asarray(p).reshape(()))
    except Exception:
        static_p = None
    p_int = None
    if static_p is not None:
        r = round(static_p)
        if abs(static_p - r) < 1e-12 and 1 <= r <= 8:
            p_int = int(r)

    # ---- generation-aware tiling (v5e/v6e: 128 MiB VMEM, v7x: 64 MiB) ----
    vmem_cap = _vmem_capacity_bytes()
    hard_cap = max(32 << 20, min(100 << 20, vmem_cap - (16 << 20)))

    # Channel chunk: multiple of 8 that divides C (must divide C exactly so no
    # garbage channels are accumulated); bounds elementwise temps and streams w1.
    if cc is None:
        cc = C
        if C > 512:
            for cand in range(512, 7, -8):
                if C % cand == 0:
                    cc = cand
                    break
    else:
        cc = int(cc)
        if C % cc != 0 or (cc % 8 != 0 and cc != C):
            cc = C
    n_c = C // cc

    # Batch tile from a VMEM budget (double-buffered input slab + ~3x f32 temp
    # headroom), capped so the "parallel" batch axis keeps enough grid steps
    # for pipelining and v7x's two TensorCores.
    row_bytes = cc * HW * (2 * itemsize + 3 * 4)
    fixed_bytes = (2 * cc * hidden * 2
                   + 2 * (hidden * 2 + hidden * ncls_pad * 2 + ncls_pad * 4))
    if tb is None:
        budget = int(hard_cap * 0.8) - fixed_bytes
        tb = max(1, budget // max(row_bytes, 1))
        if B >= 64:
            depth_cap = max(8, (B // 4) // 8 * 8)
        elif B >= 16:
            depth_cap = max(8, (B // 2) // 8 * 8)
        else:
            depth_cap = 8
        tb = min(tb, depth_cap, 128)
    tb = int(tb)
    if B < 8:
        tb = B                                   # block dim == full array dim is legal
    else:
        tb = max(8, min((tb // 8) * 8, ((B + 7) // 8) * 8))
    n_b = pl.cdiv(B, tb)                         # partial last batch tile is safe:
    grid = (n_b, n_c)                            # garbage rows only affect discarded rows

    est_vmem = (2 * tb * cc * HW * itemsize      # input double buffer
                + 3 * tb * cc * HW * 4           # f32 elementwise temp headroom
                + fixed_bytes                    # streamed / resident params
                + tb * hidden * 4                # h accumulator scratch
                + 2 * tb * ncls_pad * 4)         # output double buffer
    vmem_limit = int(min(hard_cap, max(32 << 20, int(1.5 * est_vmem))))

    # Advisory cost hint so XLA overlaps this call with neighbouring backbone ops.
    n_elem = B * C * HW
    flops = 4 * n_elem + 2 * B * (C * hidden + hidden * ncls_pad)
    transc = 2 * B * C + (0 if p_int is not None else 2 * n_elem)
    bytes_acc = (n_elem * itemsize + C * hidden * 2 + hidden * ncls_pad * 2
                 + (hidden + ncls_pad) * 4 + B * ncls_pad * 4 + 4)
    cost = pl.CostEstimate(flops=int(flops), transcendentals=int(transc),
                           bytes_accessed=int(bytes_acc))

    kernel = _make_kernel(1.0 / float(HW), static_p, p_int)

    out = pl.pallas_call(
        kernel,
        out_shape=jax.ShapeDtypeStruct((B, ncls_pad), jnp.float32),
        grid=grid,
        in_specs=[
            pl.BlockSpec(memory_space=pltpu.MemorySpace.SMEM),         # p (scalar)
            pl.BlockSpec((tb, cc, HW), lambda b, c: (b, c, 0)),        # features (native NCHW)
            pl.BlockSpec((cc, hidden), lambda b, c: (c, 0)),           # w1 (streamed over C)
            pl.BlockSpec((1, hidden), lambda b, c: (0, 0)),            # b1 (resident, tiny)
            pl.BlockSpec((hidden, ncls_pad), lambda b, c: (0, 0)),     # w2 (resident, tiny)
            pl.BlockSpec((1, ncls_pad), lambda b, c: (0, 0)),          # b2 (resident, tiny)
        ],
        out_specs=pl.BlockSpec((tb, ncls_pad), lambda b, c: (b, 0)),
        scratch_shapes=[pltpu.VMEM((tb, hidden), jnp.float32)],
        compiler_params=pltpu.CompilerParams(
            dimension_semantics=("parallel", "arbitrary"),
            vmem_limit_bytes=vmem_limit,
        ),
        cost_estimate=cost,
    )(p_arr, x, w1b, b1r, w2p, b2p)

    return out[:, :ncls]


def reference_forward(feat_nchw, p, w1, b1, w2, b2):
    """Pure-JAX reference mirroring the PyTorch module (eval mode), f32."""
    pv = jnp.asarray(p, jnp.float32).reshape(())
    x = jnp.clip(feat_nchw.astype(jnp.float32), EPS, None) ** pv
    pooled = jnp.mean(x, axis=(2, 3)) ** (1.0 / pv)            # GeM -> (B, C)
    h = pooled @ w1 + b1
    h = h * jax.nn.sigmoid(h)                                  # SiLU
    return h @ w2 + b2                                         # Dropout: eval identity


if __name__ == "__main__":
    key = jax.random.PRNGKey(0)
    k_feat, k_w1, k_b1, k_w2, k_b2 = jax.random.split(key, 5)

    # Small shapes: batch=16, backbone feature channels=128, spatial 16x16.
    B, C, H, W = 16, 128, 16, 16
    HIDDEN, NCLS = 512, 4  # head: Linear(C, 512) -> SiLU -> Dropout -> Linear(512, 4)

    # Backbone feature map stand-in (positive activations, typical post-act).
    feat = jax.random.uniform(k_feat, (B, C, H, W), jnp.float32, 0.0, 2.0)

    # Deterministic parameter init (PyTorch Linear default: U(-1/sqrt(fan_in), +)).
    p_gem = jnp.array([3.0], jnp.float32)
    lim1 = 1.0 / (C ** 0.5)
    w1 = jax.random.uniform(k_w1, (C, HIDDEN), jnp.float32, -lim1, lim1)
    b1 = jax.random.uniform(k_b1, (HIDDEN,), jnp.float32, -lim1, lim1)
    lim2 = 1.0 / (HIDDEN ** 0.5)
    w2 = jax.random.uniform(k_w2, (HIDDEN, NCLS), jnp.float32, -lim2, lim2)
    b2 = jax.random.uniform(k_b2, (HIDDEN and NCLS,), jnp.float32, -lim2, lim2)

    ref = reference_forward(feat, p_gem, w1, b1, w2, b2)

    # Static-p fast path (p is a closed-over constant -> pure-VPU x*x*x).
    # tb=8 / cc=64 so the demo exercises a 2x2 pipelined grid with C accumulation.
    out = jax.jit(
        lambda f: netclassifier_forward(f, p_gem, w1, b1, w2, b2, tb=8, cc=64)
    )(feat)
    out = jax.block_until_ready(out)
    assert out.shape == (B, NCLS)
    assert jnp.allclose(out, ref, atol=3e-2, rtol=3e-2), (out, ref)

    # Traced-p fallback path (p is a jit argument -> exp(p*log(x)) in-kernel).
    out_traced = jax.jit(
        lambda pv: netclassifier_forward(feat, pv, w1, b1, w2, b2, tb=8, cc=64)
    )(p_gem)
    out_traced = jax.block_until_ready(out_traced)
    assert jnp.allclose(out_traced, ref, atol=3e-2, rtol=3e-2), (out_traced, ref)

    print("KERNEL_OK")
</pallas_src>

<mosaic_0001>
module attributes {stable_mosaic.version = 11 : i64} {
  func.func @kernel(%arg0: i32, %arg1: i32, %arg2: memref<1xf32, #tpu.memory_space<smem>>, %arg3: memref<8x64x256xf32, #tpu.memory_space<vmem>>, %arg4: memref<64x512xbf16, #tpu.memory_space<vmem>>, %arg5: memref<1x512xf32, #tpu.memory_space<vmem>>, %arg6: memref<512x128xbf16, #tpu.memory_space<vmem>>, %arg7: memref<1x128xf32, #tpu.memory_space<vmem>>, %arg8: memref<8x128xf32, #tpu.memory_space<vmem>>, %arg9: memref<8x512xf32, #tpu.memory_space<vmem>>) attributes {dimension_semantics = [#tpu.dimension_semantics<parallel>, #tpu.dimension_semantics<arbitrary>], iteration_bounds = array<i64: 2, 2>, scalar_prefetch = 0 : i64, scratch_operands = 1 : i64, tpu.core_type = #tpu.core_type<tc>, window_params = [{transform_indices = @transform_0, window_bounds = array<i64: 1>}, {transform_indices = @transform_1, window_bounds = array<i64: 8, 64, 256>}, {transform_indices = @transform_2, window_bounds = array<i64: 64, 512>}, {pipeline_mode = #tpu.pipeline_mode<synchronous>, transform_indices = @transform_3, window_bounds = array<i64: 1, 512>}, {pipeline_mode = #tpu.pipeline_mode<synchronous>, transform_indices = @transform_4, window_bounds = array<i64: 512, 128>}, {pipeline_mode = #tpu.pipeline_mode<synchronous>, transform_indices = @transform_5, window_bounds = array<i64: 1, 128>}, {transform_indices = @transform_6, window_bounds = array<i64: 8, 128>}]} {
    %c0_i32 = arith.constant 0 : i32
    %0 = arith.cmpi eq, %arg1, %c0_i32 : i32
    %1 = arith.extui %0 : i1 to i32
    %c0_i32_0 = arith.constant 0 : i32
    %2 = arith.cmpi ne, %1, %c0_i32_0 : i32
    scf.if %2 {
      %cst_16 = arith.constant 0.000000e+00 : f32
      %29 = vector.broadcast %cst_16 : f32 to vector<8x512xf32>
      %c0_17 = arith.constant 0 : index
      %c0_18 = arith.constant 0 : index
      %30 = vector.load %arg9[%c0_17, %c0_18] : memref<8x512xf32, #tpu.memory_space<vmem>>, vector<8x512xf32>
      tpu.vector_store %arg9[%c0_17, %c0_18], %29 {strides = array<i32>} : memref<8x512xf32, #tpu.memory_space<vmem>>, vector<8x512xf32>,
    } else {
    }
    %c0 = arith.constant 0 : index
    %c0_1 = arith.constant 0 : index
    %c0_2 = arith.constant 0 : index
    %3 = vector.load %arg3[%c0, %c0_1, %c0_2] : memref<8x64x256xf32, #tpu.memory_space<vmem>>, vector<8x64x256xf32>
    %cst = arith.constant 9.99999997E-7 : f32
    %4 = vector.broadcast %cst : f32 to vector<8x64x256xf32>
    %5 = arith.maximumf %3, %4 : vector<8x64x256xf32>
    %c0_3 = arith.constant 0 : index
    %6 = memref.load %arg2[%c0_3] : memref<1xf32, #tpu.memory_space<smem>>
    %7 = math.log %5 : vector<8x64x256xf32>
    %8 = vector.broadcast %6 : f32 to vector<8x64x256xf32>
    %9 = arith.mulf %8, %7 : vector<8x64x256xf32>
    %10 = math.exp %9 : vector<8x64x256xf32>
    %cst_4 = arith.constant dense<0.000000e+00> : vector<8x64xf32>
    %11 = vector.multi_reduction <add>, %10, %cst_4 [2] : vector<8x64x256xf32> to vector<8x64xf32>
    %cst_5 = arith.constant 3.906250e-03 : f32
    %12 = vector.broadcast %cst_5 : f32 to vector<8x64xf32>
    %13 = arith.mulf %11, %12 : vector<8x64xf32>
    %c0_6 = arith.constant 0 : index
    %14 = memref.load %arg2[%c0_6] : memref<1xf32, #tpu.memory_space<smem>>
    %cst_7 = arith.constant 1.000000e+00 : f32
    %15 = arith.divf %cst_7, %14 : f32
    %16 = math.log %13 : vector<8x64xf32>
    %17 = vector.broadcast %15 : f32 to vector<8x64xf32>
    %18 = arith.mulf %17, %16 : vector<8x64xf32>
    %19 = math.exp %18 : vector<8x64xf32>
    %c0_8 = arith.constant 0 : index
    %c0_9 = arith.constant 0 : index
    %20 = vector.load %arg9[%c0_8, %c0_9] : memref<8x512xf32, #tpu.memory_space<vmem>>, vector<8x512xf32>
    %21 = arith.truncf %19 : vector<8x64xf32> to vector<8x64xbf16>
    %c0_10 = arith.constant 0 : index
    %c0_11 = arith.constant 0 : index
    %22 = vector.load %arg4[%c0_10, %c0_11] : memref<64x512xbf16, #tpu.memory_space<vmem>>, vector<64x512xbf16>
    %cst_12 = arith.constant dense<0.000000e+00> : vector<8x512xf32>
    %23 = tpu.matmul %21, %22, %cst_12 {dimension_numbers = #tpu.dot_dimension_numbers<[1], [0], [0], [1], [0, 0, 1, 1], [], []>} : vector<8x64xbf16>, vector<64x512xbf16>, vector<8x512xf32> -> vector<8x512xf32>
    %24 = arith.addf %20, %23 : vector<8x512xf32>
    %c0_13 = arith.constant 0 : index
    %c0_14 = arith.constant 0 : index
    %25 = vector.load %arg9[%c0_13, %c0_14] : memref<8x512xf32, #tpu.memory_space<vmem>>, vector<8x512xf32>
    tpu.vector_store %arg9[%c0_13, %c0_14], %24 {strides = array<i32>} : memref<8x512xf32, #tpu.memory_space<vmem>>, vector<8x512xf32>,
    %c1_i32 = arith.constant 1 : i32
    %26 = arith.cmpi eq, %arg1, %c1_i32 : i32
    %27 = arith.extui %26 : i1 to i32
    %c0_i32_15 = arith.constant 0 : i32
    %28 = arith.cmpi ne, %27, %c0_i32_15 : i32
    scf.if %28 {
      %c0_16 = arith.constant 0 : index
      %c0_17 = arith.constant 0 : index
      %29 = vector.load %arg9[%c0_16, %c0_17] : memref<8x512xf32, #tpu.memory_space<vmem>>, vector<8x512xf32>
      %c0_18 = arith.constant 0 : index
      %c0_19 = arith.constant 0 : index
      %30 = vector.load %arg5[%c0_18, %c0_19] : memref<1x512xf32, #tpu.memory_space<vmem>>, vector<1x512xf32>
      %31 = vector.broadcast %30 : vector<1x512xf32> to vector<8x512xf32>
      %32 = arith.addf %29, %31 : vector<8x512xf32>
      %33 = arith.negf %32 : vector<8x512xf32>
      %34 = math.exp %33 : vector<8x512xf32>
      %cst_20 = arith.constant 1.000000e+00 : f32
      %35 = vector.broadcast %cst_20 : f32 to vector<8x512xf32>
      %36 = arith.addf %35, %34 : vector<8x512xf32>
      %37 = arith.divf %35, %36 : vector<8x512xf32>
      %38 = arith.mulf %32, %37 : vector<8x512xf32>
      %39 = arith.truncf %38 : vector<8x512xf32> to vector<8x512xbf16>
      %c0_21 = arith.constant 0 : index
      %c0_22 = arith.constant 0 : index
      %40 = vector.load %arg6[%c0_21, %c0_22] : memref<512x128xbf16, #tpu.memory_space<vmem>>, vector<512x128xbf16>
      %cst_23 = arith.constant dense<0.000000e+00> : vector<8x128xf32>
      %41 = tpu.matmul %39, %40, %cst_23 {dimension_numbers = #tpu.dot_dimension_numbers<[1], [0], [0], [1], [0, 0, 1, 1], [], []>} : vector<8x512xbf16>, vector<512x128xbf16>, vector<8x128xf32> -> vector<8x128xf32>
      %c0_24 = arith.constant 0 : index
      %c0_25 = arith.constant 0 : index
      %42 = vector.load %arg7[%c0_24, %c0_25] : memref<1x128xf32, #tpu.memory_space<vmem>>, vector<1x128xf32>
      %43 = vector.broadcast %42 : vector<1x128xf32> to vector<8x128xf32>
      %44 = arith.addf %41, %43 : vector<8x128xf32>
      %c0_26 = arith.constant 0 : index
      %c0_27 = arith.constant 0 : index
      %45 = vector.load %arg8[%c0_26, %c0_27] : memref<8x128xf32, #tpu.memory_space<vmem>>, vector<8x128xf32>
      tpu.vector_store %arg8[%c0_26, %c0_27], %44 {strides = array<i32>} : memref<8x128xf32, #tpu.memory_space<vmem>>, vector<8x128xf32>,
    } else {
    }
    return
  }
  func.func @transform_0(%arg0: i32, %arg1: i32) -> i32 {
    %c0_i32 = arith.constant 0 : i32
    %c0_i32_0 = arith.constant 0 : i32
    return %c0_i32 : i32
  }
  func.func @transform_1(%arg0: i32, %arg1: i32) -> (i32, i32, i32) {
    %c0_i32 = arith.constant 0 : i32
    %c0_i32_0 = arith.constant 0 : i32
    return %arg0, %arg1, %c0_i32 : i32, i32, i32
  }
  func.func @transform_2(%arg0: i32, %arg1: i32) -> (i32, i32) {
    %c0_i32 = arith.constant 0 : i32
    %c0_i32_0 = arith.constant 0 : i32
    return %arg1, %c0_i32 : i32, i32
  }
  func.func @transform_3(%arg0: i32, %arg1: i32) -> (i32, i32) {
    %c0_i32 = arith.constant 0 : i32
    %c0_i32_0 = arith.constant 0 : i32
    %c0_i32_1 = arith.constant 0 : i32
    return %c0_i32, %c0_i32_0 : i32, i32
  }
  func.func @transform_4(%arg0: i32, %arg1: i32) -> (i32, i32) {
    %c0_i32 = arith.constant 0 : i32
    %c0_i32_0 = arith.constant 0 : i32
    %c0_i32_1 = arith.constant 0 : i32
    return %c0_i32, %c0_i32_0 : i32, i32
  }
  func.func @transform_5(%arg0: i32, %arg1: i32) -> (i32, i32) {
    %c0_i32 = arith.constant 0 : i32
    %c0_i32_0 = arith.constant 0 : i32
    %c0_i32_1 = arith.constant 0 : i32
    return %c0_i32, %c0_i32_0 : i32, i32
  }
  func.func @transform_6(%arg0: i32, %arg1: i32) -> (i32, i32) {
    %c0_i32 = arith.constant 0 : i32
    %c0_i32_0 = arith.constant 0 : i32
    return %arg0, %c0_i32 : i32, i32
  }
}

</mosaic_0001>

<bundles_post_ra>
// kernel: _lambda_.1
= control target key start
LH: loop header
LB: loop body
LE: loop exit
PB: predicated region body
PF: predicated region fallthrough
CT: control target
= control target key end

     0   :  { %s5395_s0 = inlined_call_operand.<no memory space> [shape: f32[1], index: 0, kind: input, shape index: {}]   ;;  %s5396_s1 = inlined_call_operand.vmem [shape: f32[16,128,256], index: 1, kind: input, shape index: {}]   ;;  %s5397_s2 = inlined_call_operand.vmem [shape: bf16[128,512], index: 2, kind: input, shape index: {}]   ;;  %s5398_s3 = inlined_call_operand.vmem [shape: f32[1,512], index: 3, kind: input, shape index: {}]   ;;  %s5399_s4 = inlined_call_operand.vmem [shape: bf16[512,128], index: 4, kind: input, shape index: {}]   ;;  %s5400_s5 = inlined_call_operand.vmem [shape: f32[1,128], index: 5, kind: input, shape index: {}]   ;;  %s5401_s6 = inlined_call_operand.vmem [shape: f32[16,128], index: 6, kind: output, shape index: {}]  }
   0x1   :  { %11 = sst [smem:[#allocation3]] %s5395_s0 }
   0x2   :  { %s4229_s23 = smov 0   ;;  %s4231_s24 = smov 0  }
   0x3   :  { %s4233_s25 = smov 0   ;;  %s4235_s26 = smov 0  }
   0x4   :  { %s4237_s27 = smov 0   ;;  %s4239_s28 = smov 0  }
   0x5   :  { %s4241_s29 = smov 0  }
   0x6 LB: > { %s26_s0 = sadd.s32 1, %s4180_s27  ;;  %s29_s30 = sadd.s32 1, %s4184_s28  ;;  %s4188_s29 = sphi %s4241_s29, %s17_s29   ;;  %s4184_s28 = sphi %s4239_s28, %s5421_s28   ;;  %s4180_s27 = sphi %s4237_s27, %s5420_s27   ;;  %s4176_s26 = sphi %s4235_s26, %s5419_s26   ;;  %s4172_s25 = sphi %s4233_s25, %s5418_s25   ;;  %s4168_s24 = sphi %s4231_s24, %s5417_s24   ;;  %s4164_s23 = sphi %s4229_s23, %s5416_s23  }
   0x7   : > { %p27_p0 = scmp.ge.s32.totalorder %s26_s0, 2  ;;  %p66_p1 = scmp.ne.s32.totalorder %s4168_s24, %s4164_s23 }
   0x8   : > { %p67_p2 = scmp.eq.s32.totalorder %s4188_s29, 0  ;;  %s59_s10 = sadd.s32 1, %s4168_s24 }
   0x9   : > { %s5423_s0 = smov (%p27_p0, %s26_s0), 0  ;;  %s5425_s30 = smov (!%p27_p0, %s29_s30), %s4184_s28 }
   0xa   : > { %p68_p3 = por %p67_p2, %p66_p1  ;;  %p31_p4 = scmp.ge.s32.totalorder %s5425_s30, 2 }
   0xb   : > { %s55_s7 = ssub.s32 %s4180_s27, %s5423_s0  ;;  %p3020_p6 = scmp.ge.s32.totalorder %s4188_s29, 4 }
   0xc   : > { %s5427_s30 = smov (%p31_p4, %s5425_s30), 0 }
   0xd   : > { %s54_s8 = ssub.s32 %s4184_s28, %s5427_s30  ;;  %219 = sbr.rel (%p3020_p6) target bundleno = 153 (0x99), region = 32 }
   0xe   : > { %s56_s9 = sor.u32 %s55_s7, %s54_s8 }
   0xf   : > { %p57_p5 = scmp.eq.s32.totalorder %s56_s9, 0 }
  0x11   : > { %s4280_s11 = scalar_select %p57_p5, %s4168_s24, %s59_s10  }
  0x12   : > { %222 = sbr.rel (!%p68_p3) target bundleno = 153 (0x99), region = 36  ;;  %s224_s12 = sand.u32 (%p68_p3), 1, %s4168_s24  }
  0x13   : > { %s3237_s13 = sshll.u32 (%p68_p3), %s4180_s27, 4  ;;  %s3021_s14 = sshll.u32 (%p68_p3), %s224_s12, 10 }
  0x14   : > { %s3238_s15 = sshll.u32 (%p68_p3), %s4184_s28, 8  ;;  %s4294_s21 = scalar_lea.vmem (%p68_p3), [#allocation4], %s3021_s14 }
  0x15   : > { %s231_s16 = sadd.s32 (%p68_p3), %s3238_s15, %s3237_s13 }
  0x16   : > { %s3026_s17 = sshll.u32 (%p68_p3), %s231_s16, 3 }
  0x17   : > { %s4289_s20 = scalar_lea.vmem %s5396_s1, %s3026_s17 }
  0x18   : > { %v246_v0 = vld [vmem:[%s4289_s20] sm:$0xff]  ;;  %v248_v1 = vld [vmem:[%s4289_s20 + $0x8] sm:$0xff]  ;;  %v250_v2 = vld [vmem:[%s4289_s20 + $0x10] sm:$0xff] }
  0x19   : > { %247 = vst [vmem:[%s4294_s21] sm:$0xff] %v246_v0  ;;  %v252_v3 = vld [vmem:[%s4289_s20 + $0x18] sm:$0xff]  ;;  %v254_v4 = vld [vmem:[%s4289_s20 + $0x20] sm:$0xff]  ;;  %v256_v5 = vld [vmem:[%s4289_s20 + $0x28] sm:$0xff] }
  0x1a   : > { %249 = vst [vmem:[%s4294_s21 + $0x8] sm:$0xff] %v248_v1  ;;  %v258_v6 = vld [vmem:[%s4289_s20 + $0x30] sm:$0xff]  ;;  %v260_v7 = vld [vmem:[%s4289_s20 + $0x38] sm:$0xff]  ;;  %v262_v8 = vld [vmem:[%s4289_s20 + $0x40] sm:$0xff] }
  0x1b   : > { %251 = vst [vmem:[%s4294_s21 + $0x10] sm:$0xff] %v250_v2  ;;  %v264_v9 = vld [vmem:[%s4289_s20 + $0x48] sm:$0xff]  ;;  %v266_v10 = vld [vmem:[%s4289_s20 + $0x50] sm:$0xff]  ;;  %v268_v11 = vld [vmem:[%s4289_s20 + $0x58] sm:$0xff] }
  0x1c   : > { %253 = vst [vmem:[%s4294_s21 + $0x18] sm:$0xff] %v252_v3  ;;  %v270_v12 = vld [vmem:[%s4289_s20 + $0x60] sm:$0xff]  ;;  %v272_v13 = vld [vmem:[%s4289_s20 + $0x68] sm:$0xff]  ;;  %v274_v14 = vld [vmem:[%s4289_s20 + $0x70] sm:$0xff] }
  0x1d   : > { %255 = vst [vmem:[%s4294_s21 + $0x20] sm:$0xff] %v254_v4  ;;  %v276_v15 = vld [vmem:[%s4289_s20 + $0x78] sm:$0xff]  ;;  %v278_v16 = vld [vmem:[%s4289_s20 + $0x100] sm:$0xff]  ;;  %v280_v17 = vld [vmem:[%s4289_s20 + $0x108] sm:$0xff] }
  0x1e   : > { %257 = vst [vmem:[%s4294_s21 + $0x28] sm:$0xff] %v256_v5  ;;  %v282_v18 = vld [vmem:[%s4289_s20 + $0x110] sm:$0xff]  ;;  %v284_v19 = vld [vmem:[%s4289_s20 + $0x118] sm:$0xff]  ;;  %v286_v20 = vld [vmem:[%s4289_s20 + $0x120] sm:$0xff] }
  0x1f   : > { %259 = vst [vmem:[%s4294_s21 + $0x30] sm:$0xff] %v258_v6  ;;  %v288_v21 = vld [vmem:[%s4289_s20 + $0x128] sm:$0xff]  ;;  %v290_v22 = vld [vmem:[%s4289_s20 + $0x130] sm:$0xff]  ;;  %v292_v23 = vld [vmem:[%s4289_s20 + $0x138] sm:$0xff] }
  0x20   : > { %261 = vst [vmem:[%s4294_s21 + $0x38] sm:$0xff] %v260_v7  ;;  %v294_v24 = vld [vmem:[%s4289_s20 + $0x140] sm:$0xff]  ;;  %v296_v25 = vld [vmem:[%s4289_s20 + $0x148] sm:$0xff]  ;;  %v298_v26 = vld [vmem:[%s4289_s20 + $0x150] sm:$0xff] }
  0x21   : > { %263 = vst [vmem:[%s4294_s21 + $0x40] sm:$0xff] %v262_v8  ;;  %v300_v27 = vld [vmem:[%s4289_s20 + $0x158] sm:$0xff]  ;;  %v302_v28 = vld [vmem:[%s4289_s20 + $0x160] sm:$0xff]  ;;  %v304_v29 = vld [vmem:[%s4289_s20 + $0x168] sm:$0xff] }
  0x22   : > { %265 = vst [vmem:[%s4294_s21 + $0x48] sm:$0xff] %v264_v9  ;;  %v306_v30 = vld [vmem:[%s4289_s20 + $0x170] sm:$0xff]  ;;  %v308_v31 = vld [vmem:[%s4289_s20 + $0x178] sm:$0xff]  ;;  %v310_v32 = vld [vmem:[%s4289_s20 + $0x200] sm:$0xff] }
  0x23   : > { %267 = vst [vmem:[%s4294_s21 + $0x50] sm:$0xff] %v266_v10  ;;  %v312_v33 = vld [vmem:[%s4289_s20 + $0x208] sm:$0xff]  ;;  %v314_v34 = vld [vmem:[%s4289_s20 + $0x210] sm:$0xff]  ;;  %v316_v35 = vld [vmem:[%s4289_s20 + $0x218] sm:$0xff] }
  0x24   : > { %269 = vst [vmem:[%s4294_s21 + $0x58] sm:$0xff] %v268_v11  ;;  %v318_v36 = vld [vmem:[%s4289_s20 + $0x220] sm:$0xff]  ;;  %v320_v37 = vld [vmem:[%s4289_s20 + $0x228] sm:$0xff]  ;;  %v322_v38 = vld [vmem:[%s4289_s20 + $0x230] sm:$0xff] }
  0x25   : > { %271 = vst [vmem:[%s4294_s21 + $0x60] sm:$0xff] %v270_v12  ;;  %v324_v39 = vld [vmem:[%s4289_s20 + $0x238] sm:$0xff]  ;;  %v326_v40 = vld [vmem:[%s4289_s20 + $0x240] sm:$0xff]  ;;  %v328_v41 = vld [vmem:[%s4289_s20 + $0x248] sm:$0xff] }
  0x26   : > { %273 = vst [vmem:[%s4294_s21 + $0x68] sm:$0xff] %v272_v13  ;;  %v330_v42 = vld [vmem:[%s4289_s20 + $0x250] sm:$0xff]  ;;  %v332_v43 = vld [vmem:[%s4289_s20 + $0x258] sm:$0xff]  ;;  %v334_v44 = vld [vmem:[%s4289_s20 + $0x260] sm:$0xff] }
  0x27   : > { %275 = vst [vmem:[%s4294_s21 + $0x70] sm:$0xff] %v274_v14  ;;  %v336_v45 = vld [vmem:[%s4289_s20 + $0x268] sm:$0xff]  ;;  %v338_v46 = vld [vmem:[%s4289_s20 + $0x270] sm:$0xff]  ;;  %v340_v47 = vld [vmem:[%s4289_s20 + $0x278] sm:$0xff] }
  0x28   : > { %277 = vst [vmem:[%s4294_s21 + $0x78] sm:$0xff] %v276_v15  ;;  %v342_v48 = vld [vmem:[%s4289_s20 + $0x300] sm:$0xff]  ;;  %v344_v49 = vld [vmem:[%s4289_s20 + $0x308] sm:$0xff]  ;;  %v346_v50 = vld [vmem:[%s4289_s20 + $0x310] sm:$0xff] }
  0x29   : > { %279 = vst [vmem:[%s4294_s21 + $0x80] sm:$0xff] %v278_v16  ;;  %v348_v51 = vld [vmem:[%s4289_s20 + $0x318] sm:$0xff]  ;;  %v350_v52 = vld [vmem:[%s4289_s20 + $0x320] sm:$0xff]  ;;  %v352_v53 = vld [vmem:[%s4289_s20 + $0x328] sm:$0xff] }
  0x2a   : > { %281 = vst [vmem:[%s4294_s21 + $0x88] sm:$0xff] %v280_v17  ;;  %v354_v54 = vld [vmem:[%s4289_s20 + $0x330] sm:$0xff]  ;;  %v356_v55 = vld [vmem:[%s4289_s20 + $0x338] sm:$0xff]  ;;  %v358_v56 = vld [vmem:[%s4289_s20 + $0x340] sm:$0xff] }
  0x2b   : > { %283 = vst [vmem:[%s4294_s21 + $0x90] sm:$0xff] %v282_v18  ;;  %v360_v57 = vld [vmem:[%s4289_s20 + $0x348] sm:$0xff]  ;;  %v362_v58 = vld [vmem:[%s4289_s20 + $0x350] sm:$0xff]  ;;  %v364_v59 = vld [vmem:[%s4289_s20 + $0x358] sm:$0xff] }
  0x2c   : > { %285 = vst [vmem:[%s4294_s21 + $0x98] sm:$0xff] %v284_v19  ;;  %v366_v60 = vld [vmem:[%s4289_s20 + $0x360] sm:$0xff]  ;;  %v368_v61 = vld [vmem:[%s4289_s20 + $0x368] sm:$0xff]  ;;  %v370_v62 = vld [vmem:[%s4289_s20 + $0x370] sm:$0xff] }
  0x2d   : > { %287 = vst [vmem:[%s4294_s21 + $0xa0] sm:$0xff] %v286_v20  ;;  %v372_v63 = vld [vmem:[%s4289_s20 + $0x378] sm:$0xff]  ;;  %v374_v0 = vld [vmem:[%s4289_s20 + $0x400] sm:$0xff]  ;;  %v376_v1 = vld [vmem:[%s4289_s20 + $0x408] sm:$0xff] }
  0x2e   : > { %289 = vst [vmem:[%s4294_s21 + $0xa8] sm:$0xff] %v288_v21  ;;  %v378_v2 = vld [vmem:[%s4289_s20 + $0x410] sm:$0xff]  ;;  %v380_v3 = vld [vmem:[%s4289_s20 + $0x418] sm:$0xff]  ;;  %v382_v4 = vld [vmem:[%s4289_s20 + $0x420] sm:$0xff] }
  0x2f   : > { %291 = vst [vmem:[%s4294_s21 + $0xb0] sm:$0xff] %v290_v22  ;;  %v384_v5 = vld [vmem:[%s4289_s20 + $0x428] sm:$0xff]  ;;  %v386_v6 = vld [vmem:[%s4289_s20 + $0x430] sm:$0xff]  ;;  %v388_v7 = vld [vmem:[%s4289_s20 + $0x438] sm:$0xff] }
  0x30   : > { %293 = vst [vmem:[%s4294_s21 + $0xb8] sm:$0xff] %v292_v23  ;;  %v390_v8 = vld [vmem:[%s4289_s20 + $0x440] sm:$0xff]  ;;  %v392_v9 = vld [vmem:[%s4289_s20 + $0x448] sm:$0xff]  ;;  %v394_v10 = vld [vmem:[%s4289_s20 + $0x450] sm:$0xff] }
  0x31   : > { %295 = vst [vmem:[%s4294_s21 + $0xc0] sm:$0xff] %v294_v24  ;;  %v396_v11 = vld [vmem:[%s4289_s20 + $0x458] sm:$0xff]  ;;  %v398_v12 = vld [vmem:[%s4289_s20 + $0x460] sm:$0xff]  ;;  %v400_v13 = vld [vmem:[%s4289_s20 + $0x468] sm:$0xff] }
  0x32   : > { %297 = vst [vmem:[%s4294_s21 + $0xc8] sm:$0xff] %v296_v25  ;;  %v402_v14 = vld [vmem:[%s4289_s20 + $0x470] sm:$0xff]  ;;  %v404_v15 = vld [vmem:[%s4289_s20 + $0x478] sm:$0xff]  ;;  %v406_v16 = vld [vmem:[%s4289_s20 + $0x500] sm:$0xff] }
  0x33   : > { %299 = vst [vmem:[%s4294_s21 + $0xd0] sm:$0xff] %v298_v26  ;;  %v408_v17 = vld [vmem:[%s4289_s20 + $0x508] sm:$0xff]  ;;  %v410_v18 = vld [vmem:[%s4289_s20 + $0x510] sm:$0xff]  ;;  %v412_v19 = vld [vmem:[%s4289_s20 + $0x518] sm:$0xff] }
  0x34   : > { %301 = vst [vmem:[%s4294_s21 + $0xd8] sm:$0xff] %v300_v27  ;;  %v414_v20 = vld [vmem:[%s4289_s20 + $0x520] sm:$0xff]  ;;  %v416_v21 = vld [vmem:[%s4289_s20 + $0x528] sm:$0xff]  ;;  %v418_v22 = vld [vmem:[%s4289_s20 + $0x530] sm:$0xff] }
  0x35   : > { %303 = vst [vmem:[%s4294_s21 + $0xe0] sm:$0xff] %v302_v28  ;;  %v420_v23 = vld [vmem:[%s4289_s20 + $0x538] sm:$0xff]  ;;  %v422_v24 = vld [vmem:[%s4289_s20 + $0x540] sm:$0xff]  ;;  %v424_v25 = vld [vmem:[%s4289_s20 + $0x548] sm:$0xff] }
  0x36   : > { %305 = vst [vmem:[%s4294_s21 + $0xe8] sm:$0xff] %v304_v29  ;;  %v426_v26 = vld [vmem:[%s4289_s20 + $0x550] sm:$0xff]  ;;  %v428_v27 = vld [vmem:[%s4289_s20 + $0x558] sm:$0xff]  ;;  %v430_v28 = vld [vmem:[%s4289_s20 + $0x560] sm:$0xff] }
  0x37   : > { %307 = vst [vmem:[%s4294_s21 + $0xf0] sm:$0xff] %v306_v30  ;;  %v432_v29 = vld [vmem:[%s4289_s20 + $0x568] sm:$0xff]  ;;  %v434_v30 = vld [vmem:[%s4289_s20 + $0x570] sm:$0xff] }
  0x38   : > { %309 = vst [vmem:[%s4294_s21 + $0xf8] sm:$0xff] %v308_v31  ;;  %v436_v31 = vld [vmem:[%s4289_s20 + $0x578] sm:$0xff] }
  0x39   : > { %311 = vst [vmem:[%s4294_s21 + $0x100] sm:$0xff] %v310_v32  ;;  %v438_v32 = vld [vmem:[%s4289_s20 + $0x600] sm:$0xff] }
  0x3a   : > { %313 = vst [vmem:[%s4294_s21 + $0x108] sm:$0xff] %v312_v33  ;;  %v440_v33 = vld [vmem:[%s4289_s20 + $0x608] sm:$0xff] }
  0x3b   : > { %315 = vst [vmem:[%s4294_s21 + $0x110] sm:$0xff] %v314_v34  ;;  %v442_v34 = vld [vmem:[%s4289_s20 + $0x610] sm:$0xff] }
  0x3c   : > { %317 = vst [vmem:[%s4294_s21 + $0x118] sm:$0xff] %v316_v35  ;;  %v444_v35 = vld [vmem:[%s4289_s20 + $0x618] sm:$0xff] }
  0x3d   : > { %319 = vst [vmem:[%s4294_s21 + $0x120] sm:$0xff] %v318_v36  ;;  %v446_v36 = vld [vmem:[%s4289_s20 + $0x620] sm:$0xff] }
  0x3e   : > { %321 = vst [vmem:[%s4294_s21 + $0x128] sm:$0xff] %v320_v37  ;;  %v448_v37 = vld [vmem:[%s4289_s20 + $0x628] sm:$0xff] }
  0x3f   : > { %323 = vst [vmem:[%s4294_s21 + $0x130] sm:$0xff] %v322_v38  ;;  %v450_v38 = vld [vmem:[%s4289_s20 + $0x630] sm:$0xff] }
  0x40   : > { %325 = vst [vmem:[%s4294_s21 + $0x138] sm:$0xff] %v324_v39  ;;  %v452_v39 = vld [vmem:[%s4289_s20 + $0x638] sm:$0xff] }
  0x41   : > { %327 = vst [vmem:[%s4294_s21 + $0x140] sm:$0xff] %v326_v40  ;;  %v454_v40 = vld [vmem:[%s4289_s20 + $0x640] sm:$0xff] }
  0x42   : > { %329 = vst [vmem:[%s4294_s21 + $0x148] sm:$0xff] %v328_v41  ;;  %v456_v41 = vld [vmem:[%s4289_s20 + $0x648] sm:$0xff] }
  0x43   : > { %331 = vst [vmem:[%s4294_s21 + $0x150] sm:$0xff] %v330_v42  ;;  %v458_v42 = vld [vmem:[%s4289_s20 + $0x650] sm:$0xff] }
  0x44   : > { %333 = vst [vmem:[%s4294_s21 + $0x158] sm:$0xff] %v332_v43  ;;  %v460_v43 = vld [vmem:[%s4289_s20 + $0x658] sm:$0xff] }
  0x45   : > { %335 = vst [vmem:[%s4294_s21 + $0x160] sm:$0xff] %v334_v44  ;;  %v462_v44 = vld [vmem:[%s4289_s20 + $0x660] sm:$0xff] }
  0x46   : > { %337 = vst [vmem:[%s4294_s21 + $0x168] sm:$0xff] %v336_v45  ;;  %v464_v45 = vld [vmem:[%s4289_s20 + $0x668] sm:$0xff] }
  0x47   : > { %339 = vst [vmem:[%s4294_s21 + $0x170] sm:$0xff] %v338_v46  ;;  %v466_v46 = vld [vmem:[%s4289_s20 + $0x670] sm:$0xff] }
  0x48   : > { %341 = vst [vmem:[%s4294_s21 + $0x178] sm:$0xff] %v340_v47  ;;  %v468_v47 = vld [vmem:[%s4289_s20 + $0x678] sm:$0xff] }
  0x49   : > { %343 = vst [vmem:[%s4294_s21 + $0x180] sm:$0xff] %v342_v48  ;;  %v470_v48 = vld [vmem:[%s4289_s20 + $0x700] sm:$0xff] }
  0x4a   : > { %345 = vst [vmem:[%s4294_s21 + $0x188] sm:$0xff] %v344_v49  ;;  %v472_v49 = vld [vmem:[%s4289_s20 + $0x708] sm:$0xff] }
  0x4b   : > { %347 = vst [vmem:[%s4294_s21 + $0x190] sm:$0xff] %v346_v50  ;;  %v474_v50 = vld [vmem:[%s4289_s20 + $0x710] sm:$0xff] }
  0x4c   : > { %349 = vst [vmem:[%s4294_s21 + $0x198] sm:$0xff] %v348_v51  ;;  %v476_v51 = vld [vmem:[%s4289_s20 + $0x718] sm:$0xff] }
  0x4d   : > { %351 = vst [vmem:[%s4294_s21 + $0x1a0] sm:$0xff] %v350_v52  ;;  %v478_v52 = vld [vmem:[%s4289_s20 + $0x720] sm:$0xff] }
  0x4e   : > { %353 = vst [vmem:[%s4294_s21 + $0x1a8] sm:$0xff] %v352_v53  ;;  %v480_v53 = vld [vmem:[%s4289_s20 + $0x728] sm:$0xff] }
  0x4f   : > { %355 = vst [vmem:[%s4294_s21 + $0x1b0] sm:$0xff] %v354_v54  ;;  %v482_v54 = vld [vmem:[%s4289_s20 + $0x730] sm:$0xff] }
  0x50   : > { %357 = vst [vmem:[%s4294_s21 + $0x1b8] sm:$0xff] %v356_v55  ;;  %v484_v55 = vld [vmem:[%s4289_s20 + $0x738] sm:$0xff] }
  0x51   : > { %359 = vst [vmem:[%s4294_s21 + $0x1c0] sm:$0xff] %v358_v56  ;;  %v486_v56 = vld [vmem:[%s4289_s20 + $0x740] sm:$0xff] }
  0x52   : > { %361 = vst [vmem:[%s4294_s21 + $0x1c8] sm:$0xff] %v360_v57  ;;  %v488_v57 = vld [vmem:[%s4289_s20 + $0x748] sm:$0xff] }
  0x53   : > { %363 = vst [vmem:[%s4294_s21 + $0x1d0] sm:$0xff] %v362_v58  ;;  %v490_v58 = vld [vmem:[%s4289_s20 + $0x750] sm:$0xff] }
  0x54   : > { %365 = vst [vmem:[%s4294_s21 + $0x1d8] sm:$0xff] %v364_v59  ;;  %v492_v59 = vld [vmem:[%s4289_s20 + $0x758] sm:$0xff] }
  0x55   : > { %367 = vst [vmem:[%s4294_s21 + $0x1e0] sm:$0xff] %v366_v60  ;;  %v494_v60 = vld [vmem:[%s4289_s20 + $0x760] sm:$0xff] }
  0x56   : > { %369 = vst [vmem:[%s4294_s21 + $0x1e8] sm:$0xff] %v368_v61  ;;  %v496_v61 = vld [vmem:[%s4289_s20 + $0x768] sm:$0xff] }
  0x57   : > { %371 = vst [vmem:[%s4294_s21 + $0x1f0] sm:$0xff] %v370_v62  ;;  %v498_v62 = vld [vmem:[%s4289_s20 + $0x770] sm:$0xff] }
  0x58   : > { %373 = vst [vmem:[%s4294_s21 + $0x1f8] sm:$0xff] %v372_v63  ;;  %v500_v63 = vld [vmem:[%s4289_s20 + $0x778] sm:$0xff] }
  0x59   : > { %375 = vst [vmem:[%s4294_s21 + $0x200] sm:$0xff] %v374_v0 }
  0x5a   : > { %377 = vst [vmem:[%s4294_s21 + $0x208] sm:$0xff] %v376_v1 }
  0x5b   : > { %379 = vst [vmem:[%s4294_s21 + $0x210] sm:$0xff] %v378_v2 }
  0x5c   : > { %381 = vst [vmem:[%s4294_s21 + $0x218] sm:$0xff] %v380_v3 }
  0x5d   : > { %383 = vst [vmem:[%s4294_s21 + $0x220] sm:$0xff] %v382_v4 }
  0x5e   : > { %385 = vst [vmem:[%s4294_s21 + $0x228] sm:$0xff] %v384_v5 }
  0x5f   : > { %387 = vst [vmem:[%s4294_s21 + $0x230] sm:$0xff] %v386_v6 }
  0x60   : > { %389 = vst [vmem:[%s4294_s21 + $0x238] sm:$0xff] %v388_v7 }
  0x61   : > { %391 = vst [vmem:[%s4294_s21 + $0x240] sm:$0xff] %v390_v8 }
  0x62   : > { %393 = vst [vmem:[%s4294_s21 + $0x248] sm:$0xff] %v392_v9 }
  0x63   : > { %395 = vst [vmem:[%s4294_s21 + $0x250] sm:$0xff] %v394_v10 }
  0x64   : > { %397 = vst [vmem:[%s4294_s21 + $0x258] sm:$0xff] %v396_v11 }
  0x65   : > { %399 = vst [vmem:[%s4294_s21 + $0x260] sm:$0xff] %v398_v12 }
  0x66   : > { %401 = vst [vmem:[%s4294_s21 + $0x268] sm:$0xff] %v400_v13 }
  0x67   : > { %403 = vst [vmem:[%s4294_s21 + $0x270] sm:$0xff] %v402_v14 }
  0x68   : > { %405 = vst [vmem:[%s4294_s21 + $0x278] sm:$0xff] %v404_v15 }
  0x69   : > { %407 = vst [vmem:[%s4294_s21 + $0x280] sm:$0xff] %v406_v16 }
  0x6a   : > { %409 = vst [vmem:[%s4294_s21 + $0x288] sm:$0xff] %v408_v17 }
  0x6b   : > { %411 = vst [vmem:[%s4294_s21 + $0x290] sm:$0xff] %v410_v18 }
  0x6c   : > { %413 = vst [vmem:[%s4294_s21 + $0x298] sm:$0xff] %v412_v19 }
  0x6d   : > { %415 = vst [vmem:[%s4294_s21 + $0x2a0] sm:$0xff] %v414_v20 }
  0x6e   : > { %417 = vst [vmem:[%s4294_s21 + $0x2a8] sm:$0xff] %v416_v21 }
  0x6f   : > { %419 = vst [vmem:[%s4294_s21 + $0x2b0] sm:$0xff] %v418_v22 }
  0x70   : > { %421 = vst [vmem:[%s4294_s21 + $0x2b8] sm:$0xff] %v420_v23 }
  0x71   : > { %423 = vst [vmem:[%s4294_s21 + $0x2c0] sm:$0xff] %v422_v24 }
  0x72   : > { %425 = vst [vmem:[%s4294_s21 + $0x2c8] sm:$0xff] %v424_v25 }
  0x73   : > { %427 = vst [vmem:[%s4294_s21 + $0x2d0] sm:$0xff] %v426_v26 }
  0x74   : > { %429 = vst [vmem:[%s4294_s21 + $0x2d8] sm:$0xff] %v428_v27 }
  0x75   : > { %431 = vst [vmem:[%s4294_s21 + $0x2e0] sm:$0xff] %v430_v28 }
  0x76   : > { %433 = vst [vmem:[%s4294_s21 + $0x2e8] sm:$0xff] %v432_v29 }
  0x77   : > { %435 = vst [vmem:[%s4294_s21 + $0x2f0] sm:$0xff] %v434_v30 }
  0x78   : > { %437 = vst [vmem:[%s4294_s21 + $0x2f8] sm:$0xff] %v436_v31 }
  0x79   : > { %439 = vst [vmem:[%s4294_s21 + $0x300] sm:$0xff] %v438_v32 }
  0x7a   : > { %441 = vst [vmem:[%s4294_s21 + $0x308] sm:$0xff] %v440_v33 }
  0x7b   : > { %443 = vst [vmem:[%s4294_s21 + $0x310] sm:$0xff] %v442_v34 }
  0x7c   : > { %445 = vst [vmem:[%s4294_s21 + $0x318] sm:$0xff] %v444_v35 }
  0x7d   : > { %447 = vst [vmem:[%s4294_s21 + $0x320] sm:$0xff] %v446_v36 }
  0x7e   : > { %449 = vst [vmem:[%s4294_s21 + $0x328] sm:$0xff] %v448_v37 }
  0x7f   : > { %451 = vst [vmem:[%s4294_s21 + $0x330] sm:$0xff] %v450_v38 }
  0x80   : > { %453 = vst [vmem:[%s4294_s21 + $0x338] sm:$0xff] %v452_v39 }
  0x81   : > { %455 = vst [vmem:[%s4294_s21 + $0x340] sm:$0xff] %v454_v40 }
  0x82   : > { %457 = vst [vmem:[%s4294_s21 + $0x348] sm:$0xff] %v456_v41 }
  0x83   : > { %459 = vst [vmem:[%s4294_s21 + $0x350] sm:$0xff] %v458_v42 }
  0x84   : > { %461 = vst [vmem:[%s4294_s21 + $0x358] sm:$0xff] %v460_v43 }
  0x85   : > { %463 = vst [vmem:[%s4294_s21 + $0x360] sm:$0xff] %v462_v44 }
  0x86   : > { %465 = vst [vmem:[%s4294_s21 + $0x368] sm:$0xff] %v464_v45 }
  0x87   : > { %467 = vst [vmem:[%s4294_s21 + $0x370] sm:$0xff] %v466_v46 }
  0x88   : > { %469 = vst [vmem:[%s4294_s21 + $0x378] sm:$0xff] %v468_v47 }
  0x89   : > { %471 = vst [vmem:[%s4294_s21 + $0x380] sm:$0xff] %v470_v48 }
  0x8a   : > { %473 = vst [vmem:[%s4294_s21 + $0x388] sm:$0xff] %v472_v49 }
  0x8b   : > { %475 = vst [vmem:[%s4294_s21 + $0x390] sm:$0xff] %v474_v50 }
  0x8c   : > { %477 = vst [vmem:[%s4294_s21 + $0x398] sm:$0xff] %v476_v51 }
  0x8d   : > { %479 = vst [vmem:[%s4294_s21 + $0x3a0] sm:$0xff] %v478_v52 }
  0x8e   : > { %481 = vst [vmem:[%s4294_s21 + $0x3a8] sm:$0xff] %v480_v53 }
  0x8f   : > { %483 = vst [vmem:[%s4294_s21 + $0x3b0] sm:$0xff] %v482_v54 }
  0x90   : > { %485 = vst [vmem:[%s4294_s21 + $0x3b8] sm:$0xff] %v484_v55 }
  0x91   : > { %487 = vst [vmem:[%s4294_s21 + $0x3c0] sm:$0xff] %v486_v56 }
  0x92   : > { %489 = vst [vmem:[%s4294_s21 + $0x3c8] sm:$0xff] %v488_v57 }
  0x93   : > { %491 = vst [vmem:[%s4294_s21 + $0x3d0] sm:$0xff] %v490_v58 }
  0x94   : > { %493 = vst [vmem:[%s4294_s21 + $0x3d8] sm:$0xff] %v492_v59 }
  0x95   : > { %495 = vst [vmem:[%s4294_s21 + $0x3e0] sm:$0xff] %v494_v60 }
  0x96   : > { %497 = vst [vmem:[%s4294_s21 + $0x3e8] sm:$0xff] %v496_v61 }
  0x97   : > { %499 = vst [vmem:[%s4294_s21 + $0x3f0] sm:$0xff] %v498_v62 }
  0x98   : > { %501 = vst [vmem:[%s4294_s21 + $0x3f8] sm:$0xff] %v500_v63 }
  0x99 PF: > { %p3027_p7 = scmp.ge.s32.totalorder %s4188_s29, 1  ;;  %p516_p8 = scmp.lt.s32.totalorder %s4188_s29, 5 }
  0x9b   : > { %p517_p9 = pnand %p3027_p7, %p516_p8 }
  0x9c   : > { %s523_s22 = sand.u32 (!%p517_p9), 1, %s4164_s23   ;;  %s3029_s7 = sshll.u32 (!%p517_p9), %s4172_s25, 3 }
  0x9d   : > { %520 = sbr.rel (%p517_p9) target bundleno = 975 (0x3cf), region = 63  ;;  %s3028_s8 = sshll.u32 (!%p517_p9), %s523_s22, 10 }
  0x9e   : > { %p560_p10 = scmp.lt.s32.totalorder (!%p517_p9), %s3029_s7, 15  ;;  %p566_p11 = scmp.lt.s32.totalorder (!%p517_p9), %s4176_s26, 1 }
  0x9f   : > { %s4565_s18 = scalar_lea.vmem (!%p517_p9), [#allocation4], %s3028_s8  ;;  %p3033_p12 = scmp.ne.s32.totalorder (!%p517_p9), %s4172_s25, 0 }
  0xa2   : > { %s5429_s7 = smov (!%p560_p10, %s3029_s7), 15  ;;  %s5431_s26 = smov (!%p566_p11, %s4176_s26), 1 }
  0xa3   : > { %s3239_s9 = sshll.u32 %s5429_s7, 4  ;;  %s3032_s14 = sshll.u32 %s5431_s26, 3 }
  0xa4   : > { %s4558_s13 = scalar_lea.vmem %s5397_s2, %s3239_s9  ;;  %s4563_s17 = scalar_lea.vmem %s5401_s6, %s3032_s14 }
  0xa5   : > { %574 = sbr.rel (%p3033_p12) target bundleno = 175 (0xaf), region = 71 }
  0xaa   : > { %v4190_v0 = vmov 0.0  }
  0xab   : > { %575 = vst [vmem:[#allocation2 + $0x10] sm:$0xff] %v4190_v0 }
  0xac   : > { %576 = vst [vmem:[#allocation2] sm:$0xff] %v4190_v0 }
  0xad   : > { %577 = vst [vmem:[#allocation2 + $0x18] sm:$0xff] %v4190_v0 }
  0xae   : > { %578 = vst [vmem:[#allocation2 + $0x8] sm:$0xff] %v4190_v0 }
  0xaf PF: > { %v595_v1 = vld [vmem:[%s4565_s18 + $0x80] sm:$0xff]  ;;  %v596_v2 = vld [vmem:[%s4565_s18 + $0x88] sm:$0xff]  ;;  %s835_s23 = sld [smem:[#allocation3]]  ;;  %v597_v11 = vld [vmem:[%s4565_s18 + $0x90] sm:$0xff]  ;;  %vm2223_vm4 = vcmask 130112   ;;  %vm2227_vm5 = vcmask 195712  }
  0xb0   : > { %v583_v3 = vld [vmem:[%s4565_s18 + $0x20] sm:$0xff]  ;;  %v723_v4 = vmax.f32 %v595_v1, 1e-06  ;;  %v724_v5 = vmax.f32 %v596_v2, 1e-06  ;;  %v584_v6 = vld [vmem:[%s4565_s18 + $0x28] sm:$0xff] }
  0xb1   : > { %v579_v7 = vld [vmem:[%s4565_s18] sm:$0xff]  ;;  %v711_v8 = vmax.f32 %v583_v3, 1e-06  ;;  %v712_v9 = vmax.f32 %v584_v6, 1e-06  ;;  %v580_v10 = vld [vmem:[%s4565_s18 + $0x8] sm:$0xff] }
  0xb2   : > { %3347 = vlog2.f32 %v723_v4  ;;  %v707_v12 = vmax.f32 %v579_v7, 1e-06  ;;  %v598_v13 = vld [vmem:[%s4565_s18 + $0x98] sm:$0xff]  ;;  %v708_v14 = vmax.f32 %v580_v10, 1e-06  ;;  %v585_v15 = vld [vmem:[%s4565_s18 + $0x30] sm:$0xff] }
  0xb3   : > { %3349 = vlog2.f32 %v724_v5  ;;  %v725_v16 = vmax.f32 %v597_v11, 1e-06  ;;  %v586_v17 = vld [vmem:[%s4565_s18 + $0x38] sm:$0xff]  ;;  %v726_v18 = vmax.f32 %v598_v13, 1e-06  ;;  %v581_v19 = vld [vmem:[%s4565_s18 + $0x10] sm:$0xff] }
  0xb4   : > { %3351 = vlog2.f32 %v711_v8  ;;  %v713_v20 = vmax.f32 %v585_v15, 1e-06  ;;  %v582_v21 = vld [vmem:[%s4565_s18 + $0x18] sm:$0xff]  ;;  %v714_v22 = vmax.f32 %v586_v17, 1e-06  ;;  %v601_v23 = vld [vmem:[%s4565_s18 + $0xb0] sm:$0xff] }
  0xb5   : > { %3353 = vlog2.f32 %v712_v9  ;;  %v4581_v25 = vstv %s835_s23  ;;  %v709_v26 = vmax.f32 %v581_v19, 1e-06  ;;  %v710_v29 = vmax.f32 %v582_v21, 1e-06  ;;  %v602_v3 = vld [vmem:[%s4565_s18 + $0xb8] sm:$0xff]  ;;  %v612_v21 = vld [vmem:[%s4565_s18 + $0x108] sm:$0xff] }
  0xb6   : > { %3355 = vlog2.f32 %v707_v12  ;;  %v729_v32 = vmax.f32 %v601_v23, 1e-06  ;;  %v730_v15 = vmax.f32 %v602_v3, 1e-06  ;;  %vm1739_vm0 = vweird.f32 %v4581_v25  ;;  %p3102_p13 = scmp.ne.s32.totalorder %s4172_s25, 1 }
  0xb7   : > { %3357 = vlog2.f32 %v708_v14  ;;  %vm2231_vm6 = vcmask 261312   ;;  %vm2235_vm7 = vcmask 326912   ;;  %vm2239_vm8 = vcmask 392512  }
  0xb8   : > { %v3348_v24 = vpop.eup %3347  ;;  %3359 = vlog2.f32 %v725_v16  ;;  %v611_v16 = vld [vmem:[%s4565_s18 + $0x100] sm:$0xff]  ;;  %vm2243_vm9 = vcmask 458112   ;;  %vm2247_vm10 = vcmask 523712   ;;  %vm2354_vm11 = vcmask 1041409  }
  0xb9   : > { %v3350_v27 = vpop.eup %3349  ;;  %v869_v28 = vmul.f32 0.6931472, %v3348_v24  ;;  %3361 = vlog2.f32 %v726_v18  ;;  %v599_v24 = vld [vmem:[%s4565_s18 + $0xa0] sm:$0xff]  ;;  %vm2356_vm12 = vcmask 1042434   ;;  %vm2358_vm13 = vcmask 1043459  }
  0xba   : > { %v3352_v30 = vpop.eup %3351  ;;  %v871_v31 = vmul.f32 0.6931472, %v3350_v27  ;;  %3363 = vlog2.f32 %v713_v20  ;;  %vm2360_vm14 = vcmask 1044484   ;;  %vm2362_vm15 = vcmask 1045509  }
  0xbb   : > { %v3354_v33 = vpop.eup %3353  ;;  %v1109_v34 = vmul.f32 %v4581_v25, %v869_v28  ;;  %v845_v35 = vmul.f32 0.6931472, %v3352_v30  ;;  %3365 = vlog2.f32 %v714_v22  ;;  %v600_v30 = vld [vmem:[%s4565_s18 + $0xa8] sm:$0xff] }
  0xbc   : > { %v3356_v36 = vpop.eup %3355  ;;  %v1110_v37 = vmul.f32 %v4581_v25, %v871_v31  ;;  %v847_v38 = vmul.f32 0.6931472, %v3354_v33  ;;  %3367 = vlog2.f32 %v709_v26  ;;  %v615_v33 = vld [vmem:[%s4565_s18 + $0x120] sm:$0xff] }
  0xbd   : > { %v3358_v39 = vpop.eup %3357  ;;  %v1253_v40 = vmul.f32 1.442695, %v1109_v34  ;;  %v1097_v41 = vmul.f32 %v4581_v25, %v845_v35  ;;  %v837_v42 = vmul.f32 0.6931472, %v3356_v36  ;;  %3369 = vlog2.f32 %v710_v29 }
  0xbe   : > { %v3360_v43 = vpop.eup %3359  ;;  %v1255_v44 = vmul.f32 1.442695, %v1110_v37  ;;  %v1098_v45 = vmul.f32 %v4581_v25, %v847_v38  ;;  %v839_v46 = vmul.f32 0.6931472, %v3358_v39  ;;  %3371 = vlog2.f32 %v729_v32  ;;  %v616_v37 = vld [vmem:[%s4565_s18 + $0x128] sm:$0xff] }
  0xbf   : > { %v3362_v47 = vpop.eup %3361  ;;  %3373 = vpow2.f32 %v1253_v40  ;;  %v1229_v48 = vmul.f32 1.442695, %v1097_v41  ;;  %v1093_v49 = vmul.f32 %v4581_v25, %v837_v42  ;;  %v873_v50 = vmul.f32 0.6931472, %v3360_v43  ;;  %v617_v40 = vld [vmem:[%s4565_s18 + $0x130] sm:$0xff] }
  0xc0   : > { %v3364_v51 = vpop.eup %3363  ;;  %3375 = vpow2.f32 %v1255_v44  ;;  %v1231_v52 = vmul.f32 1.442695, %v1098_v45  ;;  %v1094_v53 = vmul.f32 %v4581_v25, %v839_v46  ;;  %v875_v54 = vmul.f32 0.6931472, %v3362_v47  ;;  %v618_v44 = vld [vmem:[%s4565_s18 + $0x138] sm:$0xff]  ;;  %v613_v47 = vld [vmem:[%s4565_s18 + $0x110] sm:$0xff] }
  0xc1   : > { %v3366_v55 = vpop.eup %3365  ;;  %3377 = vpow2.f32 %v1229_v48  ;;  %v1221_v56 = vmul.f32 1.442695, %v1093_v49  ;;  %v1111_v57 = vmul.f32 %v4581_v25, %v873_v50  ;;  %v849_v58 = vmul.f32 0.6931472, %v3364_v51  ;;  %v614_v51 = vld [vmem:[%s4565_s18 + $0x118] sm:$0xff] }
  0xc2   : > { %v3368_v59 = vpop.eup %3367  ;;  %3379 = vpow2.f32 %v1231_v52  ;;  %v1223_v60 = vmul.f32 1.442695, %v1094_v53  ;;  %v1112_v61 = vmul.f32 %v4581_v25, %v875_v54  ;;  %v851_v62 = vmul.f32 0.6931472, %v3366_v55  ;;  %v629_v54 = vld [vmem:[%s4565_s18 + $0x190] sm:$0xff] }
  0xc3   : > { %v3370_v63 = vpop.eup %3369  ;;  %3381 = vpow2.f32 %v1221_v56  ;;  %v1257_v0 = vmul.f32 1.442695, %v1111_v57  ;;  %v1099_v1 = vmul.f32 %v4581_v25, %v849_v58  ;;  %v841_v2 = vmul.f32 0.6931472, %v3368_v59 }
  0xc4   : > { %v3372_v4 = vpop.eup %3371  ;;  %3383 = vpow2.f32 %v1223_v60  ;;  %v1259_v5 = vmul.f32 1.442695, %v1112_v61  ;;  %v1100_v6 = vmul.f32 %v4581_v25, %v851_v62  ;;  %v843_v7 = vmul.f32 0.6931472, %v3370_v63  ;;  %v630_v61 = vld [vmem:[%s4565_s18 + $0x198] sm:$0xff] }
  0xc5   : > { %v3374_v8 = vpop.eup %3373  ;;  %3385 = vpow2.f32 %v1257_v0  ;;  %v1233_v9 = vmul.f32 1.442695, %v1099_v1  ;;  %v1095_v10 = vmul.f32 %v4581_v25, %v841_v2  ;;  %v881_v11 = vmul.f32 0.6931472, %v3372_v4 }
  0xc6   : > { %v3376_v12 = vpop.eup %3375  ;;  %3387 = vpow2.f32 %v1259_v5  ;;  %v1235_v13 = vmul.f32 1.442695, %v1100_v6  ;;  %v1096_v14 = vmul.f32 %v4581_v25, %v843_v7  ;;  %v739_v29 = vmax.f32 %v611_v16, 1e-06 }
  0xc7   : > { %v3378_v17 = vpop.eup %3377  ;;  %v1501_v18 = vadd.f32 %v3376_v12, %v3374_v8  ;;  %3389 = vpow2.f32 %v1233_v9  ;;  %v1225_v19 = vmul.f32 1.442695, %v1095_v10  ;;  %v1115_v20 = vmul.f32 %v4581_v25, %v881_v11 }
  0xc8   : > { %v3380_v22 = vpop.eup %3379  ;;  %3391 = vpow2.f32 %v1235_v13  ;;  %v1227_v23 = vmul.f32 1.442695, %v1096_v14  ;;  %v740_v32 = vmax.f32 %v612_v21, 1e-06  ;;  %v727_v36 = vmax.f32 %v599_v24, 1e-06 }
  0xc9   : > { %v3382_v26 = vpop.eup %3381  ;;  %1502 = vadd.xlane.f32.xlu1 %v1501_v18  ;;  %v1483_v27 = vadd.f32 %v3380_v22, %v3378_v17  ;;  %3393 = vpow2.f32 %v1225_v19  ;;  %v1265_v28 = vmul.f32 1.442695, %v1115_v20  ;;  %v728_v39 = vmax.f32 %v600_v30, 1e-06 }
  0xca   : > { %v3384_v31 = vpop.eup %3383  ;;  %3395 = vpow2.f32 %v1227_v23  ;;  %v743_v43 = vmax.f32 %v615_v33, 1e-06  ;;  %v744_v46 = vmax.f32 %v616_v37, 1e-06  ;;  %v745_v50 = vmax.f32 %v617_v40, 1e-06 }
  0xcb   : > { %v3386_v34 = vpop.eup %3385  ;;  %1484 = vadd.xlane.f32.xlu2 %v1483_v27  ;;  %v1477_v35 = vadd.f32 %v3384_v31, %v3382_v26  ;;  %3397 = vlog2.f32 %v730_v15  ;;  %v746_v53 = vmax.f32 %v618_v44, 1e-06  ;;  %v741_v57 = vmax.f32 %v613_v47, 1e-06 }
  0xcc   : > { %v3388_v38 = vpop.eup %3387  ;;  %3399 = vpow2.f32 %v1265_v28  ;;  %v742_v60 = vmax.f32 %v614_v51, 1e-06  ;;  %v757_v63 = vmax.f32 %v629_v54, 1e-06  ;;  %v758_v5 = vmax.f32 %v630_v61, 1e-06 }
  0xcd   : > { %v3390_v41 = vpop.eup %3389  ;;  %1478 = vadd.xlane.f32.xlu0 %v1477_v35  ;;  %v1504_v42 = vadd.f32 %v3388_v38, %v3386_v34  ;;  %3401 = vlog2.f32 %v739_v29  ;;  %v588_v51 = vld [vmem:[%s4565_s18 + $0x48] sm:$0xff] }
  0xce   : > { %v3392_v45 = vpop.eup %3391  ;;  %3403 = vlog2.f32 %v740_v32 }
  0xcf   : > { %v3394_v48 = vpop.eup %3393  ;;  %v1486_v49 = vadd.f32 %v3392_v45, %v3390_v41  ;;  %3405 = vlog2.f32 %v727_v36 }
  0xd0   : > { %v3396_v52 = vpop.eup %3395  ;;  %3407 = vlog2.f32 %v728_v39 }
  0xd1   : > { %v3398_v55 = vpop.eup %3397  ;;  %1505 = vadd.xlane.f32.xlu1 %v1504_v42  ;;  %v1480_v56 = vadd.f32 %v3396_v52, %v3394_v48  ;;  %3409 = vlog2.f32 %v743_v43  ;;  %v587_v42 = vld [vmem:[%s4565_s18 + $0x40] sm:$0xff] }
  0xd2   : > { %v4608_v58 = vpop.eup %3399  ;;  %v883_v59 = vmul.f32 0.6931472, %v3398_v55  ;;  %3411 = vlog2.f32 %v744_v46  ;;  %v715_v54 = vmax.f32 %v587_v42, 1e-06  ;;  %v627_v55 = vld [vmem:[%s4565_s18 + $0x180] sm:$0xff] }
  0xd3   : > { %v3402_v62 = vpop.eup %3401  ;;  %1487 = vadd.xlane.f32.xlu2 %v1486_v49  ;;  %3413 = vlog2.f32 %v745_v50 }
  0xd4   : > { %v3404_v0 = vpop.eup %3403  ;;  %v1116_v1 = vmul.f32 %v4581_v25, %v883_v59  ;;  %v901_v2 = vmul.f32 0.6931472, %v3402_v62  ;;  %3415 = vlog2.f32 %v746_v53  ;;  %v716_v62 = vmax.f32 %v588_v51, 1e-06 }
  0xd5   : > { %v3406_v3 = vpop.eup %3405  ;;  %1481 = vadd.xlane.f32.xlu0 %v1480_v56  ;;  %v903_v4 = vmul.f32 0.6931472, %v3404_v0  ;;  %3417 = vlog2.f32 %v741_v57 }
  0xd6   : > { %v3408_v6 = vpop.eup %3407  ;;  %v1267_v7 = vmul.f32 1.442695, %v1116_v1  ;;  %v1125_v8 = vmul.f32 %v4581_v25, %v901_v2  ;;  %v877_v9 = vmul.f32 0.6931472, %v3406_v3  ;;  %3419 = vlog2.f32 %v742_v60  ;;  %v628_v60 = vld [vmem:[%s4565_s18 + $0x188] sm:$0xff] }
  0xd7   : > { %v3410_v10 = vpop.eup %3409  ;;  %v1126_v11 = vmul.f32 %v4581_v25, %v903_v4  ;;  %v879_v12 = vmul.f32 0.6931472, %v3408_v6  ;;  %3421 = vlog2.f32 %v757_v63  ;;  %v603_v63 = vld [vmem:[%s4565_s18 + $0xc0] sm:$0xff]  ;;  %v755_v3 = vmax.f32 %v627_v55, 1e-06  ;;  %v604_v4 = vld [vmem:[%s4565_s18 + $0xc8] sm:$0xff] }
  0xd8   : > { %v3412_v13 = vpop.eup %3411  ;;  %3423 = vpow2.f32 %v1267_v7  ;;  %v1285_v14 = vmul.f32 1.442695, %v1125_v8  ;;  %v1113_v15 = vmul.f32 %v4581_v25, %v877_v9  ;;  %v909_v16 = vmul.f32 0.6931472, %v3410_v10  ;;  %v605_v7 = vld [vmem:[%s4565_s18 + $0xd0] sm:$0xff] }
  0xd9   : > { %v3414_v17 = vpop.eup %3413  ;;  %v1287_v18 = vmul.f32 1.442695, %v1126_v11  ;;  %v1114_v19 = vmul.f32 %v4581_v25, %v879_v12  ;;  %v911_v20 = vmul.f32 0.6931472, %v3412_v13  ;;  %3425 = vlog2.f32 %v758_v5  ;;  %v606_v11 = vld [vmem:[%s4565_s18 + $0xd8] sm:$0xff] }
  0xda   : > { %v3416_v21 = vpop.eup %3415  ;;  %3427 = vpow2.f32 %v1285_v14  ;;  %v1261_v22 = vmul.f32 1.442695, %v1113_v15  ;;  %v1129_v23 = vmul.f32 %v4581_v25, %v909_v16  ;;  %v913_v24 = vmul.f32 0.6931472, %v3414_v17  ;;  %v589_v14 = vld [vmem:[%s4565_s18 + $0x50] sm:$0xff] }
  0xdb   : > { %v3418_v26 = vpop.eup %3417  ;;  %3429 = vpow2.f32 %v1287_v18  ;;  %v1263_v27 = vmul.f32 1.442695, %v1114_v19  ;;  %v1130_v28 = vmul.f32 %v4581_v25, %v911_v20  ;;  %v915_v29 = vmul.f32 0.6931472, %v3416_v21  ;;  %v590_v18 = vld [vmem:[%s4565_s18 + $0x58] sm:$0xff]  ;;  %v633_v21 = vld [vmem:[%s4565_s18 + $0x1b0] sm:$0xff] }
  0xdc   : > { %v3420_v30 = vpop.eup %3419  ;;  %3431 = vpow2.f32 %v1261_v22  ;;  %v1293_v31 = vmul.f32 1.442695, %v1129_v23  ;;  %v1131_v32 = vmul.f32 %v4581_v25, %v913_v24  ;;  %v905_v33 = vmul.f32 0.6931472, %v3418_v26  ;;  %v634_v26 = vld [vmem:[%s4565_s18 + $0x1b8] sm:$0xff] }
  0xdd   : > { %v3422_v34 = vpop.eup %3421  ;;  %3433 = vpow2.f32 %v1263_v27  ;;  %v1295_v35 = vmul.f32 1.442695, %v1130_v28  ;;  %v1132_v36 = vmul.f32 %v4581_v25, %v915_v29  ;;  %v907_v37 = vmul.f32 0.6931472, %v3420_v30 }
  0xde   : > { %v3424_v38 = vpop.eup %3423  ;;  %3435 = vpow2.f32 %v1293_v31  ;;  %v1297_v39 = vmul.f32 1.442695, %v1131_v32  ;;  %v1127_v40 = vmul.f32 %v4581_v25, %v905_v33  ;;  %v937_v41 = vmul.f32 0.6931472, %v3422_v34  ;;  %v643_v32 = vld [vmem:[%s4565_s18 + $0x200] sm:$0xff] }
  0xdf   : > { %v3426_v43 = vpop.eup %3425  ;;  %v1510_v44 = vadd.f32 %v3424_v38, %v4608_v58  ;;  %3437 = vpow2.f32 %v1295_v35  ;;  %v1299_v45 = vmul.f32 1.442695, %v1132_v36  ;;  %v1128_v46 = vmul.f32 %v4581_v25, %v907_v37 }
  0xe0   : > { %v3428_v47 = vpop.eup %3427  ;;  %3439 = vpow2.f32 %v1297_v39  ;;  %v1289_v48 = vmul.f32 1.442695, %v1127_v40  ;;  %v939_v49 = vmul.f32 0.6931472, %v3426_v43  ;;  %v1143_v50 = vmul.f32 %v4581_v25, %v937_v41 }
  0xe1   : > { %v3430_v52 = vpop.eup %3429  ;;  %1511 = vadd.xlane.f32.xlu1 %v1510_v44  ;;  %3441 = vpow2.f32 %v1299_v45  ;;  %v1291_v53 = vmul.f32 1.442695, %v1128_v46  ;;  %v756_v6 = vmax.f32 %v628_v60, 1e-06  ;;  %v731_v10 = vmax.f32 %v603_v63, 1e-06 }
  0xe2   : > { %v3432_v56 = vpop.eup %3431  ;;  %v1525_v57 = vadd.f32 %v3430_v52, %v3428_v47  ;;  %3443 = vpow2.f32 %v1289_v48  ;;  %v1144_v58 = vmul.f32 %v4581_v25, %v939_v49  ;;  %v1321_v59 = vmul.f32 1.442695, %v1143_v50 }
  0xe3   : > { %v3434_v61 = vpop.eup %3433  ;;  %3445 = vpow2.f32 %v1291_v53  ;;  %v732_v13 = vmax.f32 %v604_v4, 1e-06  ;;  %v733_v17 = vmax.f32 %v605_v7, 1e-06  ;;  %v734_v20 = vmax.f32 %v606_v11, 1e-06 }
  0xe4   : > { %v3436_v0 = vpop.eup %3435  ;;  %1526 = vadd.xlane.f32.xlu2 %v1525_v57  ;;  %v1507_v1 = vadd.f32 %v3434_v61, %v3432_v56  ;;  %3447 = vpow2.f32 %v1321_v59  ;;  %v1323_v2 = vmul.f32 1.442695, %v1144_v58  ;;  %v717_v24 = vmax.f32 %v589_v14, 1e-06 }
  0xe5   : > { %v3438_v5 = vpop.eup %3437  ;;  %3449 = vlog2.f32 %v715_v54  ;;  %v718_v28 = vmax.f32 %v590_v18, 1e-06  ;;  %v761_v31 = vmax.f32 %v633_v21, 1e-06  ;;  %v762_v35 = vmax.f32 %v634_v26, 1e-06 }
  0xe6   : > { %v3440_v8 = vpop.eup %3439  ;;  %1508 = vadd.xlane.f32.xlu0 %v1507_v1  ;;  %v1531_v9 = vadd.f32 %v3438_v5, %v3436_v0  ;;  %3451 = vpow2.f32 %v1323_v2  ;;  %v771_v41 = vmax.f32 %v643_v32, 1e-06  ;;  %v631_v21 = vld [vmem:[%s4565_s18 + $0x1a0] sm:$0xff] }
  0xe7   : > { %v3442_v12 = vpop.eup %3441  ;;  %3453 = vlog2.f32 %v716_v62 }
  0xe8   : > { %v3444_v15 = vpop.eup %3443  ;;  %v1534_v16 = vadd.f32 %v3442_v12, %v3440_v8  ;;  %3455 = vlog2.f32 %v755_v3 }
  0xe9   : > { %v3446_v19 = vpop.eup %3445  ;;  %1532 = vadd.xlane.f32.xlu1 %v1531_v9  ;;  %3457 = vlog2.f32 %v756_v6 }
  0xea   : > { %v3448_v22 = vpop.eup %3447  ;;  %v1528_v23 = vadd.f32 %v3446_v19, %v3444_v15  ;;  %3459 = vlog2.f32 %v731_v10 }
  0xeb   : > { %v3450_v27 = vpop.eup %3449  ;;  %3461 = vlog2.f32 %v732_v13  ;;  %v644_v13 = vld [vmem:[%s4565_s18 + $0x208] sm:$0xff] }
  0xec   : > { %v3452_v29 = vpop.eup %3451  ;;  %1535 = vadd.xlane.f32.xlu2 %v1534_v16  ;;  %v853_v30 = vmul.f32 0.6931472, %v3450_v27  ;;  %3463 = vlog2.f32 %v733_v17  ;;  %v772_v26 = vmax.f32 %v644_v13, 1e-06  ;;  %v632_v27 = vld [vmem:[%s4565_s18 + $0x1a8] sm:$0xff] }
  0xed   : > { %v3454_v33 = vpop.eup %3453  ;;  %v1552_v34 = vadd.f32 %v3452_v29, %v3448_v22  ;;  %3465 = vlog2.f32 %v734_v20 }
  0xee   : > { %v3456_v36 = vpop.eup %3455  ;;  %1529 = vadd.xlane.f32.xlu0 %v1528_v23  ;;  %v855_v37 = vmul.f32 0.6931472, %v3454_v33  ;;  %v1101_v38 = vmul.f32 %v4581_v25, %v853_v30  ;;  %3467 = vlog2.f32 %v717_v24 }
  0xef   : > { %v3458_v39 = vpop.eup %3457  ;;  %v933_v40 = vmul.f32 0.6931472, %v3456_v36  ;;  %3469 = vlog2.f32 %v718_v28 }
  0xf0   : > { %v3460_v42 = vpop.eup %3459  ;;  %v1102_v43 = vmul.f32 %v4581_v25, %v855_v37  ;;  %v1237_v44 = vmul.f32 1.442695, %v1101_v38  ;;  %v935_v45 = vmul.f32 0.6931472, %v3458_v39  ;;  %3471 = vlog2.f32 %v761_v31  ;;  %v619_v31 = vld [vmem:[%s4565_s18 + $0x140] sm:$0xff]  ;;  %v621_v39 = vld [vmem:[%s4565_s18 + $0x150] sm:$0xff] }
  0xf1   : > { %v3462_v46 = vpop.eup %3461  ;;  %1553 = vadd.xlane.f32.xlu1 %v1552_v34  ;;  %v1141_v47 = vmul.f32 %v4581_v25, %v933_v40  ;;  %v885_v48 = vmul.f32 0.6931472, %v3460_v42  ;;  %3473 = vlog2.f32 %v762_v35  ;;  %v759_v34 = vmax.f32 %v631_v21, 1e-06  ;;  %v620_v35 = vld [vmem:[%s4565_s18 + $0x148] sm:$0xff] }
  0xf2   : > { %v3464_v49 = vpop.eup %3463  ;;  %3475 = vpow2.f32 %v1237_v44  ;;  %v1239_v50 = vmul.f32 1.442695, %v1102_v43  ;;  %v1142_v51 = vmul.f32 %v4581_v25, %v935_v45  ;;  %v887_v52 = vmul.f32 0.6931472, %v3462_v46  ;;  %v622_v43 = vld [vmem:[%s4565_s18 + $0x158] sm:$0xff]  ;;  %v645_v46 = vld [vmem:[%s4565_s18 + $0x210] sm:$0xff] }
  0xf3   : > { %v3466_v53 = vpop.eup %3465  ;;  %v1317_v54 = vmul.f32 1.442695, %v1141_v47  ;;  %v1117_v55 = vmul.f32 %v4581_v25, %v885_v48  ;;  %v889_v56 = vmul.f32 0.6931472, %v3464_v49  ;;  %3477 = vlog2.f32 %v771_v41 }
  0xf4   : > { %v3468_v57 = vpop.eup %3467  ;;  %3479 = vpow2.f32 %v1239_v50  ;;  %v1319_v58 = vmul.f32 1.442695, %v1142_v51  ;;  %v1118_v59 = vmul.f32 %v4581_v25, %v887_v52  ;;  %v891_v60 = vmul.f32 0.6931472, %v3466_v53  ;;  %v646_v50 = vld [vmem:[%s4565_s18 + $0x218] sm:$0xff]  ;;  %v649_v53 = vld [vmem:[%s4565_s18 + $0x230] sm:$0xff] }
  0xf5   : > { %v3470_v61 = vpop.eup %3469  ;;  %3481 = vpow2.f32 %v1317_v54  ;;  %v1269_v62 = vmul.f32 1.442695, %v1117_v55  ;;  %v1119_v63 = vmul.f32 %v4581_v25, %v889_v56  ;;  %v857_v0 = vmul.f32 0.6931472, %v3468_v57  ;;  %v650_v57 = vld [vmem:[%s4565_s18 + $0x238] sm:$0xff] }
  0xf6   : > { %v3472_v1 = vpop.eup %3471  ;;  %3483 = vpow2.f32 %v1319_v58  ;;  %v1271_v2 = vmul.f32 1.442695, %v1118_v59  ;;  %v1120_v3 = vmul.f32 %v4581_v25, %v891_v60  ;;  %v859_v4 = vmul.f32 0.6931472, %v3470_v61  ;;  %v659_v60 = vld [vmem:[%s4565_s18 + $0x280] sm:$0xff] }
  0xf7   : > { %v3474_v5 = vpop.eup %3473  ;;  %3485 = vpow2.f32 %v1269_v62  ;;  %v1273_v6 = vmul.f32 1.442695, %v1119_v63  ;;  %v1103_v7 = vmul.f32 %v4581_v25, %v857_v0  ;;  %v945_v8 = vmul.f32 0.6931472, %v3472_v1 }
  0xf8   : > { %v3476_v9 = vpop.eup %3475  ;;  %3487 = vpow2.f32 %v1271_v2  ;;  %v1275_v10 = vmul.f32 1.442695, %v1120_v3  ;;  %v1104_v11 = vmul.f32 %v4581_v25, %v859_v4  ;;  %v947_v12 = vmul.f32 0.6931472, %v3474_v5  ;;  %v660_v3 = vld [vmem:[%s4565_s18 + $0x288] sm:$0xff] }
  0xf9   : > { %v3478_v14 = vpop.eup %3477  ;;  %3489 = vpow2.f32 %v1273_v6  ;;  %v1241_v15 = vmul.f32 1.442695, %v1103_v7  ;;  %v1147_v16 = vmul.f32 %v4581_v25, %v945_v8  ;;  %v760_v38 = vmax.f32 %v632_v27, 1e-06 }
  0xfa   : > { %v3480_v17 = vpop.eup %3479  ;;  %3491 = vpow2.f32 %v1275_v10  ;;  %v1243_v18 = vmul.f32 1.442695, %v1104_v11  ;;  %v1148_v19 = vmul.f32 %v4581_v25, %v947_v12  ;;  %v965_v20 = vmul.f32 0.6931472, %v3478_v14 }
  0xfb   : > { %v3482_v22 = vpop.eup %3481  ;;  %v1489_v23 = vadd.f32 %v3480_v17, %v3476_v9  ;;  %3493 = vpow2.f32 %v1241_v15  ;;  %v1329_v24 = vmul.f32 1.442695, %v1147_v16  ;;  %v747_v42 = vmax.f32 %v619_v31, 1e-06 }
  0xfc   : > { %v3484_v28 = vpop.eup %3483  ;;  %3495 = vpow2.f32 %v1243_v18  ;;  %v1331_v29 = vmul.f32 1.442695, %v1148_v19  ;;  %v1157_v30 = vmul.f32 %v4581_v25, %v965_v20  ;;  %v748_v45 = vmax.f32 %v620_v35, 1e-06 }
  0xfd   : > { %v3486_v32 = vpop.eup %3485  ;;  %1490 = vadd.xlane.f32.xlu2 %v1489_v23  ;;  %v1549_v33 = vadd.f32 %v3484_v28, %v3482_v22  ;;  %3497 = vpow2.f32 %v1329_v24  ;;  %v749_v49 = vmax.f32 %v621_v39, 1e-06  ;;  %v750_v52 = vmax.f32 %v622_v43, 1e-06 }
  0xfe   : > { %v3488_v36 = vpop.eup %3487  ;;  %3499 = vpow2.f32 %v1331_v29  ;;  %v1349_v37 = vmul.f32 1.442695, %v1157_v30  ;;  %v773_v56 = vmax.f32 %v645_v46, 1e-06  ;;  %v774_v59 = vmax.f32 %v646_v50, 1e-06 }
  0xff   : > { %v3490_v40 = vpop.eup %3489  ;;  %1550 = vadd.xlane.f32.xlu0 %v1549_v33  ;;  %v1513_v41 = vadd.f32 %v3488_v36, %v3486_v32  ;;  %3501 = vlog2.f32 %v772_v26  ;;  %v777_v63 = vmax.f32 %v649_v53, 1e-06  ;;  %v778_v2 = vmax.f32 %v650_v57, 1e-06  ;;  %v648_v57 = vld [vmem:[%s4565_s18 + $0x228] sm:$0xff] }
 0x100   : > { %v3492_v44 = vpop.eup %3491  ;;  %3503 = vpow2.f32 %v1349_v37  ;;  %v787_v5 = vmax.f32 %v659_v60, 1e-06  ;;  %v788_v11 = vmax.f32 %v660_v3, 1e-06 }
 0x101   : > { %v3494_v47 = vpop.eup %3493  ;;  %1514 = vadd.xlane.f32.xlu1 %v1513_v41  ;;  %v1516_v48 = vadd.f32 %v3492_v44, %v3490_v40  ;;  %3505 = vlog2.f32 %v759_v34 }
 0x102   : > { %v3496_v51 = vpop.eup %3495  ;;  %3507 = vlog2.f32 %v760_v38 }
 0x103   : > { %v3498_v54 = vpop.eup %3497  ;;  %v1492_v55 = vadd.f32 %v3496_v51, %v3494_v47  ;;  %3509 = vlog2.f32 %v747_v42 }
 0x104   : > { %v3500_v58 = vpop.eup %3499  ;;  %3511 = vlog2.f32 %v748_v45 }
 0x105   : > { %v3502_v61 = vpop.eup %3501  ;;  %1517 = vadd.xlane.f32.xlu2 %v1516_v48  ;;  %v1558_v62 = vadd.f32 %v3500_v58, %v3498_v54  ;;  %3513 = vlog2.f32 %v749_v49  ;;  %v647_v48 = vld [vmem:[%s4565_s18 + $0x220] sm:$0xff] }
 0x106   : > { %v4663_v0 = vpop.eup %3503  ;;  %v967_v1 = vmul.f32 0.6931472, %v3502_v61  ;;  %3515 = vlog2.f32 %v750_v52  ;;  %v775_v60 = vmax.f32 %v647_v48, 1e-06  ;;  %v591_v61 = vld [vmem:[%s4565_s18 + $0x60] sm:$0xff] }
 0x107   : > { %v3506_v4 = vpop.eup %3505  ;;  %1493 = vadd.xlane.f32.xlu0 %v1492_v55  ;;  %3517 = vlog2.f32 %v773_v56 }
 0x108   : > { %v3508_v6 = vpop.eup %3507  ;;  %v1158_v7 = vmul.f32 %v4581_v25, %v967_v1  ;;  %v941_v8 = vmul.f32 0.6931472, %v3506_v4  ;;  %3519 = vlog2.f32 %v774_v59  ;;  %v776_v4 = vmax.f32 %v648_v57, 1e-06 }
 0x109   : > { %v3510_v9 = vpop.eup %3509  ;;  %1559 = vadd.xlane.f32.xlu1 %v1558_v62  ;;  %v943_v10 = vmul.f32 0.6931472, %v3508_v6  ;;  %3521 = vlog2.f32 %v777_v63 }
 0x10a   : > { %v3512_v12 = vpop.eup %3511  ;;  %v1351_v13 = vmul.f32 1.442695, %v1158_v7  ;;  %v1145_v14 = vmul.f32 %v4581_v25, %v941_v8  ;;  %v917_v15 = vmul.f32 0.6931472, %v3510_v9  ;;  %3523 = vlog2.f32 %v778_v2  ;;  %v592_v2 = vld [vmem:[%s4565_s18 + $0x68] sm:$0xff] }
 0x10b   : > { %v3514_v16 = vpop.eup %3513  ;;  %v1146_v17 = vmul.f32 %v4581_v25, %v943_v10  ;;  %v919_v18 = vmul.f32 0.6931472, %v3512_v12  ;;  %3525 = vlog2.f32 %v787_v5  ;;  %v593_v5 = vld [vmem:[%s4565_s18 + $0x70] sm:$0xff]  ;;  %v719_v9 = vmax.f32 %v591_v61, 1e-06  ;;  %v594_v10 = vld [vmem:[%s4565_s18 + $0x78] sm:$0xff] }
 0x10c   : > { %v3516_v19 = vpop.eup %3515  ;;  %3527 = vpow2.f32 %v1351_v13  ;;  %v1325_v20 = vmul.f32 1.442695, %v1145_v14  ;;  %v1133_v21 = vmul.f32 %v4581_v25, %v917_v15  ;;  %v921_v22 = vmul.f32 0.6931472, %v3514_v16  ;;  %v661_v13 = vld [vmem:[%s4565_s18 + $0x290] sm:$0xff] }
 0x10d   : > { %v3518_v23 = vpop.eup %3517  ;;  %v1327_v24 = vmul.f32 1.442695, %v1146_v17  ;;  %v1134_v26 = vmul.f32 %v4581_v25, %v919_v18  ;;  %v923_v27 = vmul.f32 0.6931472, %v3516_v19  ;;  %3529 = vlog2.f32 %v788_v11  ;;  %v662_v17 = vld [vmem:[%s4565_s18 + $0x298] sm:$0xff] }
 0x10e   : > { %v3520_v28 = vpop.eup %3519  ;;  %3531 = vpow2.f32 %v1325_v20  ;;  %v1301_v29 = vmul.f32 1.442695, %v1133_v21  ;;  %v1135_v30 = vmul.f32 %v4581_v25, %v921_v22  ;;  %v969_v31 = vmul.f32 0.6931472, %v3518_v23  ;;  %v609_v23 = vld [vmem:[%s4565_s18 + $0xf0] sm:$0xff] }
 0x10f   : > { %v3522_v32 = vpop.eup %3521  ;;  %3533 = vpow2.f32 %v1327_v24  ;;  %v1303_v33 = vmul.f32 1.442695, %v1134_v26  ;;  %v1136_v34 = vmul.f32 %v4581_v25, %v923_v27  ;;  %v971_v35 = vmul.f32 0.6931472, %v3520_v28  ;;  %v610_v24 = vld [vmem:[%s4565_s18 + $0xf8] sm:$0xff]  ;;  %v635_v28 = vld [vmem:[%s4565_s18 + $0x1c0] sm:$0xff] }
 0x110   : > { %v3524_v36 = vpop.eup %3523  ;;  %3535 = vpow2.f32 %v1301_v29  ;;  %v1305_v37 = vmul.f32 1.442695, %v1135_v30  ;;  %v1159_v38 = vmul.f32 %v4581_v25, %v969_v31  ;;  %v977_v39 = vmul.f32 0.6931472, %v3522_v32  ;;  %v636_v29 = vld [vmem:[%s4565_s18 + $0x1c8] sm:$0xff]  ;;  %v4693_v32 = vld [vmem:[%s4565_s18 + $0xe0] sm:$0xff] }
 0x111   : > { %v3526_v40 = vpop.eup %3525  ;;  %3537 = vpow2.f32 %v1303_v33  ;;  %v1307_v41 = vmul.f32 1.442695, %v1136_v34  ;;  %v1160_v42 = vmul.f32 %v4581_v25, %v971_v35  ;;  %v979_v43 = vmul.f32 0.6931472, %v3524_v36  ;;  %v4696_v36 = vld [vmem:[%s4565_s18 + $0xe8] sm:$0xff] }
 0x112   : > { %v3528_v44 = vpop.eup %3527  ;;  %3539 = vpow2.f32 %v1305_v37  ;;  %v1353_v45 = vmul.f32 1.442695, %v1159_v38  ;;  %v1163_v46 = vmul.f32 %v4581_v25, %v977_v39  ;;  %v997_v47 = vmul.f32 0.6931472, %v3526_v40 }
 0x113   : > { %v3530_v49 = vpop.eup %3529  ;;  %v1573_v50 = vadd.f32 %v3528_v44, %v4663_v0  ;;  %3541 = vpow2.f32 %v1307_v41  ;;  %v1355_v51 = vmul.f32 1.442695, %v1160_v42  ;;  %v1164_v52 = vmul.f32 %v4581_v25, %v979_v43 }
 0x114   : > { %v3532_v53 = vpop.eup %3531  ;;  %3543 = vpow2.f32 %v1353_v45  ;;  %v1361_v54 = vmul.f32 1.442695, %v1163_v46  ;;  %v999_v55 = vmul.f32 0.6931472, %v3530_v49  ;;  %v1173_v56 = vmul.f32 %v4581_v25, %v997_v47 }
 0x115   : > { %v3534_v58 = vpop.eup %3533  ;;  %1574 = vadd.xlane.f32.xlu2 %v1573_v50  ;;  %3545 = vpow2.f32 %v1355_v51  ;;  %v1363_v59 = vmul.f32 1.442695, %v1164_v52  ;;  %v720_v12 = vmax.f32 %v592_v2, 1e-06  ;;  %v721_v16 = vmax.f32 %v593_v5, 1e-06 }
 0x116   : > { %v3536_v62 = vpop.eup %3535  ;;  %v1555_v63 = vadd.f32 %v3534_v58, %v3532_v53  ;;  %3547 = vpow2.f32 %v1361_v54  ;;  %v1174_v0 = vmul.f32 %v4581_v25, %v999_v55  ;;  %v1381_v1 = vmul.f32 1.442695, %v1173_v56 }
 0x117   : > { %v3538_v3 = vpop.eup %3537  ;;  %3549 = vpow2.f32 %v1363_v59  ;;  %v722_v19 = vmax.f32 %v594_v10, 1e-06  ;;  %v789_v22 = vmax.f32 %v661_v13, 1e-06  ;;  %v790_v27 = vmax.f32 %v662_v17, 1e-06 }
 0x118   : > { %v3540_v6 = vpop.eup %3539  ;;  %1556 = vadd.xlane.f32.xlu0 %v1555_v63  ;;  %v1537_v7 = vadd.f32 %v3538_v3, %v3536_v62  ;;  %3551 = vpow2.f32 %v1381_v1  ;;  %v1383_v8 = vmul.f32 1.442695, %v1174_v0  ;;  %v737_v34 = vmax.f32 %v609_v23, 1e-06 }
 0x119   : > { %v3542_v11 = vpop.eup %3541  ;;  %3553 = vlog2.f32 %v775_v60  ;;  %v738_v35 = vmax.f32 %v610_v24, 1e-06  ;;  %v763_v39 = vmax.f32 %v635_v28, 1e-06  ;;  %v764_v40 = vmax.f32 %v636_v29, 1e-06 }
 0x11a   : > { %v3544_v14 = vpop.eup %3543  ;;  %1538 = vadd.xlane.f32.xlu1 %v1537_v7  ;;  %v1540_v15 = vadd.f32 %v3542_v11, %v3540_v6  ;;  %3555 = vpow2.f32 %v1383_v8  ;;  %v1745_v43 = vand.u32 2147483648, %v4581_v25  ;;  %v735_v44 = vmax.f32 %v4693_v32, 1e-06 }
 0x11b   : > { %v3546_v18 = vpop.eup %3545  ;;  %3557 = vlog2.f32 %v776_v4  ;;  %v736_v48 = vmax.f32 %v4696_v36, 1e-06  ;;  %v1743_v51 = vand.u32 2147483647, %v4581_v25 }
 0x11c   : > { %v3548_v20 = vpop.eup %3547  ;;  %v1576_v21 = vadd.f32 %v3546_v18, %v3544_v14  ;;  %3559 = vlog2.f32 %v719_v9  ;;  %v4707_v59 = vor.u32 1.1754944e-38, %v1745_v43 }
 0x11d   : > { %v3550_v26 = vpop.eup %3549  ;;  %1541 = vadd.xlane.f32.xlu2 %v1540_v15  ;;  %3561 = vlog2.f32 %v720_v12  ;;  %vm4715_vm2 = vcmp.eq.f32.partialorder %v1743_v51, 8.507059e+37 }
 0x11e   : > { %v3552_v30 = vpop.eup %3551  ;;  %v1582_v31 = vadd.f32 %v3550_v26, %v3548_v20  ;;  %3563 = vlog2.f32 %v721_v16 }
 0x11f   : > { %v3554_v33 = vpop.eup %3553  ;;  %3565 = vlog2.f32 %v722_v19 }
 0x120   : > { %v3556_v37 = vpop.eup %3555  ;;  %1577 = vadd.xlane.f32.xlu0 %v1576_v21  ;;  %v973_v38 = vmul.f32 0.6931472, %v3554_v33  ;;  %3567 = vlog2.f32 %v789_v22 }
 0x121   : > { %v3558_v41 = vpop.eup %3557  ;;  %v1597_v42 = vadd.f32 %v3556_v37, %v3552_v30  ;;  %3569 = vlog2.f32 %v790_v27 }
 0x122   : > { %v3560_v45 = vpop.eup %3559  ;;  %1583 = vadd.xlane.f32.xlu1 %v1582_v31  ;;  %v975_v46 = vmul.f32 0.6931472, %v3558_v41  ;;  %v1161_v47 = vmul.f32 %v4581_v25, %v973_v38  ;;  %3571 = vrcp.f32 %v4581_v25 }
 0x123   : > { %v3562_v49 = vpop.eup %3561  ;;  %v861_v50 = vmul.f32 0.6931472, %v3560_v45  ;;  %3573 = vlog2.f32 %v737_v34  ;;  %v663_v34 = vld [vmem:[%s4565_s18 + $0x2a0] sm:$0xff] }
 0x124   : > { %v3564_v52 = vpop.eup %3563  ;;  %v1162_v53 = vmul.f32 %v4581_v25, %v975_v46  ;;  %v1357_v54 = vmul.f32 1.442695, %v1161_v47  ;;  %v863_v55 = vmul.f32 0.6931472, %v3562_v49  ;;  %3575 = vlog2.f32 %v738_v35  ;;  %v665_v46 = vld [vmem:[%s4565_s18 + $0x2b0] sm:$0xff] }
 0x125   : > { %v3566_v56 = vpop.eup %3565  ;;  %1598 = vadd.xlane.f32.xlu2 %v1597_v42  ;;  %v1105_v57 = vmul.f32 %v4581_v25, %v861_v50  ;;  %v865_v58 = vmul.f32 0.6931472, %v3564_v52  ;;  %3577 = vlog2.f32 %v763_v39  ;;  %v791_v32 = vmax.f32 %v663_v34, 1e-06 }
 0x126   : > { %v3568_v60 = vpop.eup %3567  ;;  %3579 = vpow2.f32 %v1357_v54  ;;  %v1359_v61 = vmul.f32 1.442695, %v1162_v53  ;;  %v1106_v62 = vmul.f32 %v4581_v25, %v863_v55  ;;  %v867_v63 = vmul.f32 0.6931472, %v3566_v56  ;;  %v637_v53 = vld [vmem:[%s4565_s18 + $0x1d0] sm:$0xff] }
 0x127   : > { %v3570_v0 = vpop.eup %3569  ;;  %v1245_v1 = vmul.f32 1.442695, %v1105_v57  ;;  %v1107_v2 = vmul.f32 %v4581_v25, %v865_v58  ;;  %v1001_v3 = vmul.f32 0.6931472, %v3568_v60  ;;  %3581 = vlog2.f32 %v764_v40  ;;  %v664_v40 = vld [vmem:[%s4565_s18 + $0x2a8] sm:$0xff]  ;;  %v638_v57 = vld [vmem:[%s4565_s18 + $0x1d8] sm:$0xff] }
 0x128   : > { %v3572_v4 = vpop.eup %3571  ;;  %3583 = vpow2.f32 %v1359_v61  ;;  %v1247_v5 = vmul.f32 1.442695, %v1106_v62  ;;  %v1108_v6 = vmul.f32 %v4581_v25, %v867_v63  ;;  %v1003_v7 = vmul.f32 0.6931472, %v3570_v0  ;;  %v677_v61 = vld [vmem:[%s4565_s18 + $0x310] sm:$0xff] }
 0x129   : > { %v3574_v8 = vpop.eup %3573  ;;  %3585 = vpow2.f32 %v1245_v1  ;;  %v1249_v9 = vmul.f32 1.442695, %v1107_v2  ;;  %v1175_v10 = vmul.f32 %v4581_v25, %v1001_v3  ;;  %v1735_v11 = vmul.f32 %v3572_v4, %v4581_v25 }
 0x12a   : > { %v3576_v12 = vpop.eup %3575  ;;  %3587 = vpow2.f32 %v1247_v5  ;;  %v1251_v13 = vmul.f32 1.442695, %v1108_v6  ;;  %v1176_v14 = vmul.f32 %v4581_v25, %v1003_v7  ;;  %vm1740_vm1 = vweird.f32 %v3572_v4  ;;  %v678_v5 = vld [vmem:[%s4565_s18 + $0x318] sm:$0xff] }
 0x12b   : > { %v3578_v15 = vpop.eup %3577  ;;  %3589 = vpow2.f32 %v1249_v9  ;;  %v1385_v16 = vmul.f32 1.442695, %v1175_v10  ;;  %v1736_v17 = vsub.f32 1.0, %v1735_v11  ;;  %v897_v18 = vmul.f32 0.6931472, %v3574_v8  ;;  %vm4723_vm3 = vmor %vm1739_vm0, %vm1740_vm1  ;;  %v623_v9 = vld [vmem:[%s4565_s18 + $0x160] sm:$0xff] }
 0x12c   : > { %v3580_v19 = vpop.eup %3579  ;;  %3591 = vpow2.f32 %v1251_v13  ;;  %v1387_v20 = vmul.f32 1.442695, %v1176_v14  ;;  %v899_v21 = vmul.f32 0.6931472, %v3576_v12  ;;  %v949_v22 = vmul.f32 0.6931472, %v3578_v15 }
 0x12d   : > { %v3582_v23 = vpop.eup %3581  ;;  %3593 = vpow2.f32 %v1385_v16  ;;  %v1737_v24 = vmul.f32 %v3572_v4, %v1736_v17  ;;  %v1123_v27 = vmul.f32 %v4581_v25, %v897_v18  ;;  %v793_v56 = vmax.f32 %v665_v46, 1e-06  ;;  %v624_v13 = vld [vmem:[%s4565_s18 + $0x168] sm:$0xff]  ;;  %v675_v17 = vld [vmem:[%s4565_s18 + $0x300] sm:$0xff] }
 0x12e   : > { %v3584_v28 = vpop.eup %3583  ;;  %3595 = vpow2.f32 %v1387_v20  ;;  %v1124_v30 = vmul.f32 %v4581_v25, %v899_v21  ;;  %v951_v31 = vmul.f32 0.6931472, %v3582_v23  ;;  %v1149_v33 = vmul.f32 %v4581_v25, %v949_v22 }
 0x12f   : > { %v3586_v35 = vpop.eup %3585  ;;  %v1579_v37 = vadd.f32 %v3584_v28, %v3580_v19  ;;  %v1738_v38 = vadd.f32 %v3572_v4, %v1737_v24  ;;  %v1281_v39 = vmul.f32 1.442695, %v1123_v27  ;;  %3597 = vlog2.f32 %v735_v44  ;;  %v666_v44 = vld [vmem:[%s4565_s18 + $0x2b8] sm:$0xff] }
 0x130   : > { %v3588_v41 = vpop.eup %3587  ;;  %v1283_v42 = vmul.f32 1.442695, %v1124_v30  ;;  %v1150_v43 = vmul.f32 %v4581_v25, %v951_v31  ;;  %v1333_v45 = vmul.f32 1.442695, %v1149_v33  ;;  %3599 = vlog2.f32 %v736_v48 }
 0x131   : > { %v3590_v47 = vpop.eup %3589  ;;  %1580 = vadd.xlane.f32.xlu0 %v1579_v37  ;;  %v1495_v49 = vadd.f32 %v3588_v41, %v3586_v35  ;;  %v1742_v50 = vsel %vm4723_vm3, %v3572_v4, %v1738_v38  ;;  %3601 = vpow2.f32 %v1281_v39  ;;  %v792_v48 = vmax.f32 %v664_v40, 1e-06 }
 0x132   : > { %v3592_v51 = vpop.eup %3591  ;;  %v1747_v52 = vsel %vm4715_vm2, %v4707_v59, %v1742_v50  ;;  %3603 = vpow2.f32 %v1283_v42  ;;  %v1335_v36 = vmul.f32 1.442695, %v1150_v43  ;;  %v794_v60 = vmax.f32 %v666_v44, 1e-06 }
 0x133   : > { %v3594_v54 = vpop.eup %3593  ;;  %1496 = vadd.xlane.f32.xlu1 %v1495_v49  ;;  %v1498_v55 = vadd.f32 %v3592_v51, %v3590_v47  ;;  %3288 = vpush %v1747_v52  ;;  %3605 = vpow2.f32 %v1333_v45  ;;  %v765_v63 = vmax.f32 %v637_v53, 1e-06  ;;  %v766_v2 = vmax.f32 %v638_v57, 1e-06 }
 0x134   : > { %v3596_v58 = vpop.eup %3595  ;;  %3607 = vpow2.f32 %v1335_v36  ;;  %v805_v6 = vmax.f32 %v677_v61, 1e-06  ;;  %v806_v16 = vmax.f32 %v678_v5, 1e-06  ;;  %v751_v21 = vmax.f32 %v623_v9, 1e-06 }
 0x135   : > { %v3598_v62 = vpop.eup %3597  ;;  %1499 = vadd.xlane.f32.xlu2 %v1498_v55  ;;  %v1600_v59 = vadd.f32 %v3596_v58, %v3594_v54  ;;  %3609 = vlog2.f32 %v791_v32  ;;  %v752_v24 = vmax.f32 %v624_v13, 1e-06  ;;  %v803_v28 = vmax.f32 %v675_v17, 1e-06  ;;  %v676_v32 = vld [vmem:[%s4565_s18 + $0x308] sm:$0xff]  ;;  %v651_v36 = vld [vmem:[%s4565_s18 + $0x240] sm:$0xff] }
 0x136   : > { %v3600_v0 = vpop.eup %3599  ;;  %v893_v1 = vmul.f32 0.6931472, %v3598_v62  ;;  %3611 = vlog2.f32 %v792_v48  ;;  %vm2364_vm0 = vcmask 1046534   ;;  %vm2366_vm1 = vcmask 1047559  }
 0x137   : > { %v3602_v3 = vpop.eup %3601  ;;  %v895_v4 = vmul.f32 0.6931472, %v3600_v0  ;;  %3613 = vlog2.f32 %v793_v56  ;;  %vm2449_vm2 = vcmask 523264  }
 0x138   : > { %v3604_v7 = vpop.eup %3603  ;;  %v1121_v8 = vmul.f32 %v4581_v25, %v893_v1  ;;  %3615 = vlog2.f32 %v794_v60  ;;  %v804_v60 = vmax.f32 %v676_v32, 1e-06 }
 0x139   : > { %v3606_v10 = vpop.eup %3605  ;;  %1601 = vadd.xlane.f32.xlu0 %v1600_v59  ;;  %v1522_v11 = vadd.f32 %v3604_v7, %v3602_v3  ;;  %v1122_v12 = vmul.f32 %v4581_v25, %v895_v4  ;;  %3617 = vlog2.f32 %v765_v63  ;;  %v779_v63 = vmax.f32 %v651_v36, 1e-06 }
 0x13a   : > { %v3608_v14 = vpop.eup %3607  ;;  %v1277_v15 = vmul.f32 1.442695, %v1121_v8  ;;  %3619 = vlog2.f32 %v766_v2 }
 0x13b   : > { %v3610_v18 = vpop.eup %3609  ;;  %1523 = vadd.xlane.f32.xlu1 %v1522_v11  ;;  %v1561_v19 = vadd.f32 %v3608_v14, %v3606_v10  ;;  %v1279_v20 = vmul.f32 1.442695, %v1122_v12  ;;  %3621 = vlog2.f32 %v805_v6  ;;  %v652_v6 = vld [vmem:[%s4565_s18 + $0x248] sm:$0xff]  ;;  %v653_v10 = vld [vmem:[%s4565_s18 + $0x250] sm:$0xff] }
 0x13c   : > { %v3612_v22 = vpop.eup %3611  ;;  %3623 = vpow2.f32 %v1277_v15  ;;  %v1005_v23 = vmul.f32 0.6931472, %v3610_v18  ;;  %v654_v15 = vld [vmem:[%s4565_s18 + $0x258] sm:$0xff]  ;;  %v780_v18 = vmax.f32 %v652_v6, 1e-06 }
 0x13d   : > { %v3614_v26 = vpop.eup %3613  ;;  %1562 = vadd.xlane.f32.xlu2 %v1561_v19  ;;  %3625 = vpow2.f32 %v1279_v20  ;;  %v1007_v27 = vmul.f32 0.6931472, %v3612_v22  ;;  %v625_v19 = vld [vmem:[%s4565_s18 + $0x170] sm:$0xff] }
 0x13e   : > { %v3616_v29 = vpop.eup %3615  ;;  %v1177_v30 = vmul.f32 %v4581_v25, %v1005_v23  ;;  %v1009_v31 = vmul.f32 0.6931472, %v3614_v26  ;;  %3627 = vlog2.f32 %v806_v16  ;;  %v781_v23 = vmax.f32 %v653_v10, 1e-06 }
 0x13f   : > { %v3618_v33 = vpop.eup %3617  ;;  %v1178_v34 = vmul.f32 %v4581_v25, %v1007_v27  ;;  %v1011_v35 = vmul.f32 0.6931472, %v3616_v29  ;;  %3629 = vlog2.f32 %v751_v21  ;;  %v782_v27 = vmax.f32 %v654_v15, 1e-06 }
 0x140   : > { %v3620_v37 = vpop.eup %3619  ;;  %v1389_v38 = vmul.f32 1.442695, %v1177_v30  ;;  %v1179_v39 = vmul.f32 %v4581_v25, %v1009_v31  ;;  %v953_v40 = vmul.f32 0.6931472, %v3618_v33  ;;  %3631 = vlog2.f32 %v752_v24  ;;  %v626_v24 = vld [vmem:[%s4565_s18 + $0x178] sm:$0xff] }
 0x141   : > { %v3622_v41 = vpop.eup %3621  ;;  %v1391_v42 = vmul.f32 1.442695, %v1178_v34  ;;  %v1180_v43 = vmul.f32 %v4581_v25, %v1011_v35  ;;  %v955_v45 = vmul.f32 0.6931472, %v3620_v37  ;;  %3633 = vlog2.f32 %v803_v28  ;;  %v681_v28 = vld [vmem:[%s4565_s18 + $0x330] sm:$0xff]  ;;  %v682_v33 = vld [vmem:[%s4565_s18 + $0x338] sm:$0xff] }
 0x142   : > { %v3624_v46 = vpop.eup %3623  ;;  %3635 = vpow2.f32 %v1389_v38  ;;  %v1393_v47 = vmul.f32 1.442695, %v1179_v39  ;;  %v1151_v49 = vmul.f32 %v4581_v25, %v953_v40  ;;  %v1033_v50 = vmul.f32 0.6931472, %v3622_v41 }
 0x143   : > { %v3626_v44 = vpop.eup %3625  ;;  %3637 = vpow2.f32 %v1391_v42  ;;  %v1395_v51 = vmul.f32 1.442695, %v1180_v43  ;;  %v1152_v52 = vmul.f32 %v4581_v25, %v955_v45  ;;  %v753_v31 = vmax.f32 %v625_v19, 1e-06  ;;  %v691_v43 = vld [vmem:[%s4565_s18 + $0x380] sm:$0xff] }
 0x144   : > { %v3628_v48 = vpop.eup %3627  ;;  %v1519_v53 = vadd.f32 %v3626_v44, %v3624_v46  ;;  %3639 = vpow2.f32 %v1393_v47  ;;  %v1337_v54 = vmul.f32 1.442695, %v1151_v49  ;;  %v1191_v55 = vmul.f32 %v4581_v25, %v1033_v50  ;;  %v692_v49 = vld [vmem:[%s4565_s18 + $0x388] sm:$0xff]  ;;  %v679_v44 = vld [vmem:[%s4565_s18 + $0x320] sm:$0xff] }
 0x145   : > { %v3630_v56 = vpop.eup %3629  ;;  %3641 = vpow2.f32 %v1395_v51  ;;  %v1339_v57 = vmul.f32 1.442695, %v1152_v52  ;;  %v1035_v58 = vmul.f32 0.6931472, %v3628_v48  ;;  %v754_v35 = vmax.f32 %v626_v24, 1e-06  ;;  %v1503_v24 = vpop.xlane.xlu1 %1502 }
 0x146   : > { %v3632_v61 = vpop.eup %3631  ;;  %1520 = vadd.xlane.f32.xlu0 %v1519_v53  ;;  %3643 = vpow2.f32 %v1337_v54  ;;  %v1417_v62 = vmul.f32 1.442695, %v1191_v55  ;;  %v925_v59 = vmul.f32 0.6931472, %v3630_v56  ;;  %v809_v39 = vmax.f32 %v681_v28, 1e-06 }
 0x147   : > { %v3634_v0 = vpop.eup %3633  ;;  %3645 = vpow2.f32 %v1339_v57  ;;  %v1192_v1 = vmul.f32 %v4581_v25, %v1035_v58  ;;  %v927_v2 = vmul.f32 0.6931472, %v3632_v61  ;;  %v810_v42 = vmax.f32 %v682_v33, 1e-06  ;;  %v680_v53 = vld [vmem:[%s4565_s18 + $0x328] sm:$0xff] }
 0x148   : > { %v3636_v3 = vpop.eup %3635  ;;  %3647 = vpow2.f32 %v1417_v62  ;;  %v1137_v4 = vmul.f32 %v4581_v25, %v925_v59  ;;  %v1029_v5 = vmul.f32 0.6931472, %v3634_v0  ;;  %v819_v48 = vmax.f32 %v691_v43, 1e-06 }
 0x149   : > { %v3638_v7 = vpop.eup %3637  ;;  %v1419_v8 = vmul.f32 1.442695, %v1192_v1  ;;  %v1138_v9 = vmul.f32 %v4581_v25, %v927_v2  ;;  %3649 = vlog2.f32 %v804_v60  ;;  %v820_v56 = vmax.f32 %v692_v49, 1e-06 }
 0x14a   : > { %v3640_v11 = vpop.eup %3639  ;;  %v1603_v12 = vadd.f32 %v3638_v7, %v3636_v3  ;;  %v1309_v13 = vmul.f32 1.442695, %v1137_v4  ;;  %v1189_v14 = vmul.f32 %v4581_v25, %v1029_v5  ;;  %3651 = vlog2.f32 %v779_v63 }
 0x14b   : > { %v3642_v16 = vpop.eup %3641  ;;  %3653 = vpow2.f32 %v1419_v8  ;;  %v1311_v17 = vmul.f32 1.442695, %v1138_v9  ;;  %v807_v60 = vmax.f32 %v679_v44, 1e-06  ;;  %v808_v59 = vmax.f32 %v680_v53, 1e-06 }
 0x14c   : > { %v3644_v20 = vpop.eup %3643  ;;  %1604 = vadd.xlane.f32.xlu1 %v1603_v12  ;;  %v1606_v21 = vadd.f32 %v3642_v16, %v3640_v11  ;;  %3655 = vpow2.f32 %v1309_v13  ;;  %v1413_v22 = vmul.f32 1.442695, %v1189_v14 }
 0x14d   : > { %v3646_v26 = vpop.eup %3645  ;;  %3657 = vpow2.f32 %v1311_v17 }
 0x14e   : > { %v3648_v29 = vpop.eup %3647  ;;  %1607 = vadd.xlane.f32.xlu2 %v1606_v21  ;;  %v1564_v30 = vadd.f32 %v3646_v26, %v3644_v20  ;;  %3659 = vpow2.f32 %v1413_v22 }
 0x14f   : > { %v3650_v34 = vpop.eup %3649  ;;  %3661 = vlog2.f32 %v780_v18 }
 0x150   : > { %v3652_v37 = vpop.eup %3651  ;;  %1565 = vadd.xlane.f32.xlu0 %v1564_v30  ;;  %v1031_v38 = vmul.f32 0.6931472, %v3650_v34  ;;  %3663 = vlog2.f32 %v781_v23  ;;  %v1485_v30 = vpop.xlane.xlu2 %1484 }
 0x151   : > { %v3654_v40 = vpop.eup %3653  ;;  %v981_v41 = vmul.f32 0.6931472, %v3652_v37  ;;  %3665 = vlog2.f32 %v782_v27 }
 0x152   : > { %v3656_v45 = vpop.eup %3655  ;;  %v1624_v46 = vadd.f32 %v3654_v40, %v3648_v29  ;;  %v1190_v47 = vmul.f32 %v4581_v25, %v1031_v38  ;;  %3667 = vlog2.f32 %v753_v31  ;;  %v1677_v29 = vmul.f32 0.00390625, %v1503_v24  ;;  %v1479_v40 = vpop.xlane.xlu0 %1478 }
 0x153   : > { %v3658_v50 = vpop.eup %3657  ;;  %v1165_v32 = vmul.f32 %v4581_v25, %v981_v41  ;;  %3669 = vlog2.f32 %v754_v35  ;;  %v1671_v35 = vmul.f32 0.00390625, %v1485_v30 }
 0x154   : > { %v3660_v51 = vpop.eup %3659  ;;  %1625 = vadd.xlane.f32.xlu1 %v1624_v46  ;;  %v1543_v52 = vadd.f32 %v3658_v50, %v3656_v45  ;;  %v1415_v36 = vmul.f32 1.442695, %v1190_v47  ;;  %3671 = vlog2.f32 %v809_v39  ;;  %v639_v50 = vld [vmem:[%s4565_s18 + $0x1e0] sm:$0xff] }
 0x155   : > { %v3662_v54 = vpop.eup %3661  ;;  %v1365_v55 = vmul.f32 1.442695, %v1165_v32  ;;  %3673 = vlog2.f32 %v810_v42 }
 0x156   : > { %v3664_v57 = vpop.eup %3663  ;;  %1544 = vadd.xlane.f32.xlu2 %v1543_v52  ;;  %3675 = vpow2.f32 %v1415_v36  ;;  %v983_v58 = vmul.f32 0.6931472, %v3662_v54  ;;  %v640_v52 = vld [vmem:[%s4565_s18 + $0x1e8] sm:$0xff]  ;;  %v1669_v54 = vmul.f32 0.00390625, %v1479_v40 }
 0x157   : > { %v3666_v61 = vpop.eup %3665  ;;  %3677 = vpow2.f32 %v1365_v55  ;;  %v985_v62 = vmul.f32 0.6931472, %v3664_v57  ;;  %v641_v55 = vld [vmem:[%s4565_s18 + $0x1f0] sm:$0xff] }
 0x158   : > { %v3668_v63 = vpop.eup %3667  ;;  %v1166_v0 = vmul.f32 %v4581_v25, %v983_v58  ;;  %v987_v1 = vmul.f32 0.6931472, %v3666_v61  ;;  %3679 = vlog2.f32 %v819_v48  ;;  %v767_v58 = vmax.f32 %v639_v50, 1e-06 }
 0x159   : > { %v3670_v2 = vpop.eup %3669  ;;  %v1167_v3 = vmul.f32 %v4581_v25, %v985_v62  ;;  %v929_v4 = vmul.f32 0.6931472, %v3668_v63  ;;  %3681 = vlog2.f32 %v820_v56  ;;  %v693_v63 = vld [vmem:[%s4565_s18 + $0x390] sm:$0xff] }
 0x15a   : > { %v3672_v5 = vpop.eup %3671  ;;  %v1367_v6 = vmul.f32 1.442695, %v1166_v0  ;;  %v1168_v7 = vmul.f32 %v4581_v25, %v987_v1  ;;  %v931_v8 = vmul.f32 0.6931472, %v3670_v2  ;;  %3683 = vlog2.f32 %v807_v60  ;;  %v642_v60 = vld [vmem:[%s4565_s18 + $0x1f8] sm:$0xff] }
 0x15b   : > { %v3674_v9 = vpop.eup %3673  ;;  %v1369_v10 = vmul.f32 1.442695, %v1167_v3  ;;  %v1139_v11 = vmul.f32 %v4581_v25, %v929_v4  ;;  %v1041_v12 = vmul.f32 0.6931472, %v3672_v5  ;;  %3685 = vlog2.f32 %v808_v59  ;;  %v694_v2 = vld [vmem:[%s4565_s18 + $0x398] sm:$0xff] }
 0x15c   : > { %v3676_v13 = vpop.eup %3675  ;;  %3687 = vpow2.f32 %v1367_v6  ;;  %v1371_v14 = vmul.f32 1.442695, %v1168_v7  ;;  %v1140_v15 = vmul.f32 %v4581_v25, %v931_v8  ;;  %v1043_v16 = vmul.f32 0.6931472, %v3674_v9  ;;  %v1506_v6 = vpop.xlane.xlu1 %1505 }
 0x15d   : > { %v3678_v17 = vpop.eup %3677  ;;  %v1621_v18 = vadd.f32 %v3676_v13, %v3660_v51  ;;  %3689 = vpow2.f32 %v1369_v10  ;;  %v1313_v19 = vmul.f32 1.442695, %v1139_v11  ;;  %v1195_v20 = vmul.f32 %v4581_v25, %v1041_v12  ;;  %v1488_v9 = vpop.xlane.xlu2 %1487 }
 0x15e   : > { %v3680_v21 = vpop.eup %3679  ;;  %3691 = vpow2.f32 %v1371_v14  ;;  %v1315_v22 = vmul.f32 1.442695, %v1140_v15  ;;  %v1196_v23 = vmul.f32 %v4581_v25, %v1043_v16  ;;  %v768_v59 = vmax.f32 %v640_v52, 1e-06  ;;  %v1482_v12 = vpop.xlane.xlu0 %1481  ;;  %v669_v15 = vld [vmem:[%s4565_s18 + $0x2d0] sm:$0xff] }
 0x15f   : > { %v3682_v26 = vpop.eup %3681  ;;  %1622 = vadd.xlane.f32.xlu0 %v1621_v18  ;;  %3693 = vpow2.f32 %v1313_v19  ;;  %v1425_v27 = vmul.f32 1.442695, %v1195_v20  ;;  %v1061_v28 = vmul.f32 0.6931472, %v3680_v21  ;;  %v769_v1 = vmax.f32 %v641_v55, 1e-06 }
 0x160   : > { %v3684_v31 = vpop.eup %3683  ;;  %3695 = vpow2.f32 %v1315_v22  ;;  %v1427_v33 = vmul.f32 1.442695, %v1196_v23  ;;  %v1063_v34 = vmul.f32 0.6931472, %v3682_v26  ;;  %v770_v5 = vmax.f32 %v642_v60, 1e-06 }
 0x161   : > { %v3686_v37 = vpop.eup %3685  ;;  %3697 = vpow2.f32 %v1425_v27  ;;  %v1205_v38 = vmul.f32 %v4581_v25, %v1061_v28  ;;  %v1037_v39 = vmul.f32 0.6931472, %v3684_v31  ;;  %v821_v8 = vmax.f32 %v693_v63, 1e-06  ;;  %v670_v19 = vld [vmem:[%s4565_s18 + $0x2d8] sm:$0xff]  ;;  %v695_v20 = vld [vmem:[%s4565_s18 + $0x3a0] sm:$0xff] }
 0x162   : > { %v3688_v41 = vpop.eup %3687  ;;  %3699 = vpow2.f32 %v1427_v33  ;;  %v1206_v42 = vmul.f32 %v4581_v25, %v1063_v34  ;;  %v1039_v43 = vmul.f32 0.6931472, %v3686_v37  ;;  %v822_v11 = vmax.f32 %v694_v2, 1e-06  ;;  %v696_v23 = vld [vmem:[%s4565_s18 + $0x3a8] sm:$0xff] }
 0x163   : > { %v3690_v45 = vpop.eup %3689  ;;  %v1585_v46 = vadd.f32 %v3688_v41, %v3678_v17  ;;  %v1445_v47 = vmul.f32 1.442695, %v1205_v38  ;;  %v1193_v49 = vmul.f32 %v4581_v25, %v1037_v39  ;;  %3701 = vlog2.f32 %v1677_v29 }
 0x164   : > { %v3692_v32 = vpop.eup %3691  ;;  %v1447_v44 = vmul.f32 1.442695, %v1206_v42  ;;  %v1194_v51 = vmul.f32 %v4581_v25, %v1039_v43  ;;  %3703 = vlog2.f32 %v1671_v35  ;;  %v1678_v14 = vmul.f32 0.00390625, %v1506_v6  ;;  %s3289_s26 = spop %3288 }
 0x165   : > { %v3694_v36 = vpop.eup %3693  ;;  %1586 = vadd.xlane.f32.xlu1 %v1585_v46  ;;  %v1588_v48 = vadd.f32 %v3692_v32, %v3690_v45  ;;  %3705 = vpow2.f32 %v1445_v47  ;;  %v1421_v53 = vmul.f32 1.442695, %v1193_v49  ;;  %v1672_v18 = vmul.f32 0.00390625, %v1488_v9 }
 0x166   : > { %v3696_v56 = vpop.eup %3695  ;;  %3707 = vpow2.f32 %v1447_v44  ;;  %v1423_v57 = vmul.f32 1.442695, %v1194_v51  ;;  %v1670_v22 = vmul.f32 0.00390625, %v1482_v12  ;;  %v797_v28 = vmax.f32 %v669_v15, 1e-06 }
 0x167   : > { %v3698_v61 = vpop.eup %3697  ;;  %1589 = vadd.xlane.f32.xlu2 %v1588_v48  ;;  %v1546_v62 = vadd.f32 %v3696_v56, %v3694_v36  ;;  %3709 = vpow2.f32 %v1421_v53  ;;  %v798_v31 = vmax.f32 %v670_v19, 1e-06  ;;  %v823_v33 = vmax.f32 %v695_v20, 1e-06 }
 0x168   : > { %v3700_v0 = vpop.eup %3699  ;;  %3711 = vpow2.f32 %v1423_v57  ;;  %v4799_v37 = vstv %s3289_s26  ;;  %v824_v38 = vmax.f32 %v696_v23, 1e-06  ;;  %v2218_v42 = vlaneseq }
 0x169   : > { %v3702_v3 = vpop.eup %3701  ;;  %1547 = vadd.xlane.f32.xlu0 %v1546_v62  ;;  %v1630_v4 = vadd.f32 %v3700_v0, %v3698_v61  ;;  %3713 = vlog2.f32 %v1669_v54 }
 0x16a   : > { %v3704_v7 = vpop.eup %3703  ;;  %3715 = vlog2.f32 %v767_v58  ;;  %v1766_v40 = vmul.f32 0.6931472, %v3702_v3 }
 0x16b   : > { %v3706_v10 = vpop.eup %3705  ;;  %3717 = vlog2.f32 %v768_v59  ;;  %v1754_v27 = vmul.f32 0.6931472, %v3704_v7 }
 0x16c   : > { %v3708_v13 = vpop.eup %3707  ;;  %3719 = vlog2.f32 %v769_v1 }
 0x16d   : > { %v3710_v16 = vpop.eup %3709  ;;  %1631 = vadd.xlane.f32.xlu1 %v1630_v4  ;;  %v1645_v17 = vadd.f32 %v3708_v13, %v3706_v10  ;;  %3721 = vlog2.f32 %v770_v5  ;;  %v1880_v47 = vmul.f32 %v4799_v37, %v1754_v27 }
 0x16e   : > { %v3712_v21 = vpop.eup %3711  ;;  %3723 = vlog2.f32 %v821_v8 }
 0x16f   : > { %v3714_v24 = vpop.eup %3713  ;;  %1646 = vadd.xlane.f32.xlu2 %v1645_v17  ;;  %v1627_v26 = vadd.f32 %v3712_v21, %v3710_v16  ;;  %3725 = vlog2.f32 %v822_v11  ;;  %v1946_v61 = vmul.f32 1.442695, %v1880_v47  ;;  %v1886_v11 = vmul.f32 %v4799_v37, %v1766_v40 }
 0x170   : > { %v3716_v29 = vpop.eup %3715  ;;  %v1750_v30 = vmul.f32 0.6931472, %v3714_v24  ;;  %3727 = vlog2.f32 %v1678_v14 }
 0x171   : > { %v3718_v34 = vpop.eup %3717  ;;  %1628 = vadd.xlane.f32.xlu0 %v1627_v26  ;;  %v957_v35 = vmul.f32 0.6931472, %v3716_v29  ;;  %3729 = vlog2.f32 %v1672_v18 }
 0x172   : > { %v3720_v39 = vpop.eup %3719  ;;  %v959_v41 = vmul.f32 0.6931472, %v3718_v34  ;;  %3731 = vlog2.f32 %v1670_v22  ;;  %v1878_v44 = vmul.f32 %v4799_v37, %v1750_v30  ;;  %v667_v34 = vld [vmem:[%s4565_s18 + $0x2c0] sm:$0xff] }
 0x173   : > { %v3722_v43 = vpop.eup %3721  ;;  %v1153_v45 = vmul.f32 %v4581_v25, %v957_v35  ;;  %v961_v46 = vmul.f32 0.6931472, %v3720_v39  ;;  %3733 = vlog2.f32 %v797_v28  ;;  %v1958_v39 = vmul.f32 1.442695, %v1886_v11 }
 0x174   : > { %v3724_v49 = vpop.eup %3723  ;;  %v1154_v50 = vmul.f32 %v4581_v25, %v959_v41  ;;  %v963_v32 = vmul.f32 0.6931472, %v3722_v43  ;;  %3735 = vlog2.f32 %v798_v31  ;;  %v1942_v4 = vmul.f32 1.442695, %v1878_v44  ;;  %v668_v41 = vld [vmem:[%s4565_s18 + $0x2c8] sm:$0xff] }
 0x175   : > { %v3726_v51 = vpop.eup %3725  ;;  %v1341_v52 = vmul.f32 1.442695, %v1153_v45  ;;  %v1155_v36 = vmul.f32 %v4581_v25, %v961_v46  ;;  %v1065_v48 = vmul.f32 0.6931472, %v3724_v49  ;;  %3737 = vlog2.f32 %v823_v33  ;;  %v1512_v46 = vpop.xlane.xlu1 %1511 }
 0x176   : > { %v3728_v53 = vpop.eup %3727  ;;  %v1343_v54 = vmul.f32 1.442695, %v1154_v50  ;;  %v1156_v55 = vmul.f32 %v4581_v25, %v963_v32  ;;  %v1067_v56 = vmul.f32 0.6931472, %v3726_v51  ;;  %3739 = vlog2.f32 %v824_v38 }
 0x177   : > { %v3730_v57 = vpop.eup %3729  ;;  %3741 = vpow2.f32 %v1341_v52  ;;  %v1345_v58 = vmul.f32 1.442695, %v1155_v36  ;;  %v1207_v60 = vmul.f32 %v4581_v25, %v1065_v48  ;;  %v1768_v7 = vmul.f32 0.6931472, %v3728_v53  ;;  %v1509_v52 = vpop.xlane.xlu0 %1508  ;;  %v655_v36 = vld [vmem:[%s4565_s18 + $0x260] sm:$0xff] }
 0x178   : > { %v3732_v62 = vpop.eup %3731  ;;  %3743 = vpow2.f32 %v1343_v54  ;;  %v1347_v59 = vmul.f32 1.442695, %v1156_v55  ;;  %v1208_v63 = vmul.f32 %v4581_v25, %v1067_v56  ;;  %v1756_v0 = vmul.f32 0.6931472, %v3730_v57  ;;  %v1527_v54 = vpop.xlane.xlu2 %1526 }
 0x179   : > { %v3734_v1 = vpop.eup %3733  ;;  %3745 = vpow2.f32 %v1345_v58  ;;  %v1449_v2 = vmul.f32 1.442695, %v1207_v60  ;;  %v1752_v3 = vmul.f32 0.6931472, %v3732_v62  ;;  %v1887_v22 = vmul.f32 %v4799_v37, %v1768_v7 }
 0x17a   : > { %v3736_v5 = vpop.eup %3735  ;;  %3747 = vpow2.f32 %v1347_v59  ;;  %v1451_v6 = vmul.f32 1.442695, %v1208_v63  ;;  %v1017_v8 = vmul.f32 0.6931472, %v3734_v1  ;;  %v1881_v14 = vmul.f32 %v4799_v37, %v1756_v0  ;;  %v657_v59 = vld [vmem:[%s4565_s18 + $0x270] sm:$0xff] }
 0x17b   : > { %v3738_v9 = vpop.eup %3737  ;;  %3749 = vpow2.f32 %v1449_v2  ;;  %v1879_v10 = vmul.f32 %v4799_v37, %v1752_v3  ;;  %v1019_v12 = vmul.f32 0.6931472, %v3736_v5  ;;  %v1960_v45 = vmul.f32 1.442695, %v1887_v22  ;;  %v658_v5 = vld [vmem:[%s4565_s18 + $0x278] sm:$0xff] }
 0x17c   : > { %v3740_v13 = vpop.eup %3739  ;;  %3751 = vpow2.f32 %v1451_v6  ;;  %v1183_v15 = vmul.f32 %v4581_v25, %v1017_v8  ;;  %v1069_v16 = vmul.f32 0.6931472, %v3738_v9  ;;  %v1948_v31 = vmul.f32 1.442695, %v1881_v14 }
 0x17d   : > { %v3742_v17 = vpop.eup %3741  ;;  %v1184_v18 = vmul.f32 %v4581_v25, %v1019_v12  ;;  %v1944_v19 = vmul.f32 1.442695, %v1879_v10  ;;  %v1071_v20 = vmul.f32 0.6931472, %v3740_v13  ;;  %3753 = vpow2.f32 %v1942_v4 }
 0x17e   : > { %v3744_v21 = vpop.eup %3743  ;;  %v1401_v23 = vmul.f32 1.442695, %v1183_v15  ;;  %v1209_v24 = vmul.f32 %v4581_v25, %v1069_v16  ;;  %3755 = vpow2.f32 %v1946_v61  ;;  %v4820_v50 = vand.u32 127, %v2218_v42  ;;  %v656_v42 = vld [vmem:[%s4565_s18 + $0x268] sm:$0xff] }
 0x17f   : > { %v3746_v26 = vpop.eup %3745  ;;  %v1567_v27 = vadd.f32 %v3744_v21, %v3742_v17  ;;  %v1403_v28 = vmul.f32 1.442695, %v1184_v18  ;;  %v1210_v29 = vmul.f32 %v4581_v25, %v1071_v20  ;;  %3757 = vpow2.f32 %v1944_v19 }
 0x180   : > { %v3748_v30 = vpop.eup %3747  ;;  %3759 = vpow2.f32 %v1401_v23  ;;  %v1453_v33 = vmul.f32 1.442695, %v1209_v24  ;;  %v795_v32 = vmax.f32 %v667_v34, 1e-06  ;;  %v796_v51 = vmax.f32 %v668_v41, 1e-06 }
 0x181   : > { %v3750_v35 = vpop.eup %3749  ;;  %1568 = vadd.xlane.f32.xlu1 %v1567_v27  ;;  %v1570_v38 = vadd.f32 %v3748_v30, %v3746_v26  ;;  %3761 = vpow2.f32 %v1403_v28  ;;  %v1455_v40 = vmul.f32 1.442695, %v1210_v29  ;;  %v1680_v53 = vmul.f32 0.00390625, %v1512_v46 }
 0x182   : > { %v3752_v43 = vpop.eup %3751  ;;  %3763 = vpow2.f32 %v1453_v33  ;;  %v1685_v57 = vmul.f32 0.00390625, %v1527_v54  ;;  %v4825_v60 = vadd.s32 4294967288, %v4820_v50  ;;  %v1679_v61 = vmul.f32 0.00390625, %v1509_v52 }
 0x183   : > { %v3754_v47 = vpop.eup %3753  ;;  %1571 = vadd.xlane.f32.xlu2 %v1570_v38  ;;  %v1648_v49 = vadd.f32 %v3752_v43, %v3750_v35  ;;  %3765 = vpow2.f32 %v1455_v40  ;;  %v783_v62 = vmax.f32 %v655_v36, 1e-06  ;;  %v784_v4 = vmax.f32 %v656_v42, 1e-06  ;;  %v697_v36 = vld [vmem:[%s4565_s18 + $0x3b0] sm:$0xff]  ;;  %v698_v42 = vld [vmem:[%s4565_s18 + $0x3b8] sm:$0xff] }
 0x184   : > { %v3756_v44 = vpop.eup %3755  ;;  %3767 = vpow2.f32 %v1948_v31  ;;  %v4830_v7 = vadd.s32 4294967280, %v4820_v50  ;;  %v785_v9 = vmax.f32 %v657_v59, 1e-06  ;;  %v786_v15 = vmax.f32 %v658_v5, 1e-06 }
 0x185   : > { %v3758_v48 = vpop.eup %3757  ;;  %1649 = vadd.xlane.f32.xlu0 %v1648_v49  ;;  %3769 = vpow2.f32 %v1958_v39 }
 0x186   : > { %v3760_v55 = vpop.eup %3759  ;;  %3771 = vpow2.f32 %v1960_v45  ;;  %v2074_v56 = vpack.c.bf16 %v3758_v48, %v3754_v47 }
 0x187   : > { %v3762_v58 = vpop.eup %3761  ;;  %3773 = vlog2.f32 %v795_v32 }
 0x188   : > { %v3764_v63 = vpop.eup %3763  ;;  %v1612_v0 = vadd.f32 %v3762_v58, %v3760_v55  ;;  %3775 = vlog2.f32 %v796_v51  ;;  %v2154_v1 = vunpack.c.l.b16 %v2074_v56  ;;  %v2155_v2 = vunpack.c.h.b16 %v2074_v56  ;;  %v1533_v58 = vpop.xlane.xlu1 %1532 }
 0x189   : > { %v3766_v3 = vpop.eup %3765  ;;  %3777 = vlog2.f32 %v1680_v53 }
 0x18a   : > { %v3768_v6 = vpop.eup %3767  ;;  %1613 = vadd.xlane.f32.xlu1 %v1612_v0  ;;  %v1651_v8 = vadd.f32 %v3766_v3, %v3764_v63  ;;  %3779 = vlog2.f32 %v1685_v57  ;;  %v2220_v12 = vperm.slane %v2154_v1, %v4820_v50  ;;  %v2222_v13 = vperm.slane %v2155_v2, %v4825_v60  ;;  %v1536_v0 = vpop.xlane.xlu2 %1535 }
 0x18b   : > { %v3770_v10 = vpop.eup %3769  ;;  %v4832_v11 = vpack.c.bf16 %v3768_v6, %v3756_v44  ;;  %3781 = vlog2.f32 %v1679_v61  ;;  %v826_v2 = vmax.f32 %v698_v42, 1e-06  ;;  %v1530_v3 = vpop.xlane.xlu0 %1529 }
 0x18c   : > { %v3772_v14 = vpop.eup %3771  ;;  %1652 = vadd.xlane.f32.xlu2 %v1651_v8  ;;  %3783 = vlog2.f32 %v783_v62  ;;  %v2224_v24 = vsel %vm2223_vm4, %v2222_v13, %v2220_v12  ;;  %v825_v62 = vmax.f32 %v697_v36, 1e-06  ;;  %v1687_v8 = vmul.f32 0.00390625, %v1533_v58 }
 0x18d   : > { %v3774_v16 = vpop.eup %3773  ;;  %v4836_v17 = vpack.c.bf16 %v3772_v14, %v3770_v10  ;;  %v2156_v18 = vunpack.c.l.b16 %v4832_v11  ;;  %3785 = vlog2.f32 %v784_v4  ;;  %v1688_v14 = vmul.f32 0.00390625, %v1536_v0 }
 0x18e   : > { %v3776_v19 = vpop.eup %3775  ;;  %v1013_v20 = vmul.f32 0.6931472, %v3774_v16  ;;  %3787 = vlog2.f32 %v785_v9  ;;  %v685_v9 = vld [vmem:[%s4565_s18 + $0x350] sm:$0xff]  ;;  %v671_v16 = vld [vmem:[%s4565_s18 + $0x2e0] sm:$0xff] }
 0x18f   : > { %v3778_v21 = vpop.eup %3777  ;;  %v1015_v22 = vmul.f32 0.6931472, %v3776_v19  ;;  %v2226_v23 = vperm.slane %v2156_v18, %v4830_v7  ;;  %3789 = vlog2.f32 %v786_v15  ;;  %v2162_v5 = vunpack.c.l.b16 %v4836_v17  ;;  %v686_v15 = vld [vmem:[%s4565_s18 + $0x358] sm:$0xff] }
 0x190   : > { %v3780_v26 = vpop.eup %3779  ;;  %v1181_v27 = vmul.f32 %v4581_v25, %v1013_v20  ;;  %v1772_v28 = vmul.f32 0.6931472, %v3778_v21  ;;  %v2163_v13 = vunpack.c.h.b16 %v4836_v17  ;;  %v1686_v19 = vmul.f32 0.00390625, %v1530_v3  ;;  %v672_v20 = vld [vmem:[%s4565_s18 + $0x2e8] sm:$0xff] }
 0x191   : > { %v3782_v29 = vpop.eup %3781  ;;  %v1182_v30 = vmul.f32 %v4581_v25, %v1015_v22  ;;  %v1782_v31 = vmul.f32 0.6931472, %v3780_v26  ;;  %v4845_v39 = vsel %vm2227_vm5, %v2226_v23, %v2224_v24  ;;  %v4864_v22 = vadd.s32 4294967272, %v4820_v50 }
 0x192   : > { %v3784_v33 = vpop.eup %3783  ;;  %v1397_v34 = vmul.f32 1.442695, %v1181_v27  ;;  %v1889_v35 = vmul.f32 %v4799_v37, %v1772_v28  ;;  %v1770_v38 = vmul.f32 0.6931472, %v3782_v29  ;;  %v813_v23 = vmax.f32 %v685_v9, 1e-06  ;;  %v1491_v42 = vpop.xlane.xlu2 %1490 }
 0x193   : > { %v3786_v40 = vpop.eup %3785  ;;  %v1399_v41 = vmul.f32 1.442695, %v1182_v30  ;;  %v1894_v43 = vmul.f32 %v4799_v37, %v1782_v31  ;;  %v989_v45 = vmul.f32 0.6931472, %v3784_v33  ;;  %v814_v26 = vmax.f32 %v686_v15, 1e-06 }
 0x194   : > { %v3788_v46 = vpop.eup %3787  ;;  %3791 = vpow2.f32 %v1397_v34  ;;  %v1964_v47 = vmul.f32 1.442695, %v1889_v35  ;;  %v1888_v49 = vmul.f32 %v4799_v37, %v1770_v38  ;;  %v991_v32 = vmul.f32 0.6931472, %v3786_v40  ;;  %v683_v28 = vld [vmem:[%s4565_s18 + $0x340] sm:$0xff]  ;;  %v684_v29 = vld [vmem:[%s4565_s18 + $0x348] sm:$0xff] }
 0x195   : > { %3793 = vpow2.f32 %v1399_v41  ;;  %v1974_v44 = vmul.f32 1.442695, %v1894_v43  ;;  %v1169_v51 = vmul.f32 %v4581_v25, %v989_v45  ;;  %v993_v52 = vmul.f32 0.6931472, %v3788_v46  ;;  %v3790_v48 = vpop.eup %3789  ;;  %v1554_v43 = vpop.xlane.xlu1 %1553 }
 0x196   : > { %3795 = vpow2.f32 %v1964_v47  ;;  %v1962_v53 = vmul.f32 1.442695, %v1888_v49  ;;  %v1170_v54 = vmul.f32 %v4581_v25, %v991_v32  ;;  %v995_v56 = vmul.f32 0.6931472, %v3790_v48 }
 0x197   : > { %3797 = vpow2.f32 %v1974_v44  ;;  %v1373_v55 = vmul.f32 1.442695, %v1169_v51  ;;  %v1171_v57 = vmul.f32 %v4581_v25, %v993_v52  ;;  %v799_v27 = vmax.f32 %v671_v16, 1e-06 }
 0x198   : > { %3799 = vpow2.f32 %v1962_v53  ;;  %v1375_v61 = vmul.f32 1.442695, %v1170_v54  ;;  %v1172_v59 = vmul.f32 %v4581_v25, %v995_v56  ;;  %v2249_v31 = vperm.slane %v2162_v5, %v4820_v50 }
 0x199   : > { %3801 = vpow2.f32 %v1373_v55  ;;  %v1377_v63 = vmul.f32 1.442695, %v1171_v57  ;;  %v2250_v33 = vperm.slane %v2163_v13, %v4825_v60  ;;  %v800_v34 = vmax.f32 %v672_v20, 1e-06 }
 0x19a   : > { %v3792_v1 = vpop.eup %3791  ;;  %3803 = vpow2.f32 %v1375_v61  ;;  %v1379_v6 = vmul.f32 1.442695, %v1172_v59  ;;  %v811_v46 = vmax.f32 %v683_v28, 1e-06  ;;  %v812_v47 = vmax.f32 %v684_v29, 1e-06 }
 0x19b   : > { %v3794_v4 = vpop.eup %3793  ;;  %3805 = vpow2.f32 %v1377_v63  ;;  %v2251_v36 = vsel %vm2223_vm4, %v2250_v33, %v2249_v31  ;;  %v1694_v53 = vmul.f32 0.00390625, %v1554_v43  ;;  %v1673_v59 = vmul.f32 0.00390625, %v1491_v42 }
 0x19c   : > { %v3796_v10 = vpop.eup %3795  ;;  %v1609_v12 = vadd.f32 %v3794_v4, %v3792_v1  ;;  %3807 = vlog2.f32 %v825_v62 }
 0x19d   : > { %v4860_v18 = vpop.eup %3797  ;;  %3809 = vpow2.f32 %v1379_v6 }
 0x19e   : > { %v3800_v21 = vpop.eup %3799  ;;  %1610 = vadd.xlane.f32.xlu0 %v1609_v12  ;;  %3811 = vlog2.f32 %v826_v2 }
 0x19f   : > { %v3802_v24 = vpop.eup %3801  ;;  %v2079_v17 = vpack.c.bf16 %v3796_v10, %v3800_v21  ;;  %3813 = vlog2.f32 %v1687_v8 }
 0x1a0   : > { %v3804_v30 = vpop.eup %3803  ;;  %3815 = vlog2.f32 %v1688_v14 }
 0x1a1   : > { %v3806_v35 = vpop.eup %3805  ;;  %v2164_v38 = vunpack.c.l.b16 %v2079_v17  ;;  %v2165_v40 = vunpack.c.h.b16 %v2079_v17  ;;  %v1591_v41 = vadd.f32 %v3804_v30, %v3802_v24  ;;  %3817 = vlog2.f32 %v1686_v19 }
 0x1a2   : > { %v3808_v45 = vpop.eup %3807  ;;  %3819 = vlog2.f32 %v813_v23 }
 0x1a3   : > { %v3810_v49 = vpop.eup %3809  ;;  %v2252_v32 = vperm.slane %v2164_v38, %v4830_v7  ;;  %v2254_v44 = vperm.slane %v2165_v40, %v4864_v22  ;;  %1592 = vadd.xlane.f32.xlu1 %v1591_v41  ;;  %v1073_v51 = vmul.f32 0.6931472, %v3808_v45  ;;  %3821 = vlog2.f32 %v814_v26  ;;  %v1551_v45 = vpop.xlane.xlu0 %1550 }
 0x1a4   : > { %v3812_v52 = vpop.eup %3811  ;;  %v1594_v48 = vadd.f32 %v3810_v49, %v3806_v35  ;;  %3823 = vlog2.f32 %v799_v27 }
 0x1a5   : > { %v3814_v54 = vpop.eup %3813  ;;  %v2253_v55 = vsel %vm2227_vm5, %v2252_v32, %v2251_v36  ;;  %v1075_v56 = vmul.f32 0.6931472, %v3812_v52  ;;  %v1211_v57 = vmul.f32 %v4581_v25, %v1073_v51  ;;  %3825 = vlog2.f32 %v800_v34 }
 0x1a6   : > { %v3816_v58 = vpop.eup %3815  ;;  %v4876_v61 = vsel %vm2231_vm6, %v2254_v44, %v2253_v55  ;;  %1595 = vadd.xlane.f32.xlu2 %v1594_v48  ;;  %v1786_v62 = vmul.f32 0.6931472, %v3814_v54  ;;  %3827 = vlog2.f32 %v811_v46  ;;  %v699_v48 = vld [vmem:[%s4565_s18 + $0x3c0] sm:$0xff] }
 0x1a7   : > { %v3818_v63 = vpop.eup %3817  ;;  %v1212_v0 = vmul.f32 %v4581_v25, %v1075_v56  ;;  %v1457_v1 = vmul.f32 1.442695, %v1211_v57  ;;  %v1788_v2 = vmul.f32 0.6931472, %v3816_v58  ;;  %3829 = vlog2.f32 %v812_v47 }
 0x1a8   : > { %v3820_v3 = vpop.eup %3819  ;;  %v1896_v4 = vmul.f32 %v4799_v37, %v1786_v62  ;;  %v1784_v5 = vmul.f32 0.6931472, %v3818_v63  ;;  %3831 = vlog2.f32 %v1694_v53  ;;  %v2157_v47 = vunpack.c.h.b16 %v4832_v11  ;;  %v700_v53 = vld [vmem:[%s4565_s18 + $0x3c8] sm:$0xff]  ;;  %v701_v62 = vld [vmem:[%s4565_s18 + $0x3d0] sm:$0xff] }
 0x1a9   : > { %v3822_v6 = vpop.eup %3821  ;;  %3833 = vpow2.f32 %v1457_v1  ;;  %v1459_v8 = vmul.f32 1.442695, %v1212_v0  ;;  %v1897_v9 = vmul.f32 %v4799_v37, %v1788_v2  ;;  %v1049_v10 = vmul.f32 0.6931472, %v3820_v3 }
 0x1aa   : > { %v3824_v12 = vpop.eup %3823  ;;  %v1978_v13 = vmul.f32 1.442695, %v1896_v4  ;;  %v1895_v14 = vmul.f32 %v4799_v37, %v1784_v5  ;;  %v1051_v15 = vmul.f32 0.6931472, %v3822_v6  ;;  %3835 = vlog2.f32 %v1673_v59  ;;  %v702_v59 = vld [vmem:[%s4565_s18 + $0x3d8] sm:$0xff] }
 0x1ab   : > { %v3826_v16 = vpop.eup %3825  ;;  %3837 = vpow2.f32 %v1459_v8  ;;  %v1980_v19 = vmul.f32 1.442695, %v1897_v9  ;;  %v1199_v20 = vmul.f32 %v4581_v25, %v1049_v10  ;;  %v1021_v21 = vmul.f32 0.6931472, %v3824_v12  ;;  %v673_v8 = vld [vmem:[%s4565_s18 + $0x2f0] sm:$0xff]  ;;  %v674_v9 = vld [vmem:[%s4565_s18 + $0x2f8] sm:$0xff] }
 0x1ac   : > { %v3828_v23 = vpop.eup %3827  ;;  %3839 = vpow2.f32 %v1978_v13  ;;  %v1976_v24 = vmul.f32 1.442695, %v1895_v14  ;;  %v1200_v17 = vmul.f32 %v4581_v25, %v1051_v15  ;;  %v1023_v26 = vmul.f32 0.6931472, %v3826_v16 }
 0x1ad   : > { %v3830_v27 = vpop.eup %3829  ;;  %3841 = vpow2.f32 %v1980_v19  ;;  %v1433_v28 = vmul.f32 1.442695, %v1199_v20  ;;  %v1185_v29 = vmul.f32 %v4581_v25, %v1021_v21  ;;  %v1045_v30 = vmul.f32 0.6931472, %v3828_v23  ;;  %v1515_v21 = vpop.xlane.xlu1 %1514 }
 0x1ae   : > { %v3832_v31 = vpop.eup %3831  ;;  %3843 = vpow2.f32 %v1976_v24  ;;  %v1435_v33 = vmul.f32 1.442695, %v1200_v17  ;;  %v1186_v34 = vmul.f32 %v4581_v25, %v1023_v26  ;;  %v1047_v35 = vmul.f32 0.6931472, %v3830_v27  ;;  %v1518_v26 = vpop.xlane.xlu2 %1517 }
 0x1af   : > { %v3834_v38 = vpop.eup %3833  ;;  %3845 = vpow2.f32 %v1433_v28  ;;  %v1405_v40 = vmul.f32 1.442695, %v1185_v29  ;;  %v1197_v41 = vmul.f32 %v4581_v25, %v1045_v30  ;;  %v1800_v43 = vmul.f32 0.6931472, %v3832_v31  ;;  %v1494_v31 = vpop.xlane.xlu0 %1493 }
 0x1b0   : > { %v3836_v46 = vpop.eup %3835  ;;  %3847 = vpow2.f32 %v1435_v33  ;;  %v1407_v49 = vmul.f32 1.442695, %v1186_v34  ;;  %v1198_v32 = vmul.f32 %v4581_v25, %v1047_v35  ;;  %v1693_v57 = vmul.f32 0.00390625, %v1551_v45 }
 0x1b1   : > { %v3838_v44 = vpop.eup %3837  ;;  %3849 = vpow2.f32 %v1405_v40  ;;  %v1429_v51 = vmul.f32 1.442695, %v1197_v41  ;;  %v1903_v52 = vmul.f32 %v4799_v37, %v1800_v43  ;;  %v1758_v36 = vmul.f32 0.6931472, %v3836_v46  ;;  %v690_v46 = vld [vmem:[%s4565_s18 + $0x378] sm:$0xff] }
 0x1b2   : > { %v3840_v54 = vpop.eup %3839  ;;  %v1654_v55 = vadd.f32 %v3838_v44, %v3834_v38  ;;  %3851 = vpow2.f32 %v1407_v49  ;;  %v1431_v56 = vmul.f32 1.442695, %v1198_v32  ;;  %v827_v1 = vmax.f32 %v699_v48, 1e-06  ;;  %v689_v38 = vld [vmem:[%s4565_s18 + $0x370] sm:$0xff] }
 0x1b3   : > { %v3842_v11 = vpop.eup %3841  ;;  %3853 = vpow2.f32 %v1429_v51  ;;  %v1992_v42 = vmul.f32 1.442695, %v1903_v52  ;;  %v1882_v58 = vmul.f32 %v4799_v37, %v1758_v36  ;;  %v828_v2 = vmax.f32 %v700_v53, 1e-06  ;;  %v703_v52 = vld [vmem:[%s4565_s18 + $0x3e0] sm:$0xff] }
 0x1b4   : > { %v3844_v63 = vpop.eup %3843  ;;  %1655 = vadd.xlane.f32.xlu0 %v1654_v55  ;;  %v4895_v0 = vpack.c.bf16 %v3842_v11, %v3840_v54  ;;  %3855 = vpow2.f32 %v1431_v56  ;;  %v2230_v4 = vperm.slane %v2157_v47, %v4864_v22  ;;  %v829_v13 = vmax.f32 %v701_v62, 1e-06 }
 0x1b5   : > { %v3846_v3 = vpop.eup %3845  ;;  %v2082_v5 = vpack.c.bf16 %v3844_v63, %v4860_v18  ;;  %3857 = vpow2.f32 %v1992_v42  ;;  %v1950_v6 = vmul.f32 1.442695, %v1882_v58  ;;  %v830_v14 = vmax.f32 %v702_v59, 1e-06 }
 0x1b6   : > { %v3848_v10 = vpop.eup %3847  ;;  %v2172_v12 = vunpack.c.l.b16 %v4895_v0  ;;  %3859 = vlog2.f32 %v1693_v57  ;;  %v801_v18 = vmax.f32 %v673_v8, 1e-06  ;;  %v802_v17 = vmax.f32 %v674_v9, 1e-06 }
 0x1b7   : > { %v3850_v15 = vpop.eup %3849  ;;  %v2170_v16 = vunpack.c.l.b16 %v2082_v5  ;;  %v2171_v19 = vunpack.c.h.b16 %v2082_v5  ;;  %v1636_v20 = vadd.f32 %v3848_v10, %v3846_v3  ;;  %3861 = vpow2.f32 %v1950_v6 }
 0x1b8   : > { %v3852_v23 = vpop.eup %3851  ;;  %v2267_v24 = vperm.slane %v2172_v12, %v4830_v7  ;;  %3863 = vlog2.f32 %v827_v1  ;;  %v1681_v34 = vmul.f32 0.00390625, %v1515_v21  ;;  %v4907_v35 = vsel %vm2231_vm6, %v2230_v4, %v4845_v39 }
 0x1b9   : > { %v3854_v27 = vpop.eup %3853  ;;  %v2264_v28 = vperm.slane %v2170_v16, %v4820_v50  ;;  %v2265_v29 = vperm.slane %v2171_v19, %v4825_v60  ;;  %1637 = vadd.xlane.f32.xlu1 %v1636_v20  ;;  %v1615_v30 = vadd.f32 %v3852_v23, %v3850_v15  ;;  %3865 = vlog2.f32 %v828_v2 }
 0x1ba   : > { %v3856_v33 = vpop.eup %3855  ;;  %3867 = vlog2.f32 %v829_v13  ;;  %v1682_v45 = vmul.f32 0.00390625, %v1518_v26  ;;  %v1674_v32 = vmul.f32 0.00390625, %v1494_v31  ;;  %v817_v51 = vmax.f32 %v689_v38, 1e-06 }
 0x1bb   : > { %v4910_v40 = vpop.eup %3857  ;;  %v2266_v41 = vsel %vm2223_vm4, %v2265_v29, %v2264_v28  ;;  %1616 = vadd.xlane.f32.xlu2 %v1615_v30  ;;  %v1633_v43 = vadd.f32 %v3856_v33, %v3854_v27  ;;  %3869 = vlog2.f32 %v830_v14  ;;  %v818_v48 = vmax.f32 %v690_v46, 1e-06 }
 0x1bc   : > { %v3860_v47 = vpop.eup %3859  ;;  %v4915_v49 = vsel %vm2227_vm5, %v2267_v24, %v2266_v41  ;;  %3871 = vlog2.f32 %v801_v18  ;;  %v831_v11 = vmax.f32 %v703_v52, 1e-06  ;;  %v2173_v1 = vunpack.c.h.b16 %v4895_v0  ;;  %v704_v41 = vld [vmem:[%s4565_s18 + $0x3e8] sm:$0xff] }
 0x1bd   : > { %v4917_v44 = vpop.eup %3861  ;;  %1634 = vadd.xlane.f32.xlu0 %v1633_v43  ;;  %v1798_v39 = vmul.f32 0.6931472, %v3860_v47  ;;  %3873 = vlog2.f32 %v802_v17  ;;  %v1560_v43 = vpop.xlane.xlu1 %1559 }
 0x1be   : > { %v3864_v36 = vpop.eup %3863  ;;  %3875 = vlog2.f32 %v1681_v34 }
 0x1bf   : > { %v3866_v53 = vpop.eup %3865  ;;  %v1902_v54 = vmul.f32 %v4799_v37, %v1798_v39  ;;  %v1077_v55 = vmul.f32 0.6931472, %v3864_v36  ;;  %3877 = vlog2.f32 %v1682_v45  ;;  %v1575_v45 = vpop.xlane.xlu2 %1574 }
 0x1c0   : > { %v3868_v56 = vpop.eup %3867  ;;  %v1079_v57 = vmul.f32 0.6931472, %v3866_v53  ;;  %3879 = vlog2.f32 %v1674_v32 }
 0x1c1   : > { %v3870_v42 = vpop.eup %3869  ;;  %v1990_v58 = vmul.f32 1.442695, %v1902_v54  ;;  %v1213_v62 = vmul.f32 %v4581_v25, %v1077_v55  ;;  %v1081_v59 = vmul.f32 0.6931472, %v3868_v56  ;;  %3881 = vlog2.f32 %v817_v51  ;;  %v1557_v51 = vpop.xlane.xlu0 %1556  ;;  %v687_v54 = vld [vmem:[%s4565_s18 + $0x360] sm:$0xff] }
 0x1c2   : > { %v3872_v63 = vpop.eup %3871  ;;  %v1214_v2 = vmul.f32 %v4581_v25, %v1079_v57  ;;  %v1083_v3 = vmul.f32 0.6931472, %v3870_v42  ;;  %3883 = vlog2.f32 %v818_v48  ;;  %v2269_v56 = vperm.slane %v2173_v1, %v4864_v22 }
 0x1c3   : > { %v3874_v4 = vpop.eup %3873  ;;  %3885 = vpow2.f32 %v1990_v58  ;;  %v1461_v5 = vmul.f32 1.442695, %v1213_v62  ;;  %v1215_v6 = vmul.f32 %v4581_v25, %v1081_v59  ;;  %v1025_v8 = vmul.f32 0.6931472, %v3872_v63 }
 0x1c4   : > { %v3876_v9 = vpop.eup %3875  ;;  %v1463_v10 = vmul.f32 1.442695, %v1214_v2  ;;  %v1216_v12 = vmul.f32 %v4581_v25, %v1083_v3  ;;  %v1027_v13 = vmul.f32 0.6931472, %v3874_v4  ;;  %3887 = vlog2.f32 %v831_v11  ;;  %v688_v11 = vld [vmem:[%s4565_s18 + $0x368] sm:$0xff] }
 0x1c5   : > { %v3878_v14 = vpop.eup %3877  ;;  %3889 = vpow2.f32 %v1461_v5  ;;  %v1465_v15 = vmul.f32 1.442695, %v1215_v6  ;;  %v1187_v0 = vmul.f32 %v4581_v25, %v1025_v8  ;;  %v1774_v16 = vmul.f32 0.6931472, %v3876_v9 }
 0x1c6   : > { %v3880_v19 = vpop.eup %3879  ;;  %3891 = vpow2.f32 %v1463_v10  ;;  %v1467_v20 = vmul.f32 1.442695, %v1216_v12  ;;  %v1188_v21 = vmul.f32 %v4581_v25, %v1027_v13  ;;  %v1776_v23 = vmul.f32 0.6931472, %v3878_v14  ;;  %v705_v10 = vld [vmem:[%s4565_s18 + $0x3f0] sm:$0xff] }
 0x1c7   : > { %v3882_v24 = vpop.eup %3881  ;;  %3893 = vpow2.f32 %v1465_v15  ;;  %v1409_v18 = vmul.f32 1.442695, %v1187_v0  ;;  %v1890_v17 = vmul.f32 %v4799_v37, %v1774_v16  ;;  %v1760_v26 = vmul.f32 0.6931472, %v3880_v19  ;;  %v706_v15 = vld [vmem:[%s4565_s18 + $0x3f8] sm:$0xff]  ;;  %v1539_v0 = vpop.xlane.xlu1 %1538 }
 0x1c8   : > { %v3884_v27 = vpop.eup %3883  ;;  %3895 = vpow2.f32 %v1467_v20  ;;  %v1411_v28 = vmul.f32 1.442695, %v1188_v21  ;;  %v1891_v29 = vmul.f32 %v4799_v37, %v1776_v23  ;;  %v1057_v30 = vmul.f32 0.6931472, %v3882_v24  ;;  %v1542_v16 = vpop.xlane.xlu2 %1541 }
 0x1c9   : > { %v3886_v31 = vpop.eup %3885  ;;  %3897 = vpow2.f32 %v1409_v18  ;;  %v1966_v33 = vmul.f32 1.442695, %v1890_v17  ;;  %v1883_v34 = vmul.f32 %v4799_v37, %v1760_v26  ;;  %v1059_v38 = vmul.f32 0.6931472, %v3884_v27 }
 0x1ca   : > { %v3888_v46 = vpop.eup %3887  ;;  %v4933_v47 = vpack.c.bf16 %v4910_v40, %v3886_v31  ;;  %3899 = vpow2.f32 %v1411_v28  ;;  %v1968_v32 = vmul.f32 1.442695, %v1891_v29  ;;  %v1203_v39 = vmul.f32 %v4581_v25, %v1057_v30  ;;  %v1578_v29 = vpop.xlane.xlu0 %1577 }
 0x1cb   : > { %v3890_v52 = vpop.eup %3889  ;;  %3901 = vpow2.f32 %v1966_v33  ;;  %v1952_v36 = vmul.f32 1.442695, %v1883_v34  ;;  %v1204_v48 = vmul.f32 %v4581_v25, %v1059_v38  ;;  %v1085_v53 = vmul.f32 0.6931472, %v3888_v46 }
 0x1cc   : > { %v3892_v55 = vpop.eup %3891  ;;  %3903 = vpow2.f32 %v1968_v32  ;;  %v1441_v57 = vmul.f32 1.442695, %v1203_v39  ;;  %v832_v40 = vmax.f32 %v704_v41, 1e-06  ;;  %v815_v2 = vmax.f32 %v687_v54, 1e-06 }
 0x1cd   : > { %v3894_v42 = vpop.eup %3893  ;;  %v1657_v58 = vadd.f32 %v3892_v55, %v3890_v52  ;;  %3905 = vpow2.f32 %v1952_v36  ;;  %v1443_v62 = vmul.f32 1.442695, %v1204_v48  ;;  %v1217_v59 = vmul.f32 %v4581_v25, %v1085_v53 }
 0x1ce   : > { %v3896_v63 = vpop.eup %3895  ;;  %3907 = vpow2.f32 %v1441_v57  ;;  %v816_v5 = vmax.f32 %v688_v11, 1e-06  ;;  %v4942_v8 = vadd.s32 4294967264, %v4820_v50  ;;  %v1696_v9 = vmul.f32 0.00390625, %v1560_v43 }
 0x1cf   : > { %v3898_v3 = vpop.eup %3897  ;;  %1658 = vadd.xlane.f32.xlu1 %v1657_v58  ;;  %v1660_v4 = vadd.f32 %v3896_v63, %v3894_v42  ;;  %3909 = vpow2.f32 %v1443_v62  ;;  %v1469_v1 = vmul.f32 1.442695, %v1217_v59  ;;  %v1701_v14 = vmul.f32 0.00390625, %v1575_v45  ;;  %v1584_v57 = vpop.xlane.xlu1 %1583 }
 0x1d0   : > { %v3900_v6 = vpop.eup %3899  ;;  %3911 = vlog2.f32 %v832_v40  ;;  %v4948_v19 = vsel %vm2231_vm6, %v2269_v56, %v4915_v49  ;;  %v4951_v21 = vadd.s32 4294967256, %v4820_v50  ;;  %v1695_v23 = vmul.f32 0.00390625, %v1557_v51  ;;  %v1599_v62 = vpop.xlane.xlu2 %1598 }
 0x1d1   : > { %v3902_v12 = vpop.eup %3901  ;;  %1661 = vadd.xlane.f32.xlu2 %v1660_v4  ;;  %v1618_v13 = vadd.f32 %v3900_v6, %v3898_v3  ;;  %3913 = vpow2.f32 %v1469_v1  ;;  %v833_v17 = vmax.f32 %v705_v10, 1e-06  ;;  %v834_v28 = vmax.f32 %v706_v15, 1e-06 }
 0x1d2   : > { %v3904_v20 = vpop.eup %3903  ;;  %3915 = vlog2.f32 %v815_v2  ;;  %v1689_v49 = vmul.f32 0.00390625, %v1539_v0  ;;  %v1690_v34 = vmul.f32 0.00390625, %v1542_v16  ;;  %v1702_v48 = vmul.f32 0.00390625, %v1578_v29 }
 0x1d3   : > { %v3906_v24 = vpop.eup %3905  ;;  %1619 = vadd.xlane.f32.xlu0 %v1618_v13  ;;  %v2080_v18 = vpack.c.bf16 %v3904_v20, %v3902_v12  ;;  %3917 = vlog2.f32 %v816_v5  ;;  %v1704_v6 = vmul.f32 0.00390625, %v1584_v57 }
 0x1d4   : > { %v3908_v26 = vpop.eup %3907  ;;  %v2076_v27 = vpack.c.bf16 %v3906_v24, %v4917_v44  ;;  %3919 = vlog2.f32 %v1696_v9  ;;  %v1581_v9 = vpop.xlane.xlu0 %1580 }
 0x1d5   : > { %v3910_v30 = vpop.eup %3909  ;;  %v2166_v31 = vunpack.c.l.b16 %v2080_v18  ;;  %v2167_v33 = vunpack.c.h.b16 %v2080_v18  ;;  %3921 = vlog2.f32 %v1701_v14  ;;  %v1703_v57 = vmul.f32 0.00390625, %v1581_v9 }
 0x1d6   : > { %v3912_v38 = vpop.eup %3911  ;;  %v2158_v41 = vunpack.c.l.b16 %v2076_v27  ;;  %v2159_v43 = vunpack.c.h.b16 %v2076_v27  ;;  %v1642_v45 = vadd.f32 %v3910_v30, %v3908_v26  ;;  %3923 = vlog2.f32 %v1695_v23 }
 0x1d7   : > { %v4954_v46 = vpop.eup %3913  ;;  %v2256_v32 = vperm.slane %v2166_v31, %v4942_v8  ;;  %v2258_v44 = vperm.slane %v2167_v33, %v4951_v21  ;;  %v1087_v39 = vmul.f32 0.6931472, %v3912_v38  ;;  %3925 = vlog2.f32 %v833_v17 }
 0x1d8   : > { %v3916_v51 = vpop.eup %3915  ;;  %v2234_v52 = vperm.slane %v2158_v41, %v4942_v8  ;;  %v2238_v36 = vperm.slane %v2159_v43, %v4951_v21  ;;  %1643 = vadd.xlane.f32.xlu1 %v1642_v45  ;;  %3927 = vlog2.f32 %v834_v28 }
 0x1d9   : > { %v3918_v53 = vpop.eup %3917  ;;  %v2257_v54 = vsel %vm2235_vm7, %v2256_v32, %v4876_v61  ;;  %v1218_v55 = vmul.f32 %v4581_v25, %v1087_v39  ;;  %v1053_v56 = vmul.f32 0.6931472, %v3916_v51  ;;  %3929 = vlog2.f32 %v1689_v49 }
 0x1da   : > { %v3920_v40 = vpop.eup %3919  ;;  %v4964_v11 = vsel %vm2239_vm8, %v2258_v44, %v2257_v54  ;;  %v2236_v42 = vsel %vm2235_vm7, %v2234_v52, %v4907_v35  ;;  %v1055_v58 = vmul.f32 0.6931472, %v3918_v53  ;;  %3931 = vlog2.f32 %v1690_v34  ;;  %v1497_v52 = vpop.xlane.xlu1 %1496 }
 0x1db   : > { %v3922_v59 = vpop.eup %3921  ;;  %v4969_v63 = vsel %vm2239_vm8, %v2238_v36, %v2236_v42  ;;  %v1471_v61 = vmul.f32 1.442695, %v1218_v55  ;;  %v1201_v2 = vmul.f32 %v4581_v25, %v1053_v56  ;;  %v1804_v3 = vmul.f32 0.6931472, %v3920_v40 }
 0x1dc   : > { %v3924_v4 = vpop.eup %3923  ;;  %v1202_v1 = vmul.f32 %v4581_v25, %v1055_v58  ;;  %v1814_v5 = vmul.f32 0.6931472, %v3922_v59  ;;  %3933 = vlog2.f32 %v1702_v48  ;;  %v1709_v51 = vmul.f32 0.00390625, %v1599_v62  ;;  %v1602_v54 = vpop.xlane.xlu0 %1601 }
 0x1dd   : > { %v3926_v10 = vpop.eup %3925  ;;  %3935 = vpow2.f32 %v1471_v61  ;;  %v1437_v35 = vmul.f32 1.442695, %v1201_v2  ;;  %v1905_v12 = vmul.f32 %v4799_v37, %v1804_v3  ;;  %v1802_v13 = vmul.f32 0.6931472, %v3924_v4 }
 0x1de   : > { %v3928_v14 = vpop.eup %3927  ;;  %v1439_v15 = vmul.f32 1.442695, %v1202_v1  ;;  %v1910_v0 = vmul.f32 %v4799_v37, %v1814_v5  ;;  %v1089_v16 = vmul.f32 0.6931472, %v3926_v10  ;;  %3937 = vlog2.f32 %v1704_v6 }
 0x1df   : > { %v3930_v20 = vpop.eup %3929  ;;  %3939 = vpow2.f32 %v1437_v35  ;;  %v1996_v23 = vmul.f32 1.442695, %v1905_v12  ;;  %v1904_v24 = vmul.f32 %v4799_v37, %v1802_v13  ;;  %v1091_v18 = vmul.f32 0.6931472, %v3928_v14 }
 0x1e0   : > { %v3932_v17 = vpop.eup %3931  ;;  %3941 = vpow2.f32 %v1439_v15  ;;  %v2006_v26 = vmul.f32 1.442695, %v1910_v0  ;;  %v1219_v27 = vmul.f32 %v4581_v25, %v1089_v16  ;;  %v1790_v28 = vmul.f32 0.6931472, %v3930_v20 }
 0x1e1   : > { %3943 = vpow2.f32 %v1996_v23  ;;  %v1994_v49 = vmul.f32 1.442695, %v1904_v24  ;;  %v1220_v29 = vmul.f32 %v4581_v25, %v1091_v18  ;;  %v1792_v30 = vmul.f32 0.6931472, %v3932_v17  ;;  %v1500_v25 = vpop.xlane.xlu2 %1499 }
 0x1e2   : > { %v3934_v31 = vpop.eup %3933  ;;  %3945 = vpow2.f32 %v2006_v26  ;;  %v1473_v33 = vmul.f32 1.442695, %v1219_v27  ;;  %v1898_v34 = vmul.f32 %v4799_v37, %v1790_v28  ;;  %v2178_v56 = vunpack.c.l.b16 %v4933_v47  ;;  %v1524_v13 = vpop.xlane.xlu1 %1523 }
 0x1e3   : > { %v3936_v38 = vpop.eup %3935  ;;  %3947 = vpow2.f32 %v1994_v49  ;;  %v1475_v41 = vmul.f32 1.442695, %v1220_v29  ;;  %v1899_v43 = vmul.f32 %v4799_v37, %v1792_v30  ;;  %v1816_v45 = vmul.f32 0.6931472, %v3934_v31 }
 0x1e4   : > { %v3938_v32 = vpop.eup %3937  ;;  %v1663_v44 = vadd.f32 %v3936_v38, %v4954_v46  ;;  %3949 = vpow2.f32 %v1473_v33  ;;  %v1982_v39 = vmul.f32 1.442695, %v1898_v34  ;;  %v2179_v46 = vunpack.c.h.b16 %v4933_v47  ;;  %v1521_v23 = vpop.xlane.xlu0 %1520 }
 0x1e5   : > { %v3940_v36 = vpop.eup %3939  ;;  %3951 = vpow2.f32 %v1475_v41  ;;  %v1984_v48 = vmul.f32 1.442695, %v1899_v43  ;;  %v1911_v53 = vmul.f32 %v4799_v37, %v1816_v45  ;;  %v1675_v59 = vmul.f32 0.00390625, %v1497_v52 }
 0x1e6   : > { %v3942_v55 = vpop.eup %3941  ;;  %1664 = vadd.xlane.f32.xlu2 %v1663_v44  ;;  %3953 = vpow2.f32 %v1982_v39  ;;  %v1820_v2 = vmul.f32 0.6931472, %v3938_v32  ;;  %v1676_v3 = vmul.f32 0.00390625, %v1500_v25  ;;  %v1710_v5 = vmul.f32 0.00390625, %v1602_v54 }
 0x1e7   : > { %v3944_v40 = vpop.eup %3943  ;;  %v1639_v42 = vadd.f32 %v3942_v55, %v3940_v36  ;;  %3955 = vpow2.f32 %v1984_v48  ;;  %v2008_v58 = vmul.f32 1.442695, %v1911_v53  ;;  %v2279_v9 = vperm.slane %v2178_v56, %v4820_v50 }
 0x1e8   : > { %v3946_v62 = vpop.eup %3945  ;;  %3957 = vlog2.f32 %v1709_v51  ;;  %v2280_v47 = vperm.slane %v2179_v46, %v4825_v60  ;;  %v1913_v16 = vmul.f32 %v4799_v37, %v1820_v2  ;;  %v1684_v20 = vmul.f32 0.00390625, %v1524_v13 }
 0x1e9   : > { %v3948_v61 = vpop.eup %3947  ;;  %1640 = vadd.xlane.f32.xlu0 %v1639_v42  ;;  %3959 = vpow2.f32 %v2008_v58  ;;  %v1563_v14 = vpop.xlane.xlu2 %1562  ;;  %v1683_v29 = vmul.f32 0.00390625, %v1521_v23 }
 0x1ea   : > { %v3950_v4 = vpop.eup %3949  ;;  %v2087_v1 = vpack.c.bf16 %v3944_v40, %v3948_v61  ;;  %3961 = vlog2.f32 %v1703_v57  ;;  %v2281_v28 = vsel %vm2223_vm4, %v2280_v47, %v2279_v9  ;;  %v2012_v43 = vmul.f32 1.442695, %v1913_v16  ;;  %v1605_v57 = vpop.xlane.xlu1 %1604 }
 0x1eb   : > { %v3952_v6 = vpop.eup %3951  ;;  %3963 = vlog2.f32 %v1675_v59  ;;  %v1697_v52 = vmul.f32 0.00390625, %v1563_v14 }
 0x1ec   : > { %v3954_v10 = vpop.eup %3953  ;;  %v2180_v35 = vunpack.c.l.b16 %v2087_v1  ;;  %v2181_v12 = vunpack.c.h.b16 %v2087_v1  ;;  %v1666_v0 = vadd.f32 %v3952_v6, %v3950_v4  ;;  %3965 = vlog2.f32 %v1676_v3  ;;  %v1566_v59 = vpop.xlane.xlu0 %1565 }
 0x1ed   : > { %v3956_v15 = vpop.eup %3955  ;;  %3967 = vlog2.f32 %v1710_v5  ;;  %v1711_v4 = vmul.f32 0.00390625, %v1605_v57  ;;  %v1698_v16 = vmul.f32 0.00390625, %v1566_v59 }
 0x1ee   : > { %v3958_v24 = vpop.eup %3957  ;;  %v2282_v18 = vperm.slane %v2180_v35, %v4830_v7  ;;  %v2284_v17 = vperm.slane %v2181_v12, %v4864_v22  ;;  %v2084_v26 = vpack.c.bf16 %v3956_v15, %v3954_v10  ;;  %3969 = vlog2.f32 %v1684_v20 }
 0x1ef   : > { %v3960_v27 = vpop.eup %3959  ;;  %v1830_v49 = vmul.f32 0.6931472, %v3958_v24  ;;  %3971 = vlog2.f32 %v1683_v29 }
 0x1f0   : > { %v3962_v30 = vpop.eup %3961  ;;  %v2283_v31 = vsel %vm2227_vm5, %v2282_v18, %v2281_v28  ;;  %v2174_v33 = vunpack.c.l.b16 %v2084_v26  ;;  %v2175_v34 = vunpack.c.h.b16 %v2084_v26  ;;  %v2090_v38 = vpack.c.bf16 %v3960_v27, %v3946_v62 }
 0x1f1   : > { %v4992_v41 = vsel %vm2231_vm6, %v2284_v17, %v2283_v31  ;;  %1667 = vadd.xlane.f32.xlu0 %v1666_v0  ;;  %v1918_v45 = vmul.f32 %v4799_v37, %v1830_v49  ;;  %v1818_v32 = vmul.f32 0.6931472, %v3962_v30  ;;  %v3964_v44 = vpop.eup %3963  ;;  %v1608_v40 = vpop.xlane.xlu2 %1607  ;;  %3973 = vpow2.f32 %v2012_v43 }
 0x1f2   : > { %v2271_v39 = vperm.slane %v2174_v33, %v4942_v8  ;;  %v2273_v51 = vperm.slane %v2175_v34, %v4951_v21  ;;  %v3966_v25 = vpop.eup %3965  ;;  %v1762_v48 = vmul.f32 0.6931472, %v3964_v44  ;;  %3975 = vlog2.f32 %v1697_v52  ;;  %v5007_v20 = vpop.xlane.xlu1 %1625 }
 0x1f3   : > { %v1912_v36 = vmul.f32 %v4799_v37, %v1818_v32  ;;  %v3968_v53 = vpop.eup %3967  ;;  %v2022_v55 = vmul.f32 1.442695, %v1918_v45  ;;  %v1764_v56 = vmul.f32 0.6931472, %v3966_v25  ;;  %v2186_v47 = vunpack.c.l.b16 %v2090_v38 }
 0x1f4   : > { %v2272_v54 = vsel %vm2235_vm7, %v2271_v39, %v4948_v19  ;;  %v3970_v46 = vpop.eup %3969  ;;  %v1884_v62 = vmul.f32 %v4799_v37, %v1762_v48  ;;  %v1832_v2 = vmul.f32 0.6931472, %v3968_v53  ;;  %v2187_v13 = vunpack.c.h.b16 %v2090_v38  ;;  %v5012_v30 = vpop.xlane.xlu0 %1622 }
 0x1f5   : > { %v5001_v42 = vsel %vm2239_vm8, %v2273_v51, %v2272_v54  ;;  %v2010_v58 = vmul.f32 1.442695, %v1912_v36  ;;  %v1885_v61 = vmul.f32 %v4799_v37, %v1764_v56  ;;  %v1780_v3 = vmul.f32 0.6931472, %v3970_v46  ;;  %v3972_v9 = vpop.eup %3971 }
 0x1f6   : > { %v1954_v19 = vmul.f32 1.442695, %v1884_v62  ;;  %v1919_v5 = vmul.f32 %v4799_v37, %v1832_v2  ;;  %v1778_v14 = vmul.f32 0.6931472, %v3972_v9  ;;  %v1712_v15 = vmul.f32 0.00390625, %v1608_v40 }
 0x1f7   : > { %3977 = vpow2.f32 %v2010_v58  ;;  %v1956_v1 = vmul.f32 1.442695, %v1885_v61  ;;  %v1893_v6 = vmul.f32 %v4799_v37, %v1780_v3  ;;  %v3974_v12 = vpop.eup %3973  ;;  %v2294_v28 = vperm.slane %v2186_v47, %v4820_v50 }
 0x1f8   : > { %3979 = vpow2.f32 %v2022_v55  ;;  %v2024_v10 = vmul.f32 1.442695, %v1919_v5  ;;  %v3976_v0 = vpop.eup %3975  ;;  %v1892_v18 = vmul.f32 %v4799_v37, %v1778_v14  ;;  %v2295_v49 = vperm.slane %v2187_v13, %v4825_v60 }
 0x1f9   : > { %3981 = vpow2.f32 %v1954_v19  ;;  %v1972_v35 = vmul.f32 1.442695, %v1893_v6  ;;  %v1545_v23 = vpop.xlane.xlu2 %1544  ;;  %v1806_v38 = vmul.f32 0.6931472, %v3976_v0  ;;  %v5015_v45 = vadd.s32 4294967248, %v4820_v50 }
 0x1fa   : > { %3983 = vpow2.f32 %v1956_v1  ;;  %v1970_v29 = vmul.f32 1.442695, %v1892_v18  ;;  %v5018_v32 = vadd.s32 4294967240, %v4820_v50  ;;  %v2296_v36 = vsel %vm2223_vm4, %v2295_v49, %v2294_v28  ;;  %v1587_v58 = vpop.xlane.xlu1 %1586 }
 0x1fb   : > { %3985 = vlog2.f32 %v1711_v4  ;;  %v1906_v57 = vmul.f32 %v4799_v37, %v1806_v38  ;;  %v1691_v46 = vmul.f32 0.00390625, %v1545_v23  ;;  %v1705_v38 = vmul.f32 0.00390625, %v1587_v58 }
 0x1fc   : > { %3987 = vpow2.f32 %v2024_v10  ;;  %v1548_v14 = vpop.xlane.xlu0 %1547 }
 0x1fd   : > { %v3978_v24 = vpop.eup %3977  ;;  %3989 = vpow2.f32 %v1972_v35  ;;  %v1998_v10 = vmul.f32 1.442695, %v1906_v57  ;;  %v1692_v28 = vmul.f32 0.00390625, %v1548_v14 }
 0x1fe   : > { %v3980_v17 = vpop.eup %3979  ;;  %v2091_v26 = vpack.c.bf16 %v3974_v12, %v3978_v24  ;;  %3991 = vlog2.f32 %v1712_v15 }
 0x1ff   : > { %v3982_v27 = vpop.eup %3981  ;;  %3993 = vlog2.f32 %v1698_v16 }
 0x200   : > { %v3984_v31 = vpop.eup %3983  ;;  %v2188_v33 = vunpack.c.l.b16 %v2091_v26  ;;  %v2189_v34 = vunpack.c.h.b16 %v2091_v26  ;;  %3995 = vpow2.f32 %v1970_v29 }
 0x201   : > { %v3986_v43 = vpop.eup %3985  ;;  %v2077_v44 = vpack.c.bf16 %v3984_v31, %v3982_v27  ;;  %v1590_v62 = vpop.xlane.xlu2 %1589  ;;  %3997 = vlog2.f32 %v1691_v46 }
 0x202   : > { %v3988_v39 = vpop.eup %3987  ;;  %v2297_v51 = vperm.slane %v2188_v33, %v4830_v7  ;;  %v2299_v52 = vperm.slane %v2189_v34, %v4864_v22  ;;  %v1834_v25 = vmul.f32 0.6931472, %v3986_v43  ;;  %v5038_v18 = vpop.xlane.xlu1 %1631 }
 0x203   : > { %v2160_v48 = vunpack.c.l.b16 %v2077_v44  ;;  %v2161_v53 = vunpack.c.h.b16 %v2077_v44  ;;  %v2094_v54 = vpack.c.bf16 %v3988_v39, %v3980_v17  ;;  %v3990_v55 = vpop.eup %3989  ;;  %v1706_v39 = vmul.f32 0.00390625, %v1590_v62 }
 0x204   : > { %v2298_v56 = vsel %vm2227_vm5, %v2297_v51, %v2296_v36  ;;  %v1920_v40 = vmul.f32 %v4799_v37, %v1834_v25  ;;  %v3992_v59 = vpop.eup %3991 }
 0x205   : > { %v5027_v61 = vsel %vm2231_vm6, %v2299_v52, %v2298_v56  ;;  %v2242_v2 = vperm.slane %v2160_v48, %v5015_v45  ;;  %v2246_v3 = vperm.slane %v2161_v53, %v5018_v32  ;;  %v3994_v19 = vpop.eup %3993  ;;  %v1836_v4 = vmul.f32 0.6931472, %v3992_v59  ;;  %v5047_v52 = vpop.xlane.xlu0 %1628 }
 0x206   : > { %v3996_v1 = vpop.eup %3995  ;;  %v2026_v6 = vmul.f32 1.442695, %v1920_v40  ;;  %v1808_v9 = vmul.f32 0.6931472, %v3994_v19  ;;  %v2194_v29 = vunpack.c.l.b16 %v2094_v54  ;;  %v2195_v31 = vunpack.c.h.b16 %v2094_v54 }
 0x207   : > { %v2244_v5 = vsel %vm2243_vm9, %v2242_v2, %v4969_v63  ;;  %v2081_v35 = vpack.c.bf16 %v3990_v55, %v3996_v1  ;;  %v1921_v12 = vmul.f32 %v4799_v37, %v1836_v4  ;;  %v3998_v26 = vpop.eup %3997 }
 0x208   : > { %v2248_v47 = vsel %vm2247_vm10, %v2246_v3, %v2244_v5  ;;  %v1907_v13 = vmul.f32 %v4799_v37, %v1808_v9  ;;  %3999 = vpow2.f32 %v2026_v6  ;;  %v1794_v34 = vmul.f32 0.6931472, %v3998_v26 }
 0x209   : > { %v2168_v15 = vunpack.c.l.b16 %v2081_v35  ;;  %v2169_v0 = vunpack.c.h.b16 %v2081_v35  ;;  %v2028_v16 = vmul.f32 1.442695, %v1921_v12  ;;  %4001 = vpow2.f32 %v1998_v10  ;;  %v5040_v17 = vpop.xlane.xlu2 %1646 }
 0x20a   : > { %v2000_v23 = vmul.f32 1.442695, %v1907_v13  ;;  %v2310_v36 = vperm.slane %v2195_v31, %v4825_v60  ;;  %v1569_v53 = vpop.xlane.xlu1 %1568  ;;  %v1900_v56 = vmul.f32 %v4799_v37, %v1794_v34 }
 0x20b   : > { %v2260_v63 = vperm.slane %v2168_v15, %v5015_v45  ;;  %v2262_v24 = vperm.slane %v2169_v0, %v5018_v32  ;;  %4003 = vpow2.f32 %v2028_v16  ;;  %v1699_v57 = vmul.f32 0.00390625, %v1569_v53 }
 0x20c   : > { %4005 = vpow2.f32 %v2000_v23  ;;  %v1986_v6 = vmul.f32 1.442695, %v1900_v56 }
 0x20d   : > { %v2261_v27 = vsel %vm2243_vm9, %v2260_v63, %v4964_v11  ;;  %4007 = vlog2.f32 %v1692_v28  ;;  %v2309_v11 = vperm.slane %v2194_v29, %v4820_v50 }
 0x20e   : > { %v2263_v49 = vsel %vm2247_vm10, %v2262_v24, %v2261_v27  ;;  %v4000_v33 = vpop.eup %3999  ;;  %4009 = vlog2.f32 %v1705_v38  ;;  %v5069_v27 = vpop.xlane.xlu0 %1649 }
 0x20f   : > { %v5045_v43 = vsel %vm2354_vm11, %v2263_v49, %v2248_v47  ;;  %v4002_v44 = vpop.eup %4001  ;;  %4011 = vlog2.f32 %v1706_v39  ;;  %v2311_v3 = vsel %vm2223_vm4, %v2310_v36, %v2309_v11 }
 0x210   : > { %4013 = vlog2.f32 %v1699_v57 }
 0x211   : > { %v4004_v51 = vpop.eup %4003  ;;  %v1572_v54 = vpop.xlane.xlu2 %1571 }
 0x212   : > { %v4006_v25 = vpop.eup %4005  ;;  %v2095_v48 = vpack.c.bf16 %v4004_v51, %v4000_v33  ;;  %v1700_v58 = vmul.f32 0.00390625, %v1572_v54  ;;  %v1614_v0 = vpop.xlane.xlu1 %1613 }
 0x213   : > { %v2088_v55 = vpack.c.bf16 %v4006_v25, %v4002_v44  ;;  %v4008_v2 = vpop.eup %4007 }
 0x214   : > { %v2196_v40 = vunpack.c.l.b16 %v2095_v48  ;;  %v2197_v46 = vunpack.c.h.b16 %v2095_v48  ;;  %4015 = vlog2.f32 %v1700_v58  ;;  %v1796_v9 = vmul.f32 0.6931472, %v4008_v2  ;;  %v4010_v10 = vpop.eup %4009 }
 0x215   : > { %v2182_v62 = vunpack.c.l.b16 %v2088_v55  ;;  %v2183_v59 = vunpack.c.h.b16 %v2088_v55  ;;  %v4012_v14 = vpop.eup %4011  ;;  %4017 = vpow2.f32 %v1986_v6  ;;  %v1822_v28 = vmul.f32 0.6931472, %v4010_v10 }
 0x216   : > { %v2312_v19 = vperm.slane %v2196_v40, %v4830_v7  ;;  %v2314_v4 = vperm.slane %v2197_v46, %v4864_v22  ;;  %v1901_v13 = vmul.f32 %v4799_v37, %v1796_v9  ;;  %v4014_v23 = vpop.eup %4013  ;;  %v1611_v56 = vpop.xlane.xlu0 %1610 }
 0x217   : > { %v2286_v1 = vperm.slane %v2182_v62, %v4942_v8  ;;  %v2288_v5 = vperm.slane %v2183_v59, %v4951_v21  ;;  %v1810_v26 = vmul.f32 0.6931472, %v4014_v23  ;;  %v1914_v38 = vmul.f32 %v4799_v37, %v1822_v28 }
 0x218   : > { %v2313_v47 = vsel %vm2227_vm5, %v2312_v19, %v2311_v3  ;;  %v1988_v63 = vmul.f32 1.442695, %v1901_v13 }
 0x219   : > { %v5059_v35 = vsel %vm2231_vm6, %v2314_v4, %v2313_v47  ;;  %v2287_v12 = vsel %vm2235_vm7, %v2286_v1, %v4992_v41  ;;  %v5067_v16 = vpop.xlane.xlu2 %1652  ;;  %v1824_v41 = vmul.f32 0.6931472, %v4012_v14  ;;  %v1908_v29 = vmul.f32 %v4799_v37, %v1810_v26 }
 0x21a   : > { %v5065_v15 = vsel %vm2239_vm8, %v2288_v5, %v2287_v12  ;;  %v4016_v24 = vpop.eup %4015  ;;  %4019 = vpow2.f32 %v1988_v63  ;;  %v1593_v51 = vpop.xlane.xlu1 %1592  ;;  %v2014_v54 = vmul.f32 1.442695, %v1914_v38  ;;  %v1714_v4 = vmul.f32 0.00390625, %v1614_v0 }
 0x21b   : > { %v1812_v49 = vmul.f32 0.6931472, %v4016_v24  ;;  %v2002_v33 = vmul.f32 1.442695, %v1908_v29  ;;  %v4018_v34 = vpop.eup %4017  ;;  %v1915_v39 = vmul.f32 %v4799_v37, %v1824_v41  ;;  %v1707_v36 = vmul.f32 0.00390625, %v1593_v51 }
 0x21c   : > { %v1713_v12 = vmul.f32 0.00390625, %v1611_v56  ;;  %v1718_v29 = vmul.f32 0.00390625, %v5007_v20  ;;  %v1720_v38 = vmul.f32 0.00390625, %v5038_v18  ;;  %v1719_v20 = vmul.f32 0.00390625, %v5047_v52 }
 0x21d   : > { %v1909_v31 = vmul.f32 %v4799_v37, %v1812_v49  ;;  %4021 = vpow2.f32 %v2002_v33  ;;  %v2016_v55 = vmul.f32 1.442695, %v1915_v39  ;;  %v1717_v33 = vmul.f32 0.00390625, %v5012_v30 }
 0x21e   : > { %v1727_v56 = vmul.f32 0.00390625, %v5067_v16 }
 0x21f   : > { %v2004_v44 = vmul.f32 1.442695, %v1909_v31 }
 0x220   : > { %v4020_v11 = vpop.eup %4019 }
 0x221   : > { %v1596_v25 = vpop.xlane.xlu2 %1595  ;;  %4023 = vpow2.f32 %v2004_v44  ;;  %v2085_v48 = vpack.c.bf16 %v4020_v11, %v4018_v34  ;;  %v1725_v11 = vmul.f32 0.00390625, %v5040_v17 }
 0x222   : > { %v1708_v53 = vmul.f32 0.00390625, %v1596_v25  ;;  %4025 = vlog2.f32 %v1707_v36 }
 0x223   : > { %v2176_v57 = vunpack.c.l.b16 %v2085_v48  ;;  %v4022_v40 = vpop.eup %4021  ;;  %v2177_v58 = vunpack.c.h.b16 %v2085_v48 }
 0x224   : > { %4027 = vlog2.f32 %v1708_v53 }
 0x225   : > { %4029 = vpow2.f32 %v2014_v54  ;;  %v2275_v59 = vperm.slane %v2176_v57, %v5015_v45  ;;  %v2277_v5 = vperm.slane %v2177_v58, %v5018_v32 }
 0x226   : > { %4031 = vpow2.f32 %v2016_v55 }
 0x227   : > { %v4024_v46 = vpop.eup %4023  ;;  %v2276_v47 = vsel %vm2243_vm9, %v2275_v59, %v5001_v42  ;;  %v1656_v24 = vpop.xlane.xlu0 %1655  ;;  %4033 = vlog2.f32 %v1714_v4 }
 0x228   : > { %v2089_v62 = vpack.c.bf16 %v4024_v46, %v4022_v40  ;;  %v4026_v19 = vpop.eup %4025  ;;  %v2278_v28 = vsel %vm2247_vm10, %v2277_v5, %v2276_v47  ;;  %4035 = vlog2.f32 %v1713_v12  ;;  %v1728_v52 = vmul.f32 0.00390625, %v1656_v24 }
 0x229   : > { %v1826_v6 = vmul.f32 0.6931472, %v4026_v19  ;;  %v2357_v34 = vsel %vm2356_vm12, %v2278_v28, %v5045_v43  ;;  %v1726_v43 = vmul.f32 0.00390625, %v5069_v27 }
 0x22a   : > { %v2184_v2 = vunpack.c.l.b16 %v2089_v62  ;;  %v2185_v3 = vunpack.c.h.b16 %v2089_v62  ;;  %v4028_v1 = vpop.eup %4027 }
 0x22b   : > { %v4030_v9 = vpop.eup %4029  ;;  %v1828_v13 = vmul.f32 0.6931472, %v4028_v1  ;;  %v1916_v63 = vmul.f32 %v4799_v37, %v1826_v6 }
 0x22c   : > { %v2290_v10 = vperm.slane %v2184_v2, %v5015_v45  ;;  %v4032_v14 = vpop.eup %4031  ;;  %v2292_v23 = vperm.slane %v2185_v3, %v5018_v32  ;;  %v1638_v44 = vpop.xlane.xlu1 %1637 }
 0x22d   : > { %v1917_v0 = vmul.f32 %v4799_v37, %v1828_v13  ;;  %v2018_v26 = vmul.f32 1.442695, %v1916_v63  ;;  %v2092_v49 = vpack.c.bf16 %v4032_v14, %v4030_v9  ;;  %v4034_v51 = vpop.eup %4033  ;;  %v1722_v62 = vmul.f32 0.00390625, %v1638_v44 }
 0x22e   : > { %v2291_v41 = vsel %vm2243_vm9, %v2290_v10, %v5065_v15  ;;  %v1617_v15 = vpop.xlane.xlu2 %1616  ;;  %v4036_v36 = vpop.eup %4035  ;;  %v1840_v53 = vmul.f32 0.6931472, %v4034_v51 }
 0x22f   : > { %v2020_v42 = vmul.f32 1.442695, %v1917_v0  ;;  %v2293_v31 = vsel %vm2247_vm10, %v2292_v23, %v2291_v41  ;;  %4037 = vpow2.f32 %v2018_v26  ;;  %v2190_v25 = vunpack.c.l.b16 %v2092_v49 }
 0x230   : > { %v2359_v39 = vsel %vm2358_vm13, %v2293_v31, %v2357_v34  ;;  %v1715_v30 = vmul.f32 0.00390625, %v1617_v15  ;;  %v2191_v48 = vunpack.c.h.b16 %v2092_v49  ;;  %v1635_v18 = vpop.xlane.xlu0 %1634  ;;  %v1838_v57 = vmul.f32 0.6931472, %v4036_v36 }
 0x231   : > { %4039 = vpow2.f32 %v2020_v42  ;;  %v2301_v55 = vperm.slane %v2190_v25, %v4942_v8  ;;  %v1923_v27 = vmul.f32 %v4799_v37, %v1840_v53  ;;  %v1721_v47 = vmul.f32 0.00390625, %v1635_v18 }
 0x232   : > { %4041 = vlog2.f32 %v1718_v29  ;;  %v2303_v58 = vperm.slane %v2191_v48, %v4951_v21  ;;  %v1922_v4 = vmul.f32 %v4799_v37, %v1838_v57 }
 0x233   : > { %4043 = vlog2.f32 %v1717_v33  ;;  %v2302_v2 = vsel %vm2235_vm7, %v2301_v55, %v5027_v61  ;;  %v2032_v12 = vmul.f32 1.442695, %v1923_v27 }
 0x234   : > { %4045 = vlog2.f32 %v1720_v38  ;;  %v2304_v13 = vsel %vm2239_vm8, %v2303_v58, %v2302_v2  ;;  %v2030_v63 = vmul.f32 1.442695, %v1922_v4 }
 0x235   : > { %v4038_v54 = vpop.eup %4037  ;;  %4047 = vlog2.f32 %v1725_v11 }
 0x236   : > { %4049 = vlog2.f32 %v1719_v20 }
 0x237   : > { %v4040_v17 = vpop.eup %4039  ;;  %4051 = vlog2.f32 %v1715_v30 }
 0x238   : > { %v2093_v40 = vpack.c.bf16 %v4040_v17, %v4038_v54  ;;  %v4042_v46 = vpop.eup %4041  ;;  %4053 = vlog2.f32 %v1726_v43 }
 0x239   : > { %v4044_v59 = vpop.eup %4043  ;;  %4055 = vlog2.f32 %v1727_v56  ;;  %v1848_v31 = vmul.f32 0.6931472, %v4042_v46 }
 0x23a   : > { %v2192_v3 = vunpack.c.l.b16 %v2093_v40  ;;  %v2193_v16 = vunpack.c.h.b16 %v2093_v40  ;;  %v4046_v19 = vpop.eup %4045  ;;  %4057 = vlog2.f32 %v1728_v52  ;;  %v1846_v33 = vmul.f32 0.6931472, %v4044_v59 }
 0x23b   : > { %v4048_v5 = vpop.eup %4047  ;;  %4059 = vlog2.f32 %v1722_v62  ;;  %v1852_v34 = vmul.f32 0.6931472, %v4046_v19  ;;  %v1927_v43 = vmul.f32 %v4799_v37, %v1848_v31 }
 0x23c   : > { %v2305_v6 = vperm.slane %v2192_v3, %v5015_v45  ;;  %v2307_v9 = vperm.slane %v2193_v16, %v5018_v32  ;;  %v4050_v10 = vpop.eup %4049  ;;  %4061 = vlog2.f32 %v1721_v47  ;;  %v1862_v51 = vmul.f32 0.6931472, %v4048_v5 }
 0x23d   : > { %v4052_v61 = vpop.eup %4051  ;;  %4063 = vpow2.f32 %v2032_v12  ;;  %v1850_v25 = vmul.f32 0.6931472, %v4050_v10  ;;  %v1926_v53 = vmul.f32 %v4799_v37, %v1846_v33  ;;  %v1929_v18 = vmul.f32 %v4799_v37, %v1852_v34  ;;  %v3255_v34 = vld [vmem:[%s4558_s13 + $0x74] sm:$0xf0] }
 0x23e   : > { %v2306_v14 = vsel %vm2243_vm9, %v2305_v6, %v2304_v13  ;;  %v4054_v23 = vpop.eup %4053  ;;  %v1842_v29 = vmul.f32 0.6931472, %v4052_v61  ;;  %v1934_v56 = vmul.f32 %v4799_v37, %v1862_v51  ;;  %v2040_v16 = vmul.f32 1.442695, %v1927_v43 }
 0x23f   : > { %v2308_v0 = vsel %vm2247_vm10, %v2307_v9, %v2306_v14  ;;  %v4056_v26 = vpop.eup %4055  ;;  %v1864_v11 = vmul.f32 0.6931472, %v4054_v23  ;;  %v1928_v17 = vmul.f32 %v4799_v37, %v1850_v25  ;;  %v2038_v19 = vmul.f32 1.442695, %v1926_v53 }
 0x240   : > { %v5106_v42 = vsel %vm2360_vm14, %v2308_v0, %v2359_v39  ;;  %v4058_v41 = vpop.eup %4057  ;;  %v1866_v20 = vmul.f32 0.6931472, %v4056_v26  ;;  %v1924_v36 = vmul.f32 %v4799_v37, %v1842_v29  ;;  %v2044_v4 = vmul.f32 1.442695, %v1929_v18  ;;  %v3254_v0 = vld [vmem:[%s4558_s13 + $0x6c] sm:$0xf0] }
 0x241   : > { %v4060_v44 = vpop.eup %4059  ;;  %v1868_v15 = vmul.f32 0.6931472, %v4058_v41  ;;  %v1935_v57 = vmul.f32 %v4799_v37, %v1864_v11  ;;  %v2054_v5 = vmul.f32 1.442695, %v1934_v56  ;;  %v2042_v6 = vmul.f32 1.442695, %v1928_v17 }
 0x242   : > { %v1659_v1 = vpop.xlane.xlu1 %1658  ;;  %v4062_v48 = vpop.eup %4061  ;;  %v1856_v54 = vmul.f32 0.6931472, %v4060_v44  ;;  %v1936_v40 = vmul.f32 %v4799_v37, %v1866_v20  ;;  %v2034_v62 = vmul.f32 1.442695, %v1924_v36  ;;  %v3086_v41 = vld [vmem:[%s4558_s13 + $0x70] sm:$0xf0] }
 0x243   : > { %v1729_v28 = vmul.f32 0.00390625, %v1659_v1  ;;  %v4064_v55 = vpop.eup %4063  ;;  %v1937_v46 = vmul.f32 %v4799_v37, %v1868_v15  ;;  %v1854_v59 = vmul.f32 0.6931472, %v4062_v48  ;;  %v2056_v9 = vmul.f32 1.442695, %v1935_v57 }
 0x244   : > { %v1662_v38 = vpop.xlane.xlu2 %1661  ;;  %v1931_v1 = vmul.f32 %v4799_v37, %v1856_v54  ;;  %v5119_v10 = vmul.f32 1.442695, %v1936_v40  ;;  %v3092_v29 = vld [vmem:[%s4558_s13 + $0x68] sm:$0xf]  ;;  %v3094_v44 = vld [vmem:[%s4558_s13 + $0x78] sm:$0xf0] }
 0x245   : > { %v1730_v39 = vmul.f32 0.00390625, %v1662_v38  ;;  %v5123_v13 = vmul.f32 1.442695, %v1937_v46  ;;  %v1930_v61 = vmul.f32 %v4799_v37, %v1854_v59  ;;  %v3253_v38 = vld [vmem:[%s4558_s13 + $0x6c] sm:$0xf]  ;;  %v3093_v11 = vor.u32 %v3255_v34, %v3092_v29 }
 0x246   : > { %v1620_v24 = vpop.xlane.xlu0 %1619  ;;  %v3097_v20 = vor.u32 %v3253_v38, %v3094_v44  ;;  %v3250_v48 = vld [vmem:[%s4558_s13 + $0x4c] sm:$0xf0]  ;;  %v3070_v56 = vld [vmem:[%s4558_s13 + $0x50] sm:$0xf0]  ;;  %v3076_v40 = vld [vmem:[%s4558_s13 + $0x48] sm:$0xf] }
 0x247   : > { %v1716_v49 = vmul.f32 0.00390625, %v1620_v24  ;;  %v3084_v24 = vld [vmem:[%s4558_s13 + $0x60] sm:$0xf]  ;;  %v5135_v51 = vmul.f32 1.442695, %v1930_v61  ;;  %2483 = vmatpush.bf16.msra.mxu2 %v3093_v11 }
 0x248   : > { %2496 = vmatpush.bf16.msra.mxu3 %v3097_v20  ;;  %v3251_v46 = vld [vmem:[%s4558_s13 + $0x54] sm:$0xf0]  ;;  %v3244_v61 = vld [vmem:[%s4558_s13 + $0x24] sm:$0xf]  ;;  %v3036_v44 = vld [vmem:[%s4558_s13] sm:$0xf] }
 0x249   : > { %4065 = vlog2.f32 %v1716_v49  ;;  %v3252_v49 = vld [vmem:[%s4558_s13 + $0x64] sm:$0xf] }
 0x24a   : > { %4067 = vpow2.f32 %v2030_v63  ;;  %v2048_v63 = vmul.f32 1.442695, %v1931_v1  ;;  %v3089_v33 = vor.u32 %v3252_v49, %v3086_v41  ;;  %v3245_v49 = vld [vmem:[%s4558_s13 + $0x2c] sm:$0xf]  ;;  %v3062_v41 = vld [vmem:[%s4558_s13 + $0x38] sm:$0xf0] }
 0x24b   : > { %4069 = vlog2.f32 %v1729_v28  ;;  %v1644_v30 = vpop.xlane.xlu1 %1643  ;;  %v3085_v28 = vor.u32 %v3254_v0, %v3084_v24  ;;  %v3065_v38 = vor.u32 %v3245_v49, %v3062_v41  ;;  %v3240_v11 = vld [vmem:[%s4558_s13 + $0x4] sm:$0xf] }
 0x24c   : > { %v1724_v58 = vmul.f32 0.00390625, %v1644_v30  ;;  %4071 = vlog2.f32 %v1730_v39  ;;  %2470 = vmatpush.bf16.msra.mxu1 %v3089_v33  ;;  %v3068_v30 = vld [vmem:[%s4558_s13 + $0x40] sm:$0xf] }
 0x24d   : > { %2457 = vmatpush.bf16.msra.mxu0 %v3085_v28  ;;  %v3069_v54 = vor.u32 %v3250_v48, %v3068_v30  ;;  %v3247_v28 = vld [vmem:[%s4558_s13 + $0x34] sm:$0xf0]  ;;  %v3044_v30 = vld [vmem:[%s4558_s13 + $0x8] sm:$0xf] }
 0x24e   : > { %4073 = vlog2.f32 %v1724_v58  ;;  %v3249_v58 = vld [vmem:[%s4558_s13 + $0x4c] sm:$0xf]  ;;  %v3243_v48 = vld [vmem:[%s4558_s13 + $0x14] sm:$0xf0] }
 0x24f   : > { %v4066_v52 = vpop.eup %4065  ;;  %4075 = vpow2.f32 %v2034_v62 }
 0x250   : > { %v4068_v27 = vpop.eup %4067  ;;  %v1844_v2 = vmul.f32 0.6931472, %v4066_v52  ;;  %4077 = vpow2.f32 %v2040_v16  ;;  %v3078_v16 = vld [vmem:[%s4558_s13 + $0x58] sm:$0xf0] }
 0x251   : > { %v4070_v3 = vpop.eup %4069  ;;  %v5121_v12 = vpack.c.bf16 %v4064_v55, %v4068_v27  ;;  %v3248_v55 = vld [vmem:[%s4558_s13 + $0x44] sm:$0xf]  ;;  %2458 = vmatpush.bf16.msra.mxu0 %v3069_v54  ;;  %v3241_v54 = vld [vmem:[%s4558_s13 + $0xc] sm:$0xf] }
 0x252   : > { %v1925_v47 = vmul.f32 %v4799_v37, %v1844_v2  ;;  %v1870_v14 = vmul.f32 0.6931472, %v4070_v3  ;;  %v4072_v26 = vpop.eup %4071  ;;  %v3073_v52 = vor.u32 %v3248_v55, %v3070_v56  ;;  %v3077_v3 = vor.u32 %v3251_v46, %v3076_v40  ;;  %v3046_v55 = vld [vmem:[%s4558_s13 + $0x18] sm:$0xf0] }
 0x253   : > { %v2198_v31 = vunpack.c.l.b16 %v5121_v12  ;;  %v1872_v36 = vmul.f32 0.6931472, %v4072_v26  ;;  %v2199_v53 = vunpack.c.h.b16 %v5121_v12 }
 0x254   : > { %v2036_v23 = vmul.f32 1.442695, %v1925_v47  ;;  %v1938_v25 = vmul.f32 %v4799_v37, %v1870_v14  ;;  %v4074_v15 = vpop.eup %4073  ;;  %2471 = vmatpush.bf16.msra.mxu1 %v3073_v52  ;;  %2484 = vmatpush.bf16.msra.mxu2 %v3077_v3  ;;  %v3081_v47 = vor.u32 %v3249_v58, %v3078_v16  ;;  %v3054_v14 = vld [vmem:[%s4558_s13 + $0x30] sm:$0xf0] }
 0x255   : > { %v4076_v43 = vpop.eup %4075  ;;  %v2316_v57 = vperm.slane %v2198_v31, %v4942_v8  ;;  %v1860_v59 = vmul.f32 0.6931472, %v4074_v15  ;;  %v3057_v33 = vor.u32 %v3244_v61, %v3054_v14 }
 0x256   : > { %4079 = vpow2.f32 %v2036_v23  ;;  %v5143_v17 = vpop.eup %4077  ;;  %v5149_v62 = vmul.f32 1.442695, %v1938_v25  ;;  %v3060_v23 = vld [vmem:[%s4558_s13 + $0x28] sm:$0xf]  ;;  %2497 = vmatpush.bf16.msra.mxu3 %v3081_v47  ;;  %v3242_v25 = vld [vmem:[%s4558_s13 + $0xc] sm:$0xf0] }
 0x257   : > { %4081 = vpow2.f32 %v2038_v19  ;;  %v2317_v29 = vsel %vm2235_vm7, %v2316_v57, %v5059_v35  ;;  %v3061_v34 = vor.u32 %v3247_v28, %v3060_v23  ;;  %v1933_v52 = vmul.f32 %v4799_v37, %v1860_v59 }
 0x258   : > { %4083 = vpow2.f32 %v2044_v4  ;;  %2472 = vmatpush.bf16.msra.mxu1 %v3057_v33 }
 0x259   : > { %v1665_v39 = vpop.xlane.xlu2 %1664  ;;  %4085 = vpow2.f32 %v2054_v5  ;;  %v3052_v5 = vld [vmem:[%s4558_s13 + $0x20] sm:$0xf]  ;;  %2485 = vmatpush.bf16.msra.mxu2 %v3061_v34 }
 0x25a   : > { %v1731_v18 = vmul.f32 0.00390625, %v1665_v39  ;;  %4087 = vpow2.f32 %v2042_v6  ;;  %v3246_v6 = vld [vmem:[%s4558_s13 + $0x2c] sm:$0xf0]  ;;  %v3038_v39 = vld [vmem:[%s4558_s13 + $0x10] sm:$0xf0]  ;;  %2498 = vmatpush.bf16.msra.mxu3 %v3065_v38 }
 0x25b   : > { %4089 = vpow2.f32 %v2056_v9  ;;  %v2318_v9 = vperm.slane %v2199_v53, %v4951_v21  ;;  %v3053_v12 = vor.u32 %v3246_v6, %v3052_v5  ;;  %v3041_v53 = vor.u32 %v3240_v11, %v3038_v39 }
 0x25c   : > { %v4080_v27 = vpop.eup %4079  ;;  %v1641_v2 = vpop.xlane.xlu0 %1640  ;;  %4091 = vpow2.f32 %v2048_v63  ;;  %v1939_v63 = vmul.f32 %v4799_v37, %v1872_v36  ;;  %v3037_v36 = vor.u32 %v3242_v25, %v3036_v44 }
 0x25d   : > { %v4082_v19 = vpop.eup %4081  ;;  %v2097_v4 = vpack.c.bf16 %v4080_v27, %v4076_v43  ;;  %v1723_v1 = vmul.f32 0.00390625, %v1641_v2  ;;  %4093 = vlog2.f32 %v1731_v18  ;;  %2459 = vmatpush.bf16.msra.mxu0 %v3053_v12  ;;  %v3045_v18 = vor.u32 %v3243_v48, %v3044_v30  ;;  %2473 = vmatpush.bf16.msra.mxu1 %v3041_v53 }
 0x25e   : > { %v4084_v24 = vpop.eup %4083  ;;  %v2319_v56 = vsel %vm2239_vm8, %v2318_v9, %v2317_v29  ;;  %v2064_v58 = vmul.f32 1.442695, %v1939_v63  ;;  %v3049_v2 = vor.u32 %v3241_v54, %v3046_v55 }
 0x25f   : > { %v2200_v0 = vunpack.c.l.b16 %v2097_v4  ;;  %v2201_v26 = vunpack.c.h.b16 %v2097_v4  ;;  %v4086_v31 = vpop.eup %4085  ;;  %4095 = vlog2.f32 %v1723_v1  ;;  %2486 = vmatpush.bf16.msra.mxu2 %v3045_v18 }
 0x260   : > { %v4088_v20 = vpop.eup %4087  ;;  %4097 = vpow2.f32 %v5135_v51  ;;  %v2098_v51 = vpack.c.bf16 %v5143_v17, %v4082_v19  ;;  %v2052_v19 = vmul.f32 1.442695, %v1933_v52  ;;  %2499 = vmatpush.bf16.msra.mxu3 %v3049_v2 }
 0x261   : > { %v2320_v35 = vperm.slane %v2200_v0, %v5015_v45  ;;  %v2322_v15 = vperm.slane %v2201_v26, %v5018_v32  ;;  %v4090_v43 = vpop.eup %4089  ;;  %4099 = vpow2.f32 %v5119_v10  ;;  %2460 = vmatpush.bf16.msra.mxu0 %v3037_v36  ;;  %v2099_v10 = vpack.c.bf16 %v4084_v24, %v4088_v20 }
 0x262   : > { %v4092_v57 = vpop.eup %4091  ;;  %4101 = vpow2.f32 %v5123_v13  ;;  %v2202_v5 = vunpack.c.l.b16 %v2098_v51  ;;  %v2203_v6 = vunpack.c.h.b16 %v2098_v51  ;;  %v2102_v14 = vpack.c.bf16 %v4090_v43, %v4086_v31 }
 0x263   : > { %v2321_v40 = vsel %vm2243_vm9, %v2320_v35, %v2319_v56  ;;  %v4094_v46 = vpop.eup %4093  ;;  %4103 = vpow2.f32 %v5149_v62  ;;  %v2204_v12 = vunpack.c.l.b16 %v2099_v10  ;;  %v2205_v28 = vunpack.c.h.b16 %v2099_v10 }
 0x264   : > { %v1668_v27 = vpop.xlane.xlu0 %1667  ;;  %v2323_v3 = vsel %vm2247_vm10, %v2322_v15, %v2321_v40  ;;  %v1874_v13 = vmul.f32 0.6931472, %v4094_v46  ;;  %v2324_v63 = vperm.slane %v2202_v5, %v4820_v50  ;;  %v2325_v0 = vperm.slane %v2203_v6, %v4825_v60 }
 0x265   : > { %v1732_v16 = vmul.f32 0.00390625, %v1668_v27  ;;  %v5183_v4 = vsel %vm2362_vm15, %v2323_v3, %v5106_v42  ;;  %v4096_v17 = vpop.eup %4095  ;;  %v2327_v29 = vperm.slane %v2204_v12, %v4830_v7  ;;  %v2210_v38 = vunpack.c.l.b16 %v2102_v14 }
 0x266   : > { %v4098_v59 = vpop.eup %4097  ;;  %v1858_v1 = vmul.f32 0.6931472, %v4096_v17  ;;  %v1940_v62 = vmul.f32 %v4799_v37, %v1874_v13  ;;  %v2211_v31 = vunpack.c.h.b16 %v2102_v14  ;;  %v2326_v25 = vsel %vm2223_vm4, %v2325_v0, %v2324_v63 }
 0x267   : > { %4105 = vlog2.f32 %v1732_v16  ;;  %v4100_v9 = vpop.eup %4099  ;;  %v2100_v61 = vpack.c.bf16 %v4092_v57, %v4098_v59  ;;  %v2329_v35 = vperm.slane %v2205_v28, %v4864_v22  ;;  %v2328_v30 = vsel %vm2227_vm5, %v2327_v29, %v2326_v25  ;;  %v2073_v28 = vld [vmem:[#allocation2 + $0x8] sm:$0xff] }
 0x268   : > { %4107 = vpow2.f32 %v2064_v58  ;;  %v1932_v47 = vmul.f32 %v4799_v37, %v1858_v1  ;;  %v4102_v42 = vpop.eup %4101  ;;  %v2066_v44 = vmul.f32 1.442695, %v1940_v62  ;;  %v2339_v18 = vperm.slane %v2210_v38, %v4820_v50 }
 0x269   : > { %4109 = vpow2.f32 %v2052_v19  ;;  %v4104_v24 = vpop.eup %4103  ;;  %v2103_v49 = vpack.c.bf16 %v4102_v42, %v4100_v9  ;;  %v2206_v33 = vunpack.c.l.b16 %v2100_v61  ;;  %v2207_v36 = vunpack.c.h.b16 %v2100_v61 }
 0x26a   : > { %v2050_v23 = vmul.f32 1.442695, %v1932_v47  ;;  %v2340_v54 = vperm.slane %v2211_v31, %v4825_v60  ;;  %v2330_v52 = vsel %vm2231_vm6, %v2329_v35, %v2328_v30 }
 0x26b   : > { %v2212_v15 = vunpack.c.l.b16 %v2103_v49  ;;  %v2331_v48 = vperm.slane %v2206_v33, %v4942_v8  ;;  %v2213_v55 = vunpack.c.h.b16 %v2103_v49  ;;  %v2333_v57 = vperm.slane %v2207_v36, %v4951_v21 }
 0x26c   : > { %4111 = vpow2.f32 %v2050_v23  ;;  %v2341_v27 = vsel %vm2223_vm4, %v2340_v54, %v2339_v18 }
 0x26d   : > { %v4106_v26 = vpop.eup %4105  ;;  %4113 = vpow2.f32 %v2066_v44  ;;  %v2332_v58 = vsel %vm2235_vm7, %v2331_v48, %v2330_v52  ;;  %v2344_v50 = vperm.slane %v2213_v55, %v4864_v22 }
 0x26e   : > { %v4108_v41 = vpop.eup %4107  ;;  %v1876_v34 = vmul.f32 0.6931472, %v4106_v26  ;;  %v2334_v17 = vsel %vm2239_vm8, %v2333_v57, %v2332_v58  ;;  %v2072_v26 = vld [vmem:[#allocation2 + $0x18] sm:$0xff] }
 0x26f   : > { %v4110_v20 = vpop.eup %4109  ;;  %v2104_v39 = vpack.c.bf16 %v4108_v41, %v4104_v24  ;;  %v2071_v24 = vld [vmem:[#allocation2] sm:$0xff] }
 0x270   : > { %v1941_v11 = vmul.f32 %v4799_v37, %v1876_v34  ;;  %v2342_v37 = vperm.slane %v2212_v15, %v4830_v7 }
 0x271   : > { %v2214_v51 = vunpack.c.l.b16 %v2104_v39  ;;  %v2215_v60 = vunpack.c.h.b16 %v2104_v39 }
 0x272   : > { %v2068_v43 = vmul.f32 1.442695, %v1941_v11  ;;  %v4112_v53 = vpop.eup %4111  ;;  %v2343_v10 = vsel %vm2227_vm5, %v2342_v37, %v2341_v27 }
 0x273   : > { %v2101_v56 = vpack.c.bf16 %v4110_v20, %v4112_v53  ;;  %v4114_v16 = vpop.eup %4113  ;;  %v2346_v7 = vperm.slane %v2214_v51, %v4942_v8  ;;  %v2348_v22 = vperm.slane %v2215_v60, %v4951_v21  ;;  %v2345_v5 = vsel %vm2231_vm6, %v2344_v50, %v2343_v10 }
 0x274   : > { %4115 = vpow2.f32 %v2068_v43 }
 0x275   : > { %v2208_v40 = vunpack.c.l.b16 %v2101_v56  ;;  %v2209_v46 = vunpack.c.h.b16 %v2101_v56  ;;  %v2347_v8 = vsel %vm2235_vm7, %v2346_v7, %v2345_v5 }
 0x276   : > { %v2349_v61 = vsel %vm2239_vm8, %v2348_v22, %v2347_v8 }
 0x277   : > { %v2335_v2 = vperm.slane %v2208_v40, %v5015_v45  ;;  %v2337_v3 = vperm.slane %v2209_v46, %v5018_v32 }
 0x279   : > { %v2336_v19 = vsel %vm2243_vm9, %v2335_v2, %v2334_v17 }
 0x27a   : > { %v4116_v59 = vpop.eup %4115  ;;  %v2338_v1 = vsel %vm2247_vm10, %v2337_v3, %v2336_v19 }
 0x27b   : > { %v2105_v13 = vpack.c.bf16 %v4116_v59, %v4114_v16  ;;  %v2365_v6 = vsel %vm2364_vm0, %v2338_v1, %v5183_v4  ;;  %v2070_v4 = vld [vmem:[#allocation2 + $0x10] sm:$0xff] }
 0x27d   : > { %v2216_v9 = vunpack.c.l.b16 %v2105_v13  ;;  %v2217_v47 = vunpack.c.h.b16 %v2105_v13 }
 0x27f   : > { %v2350_v42 = vperm.slane %v2216_v9, %v5015_v45  ;;  %v2352_v12 = vperm.slane %v2217_v47, %v5018_v32 }
 0x281   : > { %v2351_v14 = vsel %vm2243_vm9, %v2350_v42, %v2349_v61 }
 0x282   : > { %v2353_v62 = vsel %vm2247_vm10, %v2352_v12, %v2351_v14 }
 0x283   : > { %v2367_v21 = vsel %vm2366_vm1, %v2353_v62, %v2365_v6 }
 0x284   : > { %v2368_v23 = vpack.c.b16 %v2367_v21, %v2367_v21 }
 0x286   : > { %3098 = vmatmul.msk.bf16.vlgmr.msra.gmra.mxu0 %vm2449_vm2, %v2368_v23  ;;  %3099 = vmatmul.msk.bf16.vlgmr.msra.gmra.mxu1 %vm2449_vm2, %v2368_v23 }
 0x287   : > { %3100 = vmatmul.msk.bf16.vlgmr.msra.gmra.mxu2 %vm2449_vm2, %v2368_v23  ;;  %3101 = vmatmul.msk.bf16.vlgmr.msra.gmra.mxu3 %vm2449_vm2, %v2368_v23 }
 0x303   : > { %v2462_v63 = vpop.f32.mrf.mxu0  ;;  %v2475_v45 = vpop.f32.mrf.mxu1 }
 0x304   : > { %v2505_v0 = vadd.f32 %v2462_v63, %v2070_v4  ;;  %v2506_v32 = vadd.f32 %v2475_v45, %v2071_v24 }
 0x306   : > { %2509 = vst [vmem:[#allocation2 + $0x10] sm:$0xff] %v2505_v0 }
 0x307   : > { %2510 = vst [vmem:[#allocation2] sm:$0xff] %v2506_v32 }
 0x30a   : > { %v2488_v49 = vpop.f32.mrf.mxu2  ;;  %v2501_v41 = vpop.f32.mrf.mxu3 }
 0x30b   : > { %v2507_v29 = vadd.f32 %v2488_v49, %v2072_v26  ;;  %v2508_v33 = vadd.f32 %v2501_v41, %v2073_v28  ;;  %v2464_v34 = vpop.f32.mrf.mxu0  ;;  %v2477_v38 = vpop.f32.mrf.mxu1 }
 0x30d   : > { %2511 = vst [vmem:[#allocation2 + $0x18] sm:$0xff] %v2507_v29 }
 0x30e   : > { %2512 = vst [vmem:[#allocation2 + $0x8] sm:$0xff] %v2508_v33  ;;  %2516 = sbr.rel (%p3102_p13) target bundleno = 975 (0x3cf), region = 75 }
 0x312   : > { %v2490_v31 = vpop.f32.mrf.mxu2  ;;  %v2503_v44 = vpop.f32.mrf.mxu3 }
 0x313   : > { %v3263_v25 = vld [vmem:[%s5399_s4 + $0x38] sm:$0xff]  ;;  %v3262_v15 = vld [vmem:[%s5399_s4 + $0x30] sm:$0xff]  ;;  %v3261_v48 = vld [vmem:[%s5399_s4 + $0x28] sm:$0xff] }
 0x314   : > { %v3271_v11 = vld [vmem:[%s5399_s4 + $0x78] sm:$0xff]  ;;  %2879 = vmatpush.bf16.msra.mxu0 %v3263_v25  ;;  %v3270_v36 = vld [vmem:[%s5399_s4 + $0x70] sm:$0xff]  ;;  %v3269_v43 = vld [vmem:[%s5399_s4 + $0x68] sm:$0xff] }
 0x315   : > { %v3279_v20 = vld [vmem:[%s5399_s4 + $0xb8] sm:$0xff]  ;;  %2892 = vmatpush.bf16.msra.mxu1 %v3271_v11  ;;  %v3278_v39 = vld [vmem:[%s5399_s4 + $0xb0] sm:$0xff]  ;;  %v3277_v53 = vld [vmem:[%s5399_s4 + $0xa8] sm:$0xff] }
 0x316   : > { %v3287_v35 = vld [vmem:[%s5399_s4 + $0xf8] sm:$0xff]  ;;  %2905 = vmatpush.bf16.msra.mxu2 %v3279_v20  ;;  %v3286_v30 = vld [vmem:[%s5399_s4 + $0xf0] sm:$0xff]  ;;  %v3285_v18 = vld [vmem:[%s5399_s4 + $0xe8] sm:$0xff] }
 0x317   : > { %2918 = vmatpush.bf16.msra.mxu3 %v3287_v35  ;;  %v3260_v54 = vld [vmem:[%s5399_s4 + $0x20] sm:$0xff]  ;;  %v2517_v57 = vld [vmem:[#allocation2 + $0x10] sm:$0xff]  ;;  %v2519_v40 = vld [vmem:[#allocation2 + $0x18] sm:$0xff] }
 0x318   : > { %2880 = vmatpush.bf16.msra.mxu0 %v3262_v15  ;;  %v3268_v55 = vld [vmem:[%s5399_s4 + $0x60] sm:$0xff]  ;;  %v2520_v50 = vld [vmem:[#allocation2 + $0x8] sm:$0xff]  ;;  %v3259_v2 = vld [vmem:[%s5399_s4 + $0x18] sm:$0xff] }
 0x319   : > { %2893 = vmatpush.bf16.msra.mxu1 %v3270_v36  ;;  %v3276_v56 = vld [vmem:[%s5399_s4 + $0xa0] sm:$0xff]  ;;  %v3267_v3 = vld [vmem:[%s5399_s4 + $0x58] sm:$0xff]  ;;  %v3258_v6 = vld [vmem:[%s5399_s4 + $0x10] sm:$0xff] }
 0x31a   : > { %2906 = vmatpush.bf16.msra.mxu2 %v3278_v39  ;;  %v3284_v37 = vld [vmem:[%s5399_s4 + $0xe0] sm:$0xff]  ;;  %v3275_v10 = vld [vmem:[%s5399_s4 + $0x98] sm:$0xff]  ;;  %v3266_v9 = vld [vmem:[%s5399_s4 + $0x50] sm:$0xff] }
 0x31b   : > { %2919 = vmatpush.bf16.msra.mxu3 %v3286_v30  ;;  %v2521_v51 = vld [vmem:[%s5398_s3] sm:$0xf]  ;;  %v3283_v59 = vld [vmem:[%s5399_s4 + $0xd8] sm:$0xff]  ;;  %v3274_v47 = vld [vmem:[%s5399_s4 + $0x90] sm:$0xff] }
 0x31c   : > { %2881 = vmatpush.bf16.msra.mxu0 %v3261_v48  ;;  %v2518_v52 = vld [vmem:[#allocation2] sm:$0xff]  ;;  %v2523_v46 = vperm.slane %v2521_v51, 0  ;;  %v2524_v58 = vperm.slane %v2521_v51, 1  ;;  %v2525_v27 = vperm.slane %v2521_v51, 2  ;;  %v2526_v60 = vperm.slane %v2521_v51, 3  ;;  %v3282_v8 = vld [vmem:[%s5399_s4 + $0xd0] sm:$0xff] }
 0x31d   : > { %2894 = vmatpush.bf16.msra.mxu1 %v3269_v43  ;;  %v3257_v42 = vld [vmem:[%s5399_s4 + $0x8] sm:$0xff]  ;;  %v3256_v24 = vld [vmem:[%s5399_s4] sm:$0xff] }
 0x31e   : > { %2907 = vmatpush.bf16.msra.mxu2 %v3277_v53  ;;  %v5278_v16 = vadd.f32 %v2523_v46, %v2517_v57  ;;  %v5280_v7 = vadd.f32 %v2524_v58, %v2518_v52  ;;  %v5282_v17 = vadd.f32 %v2525_v27, %v2519_v40  ;;  %v5290_v19 = vadd.f32 %v2526_v60, %v2520_v50  ;;  %v3265_v12 = vld [vmem:[%s5399_s4 + $0x48] sm:$0xff]  ;;  %v3264_v63 = vld [vmem:[%s5399_s4 + $0x40] sm:$0xff] }
 0x31f   : > { %2920 = vmatpush.bf16.msra.mxu3 %v3285_v18  ;;  %v3273_v61 = vld [vmem:[%s5399_s4 + $0x88] sm:$0xff]  ;;  %v3272_v32 = vld [vmem:[%s5399_s4 + $0x80] sm:$0xff] }
 0x320   : > { %2882 = vmatpush.bf16.msra.mxu0 %v3260_v54  ;;  %v3103_v13 = vmul.f32 -1.442695, %v5278_v16  ;;  %v3104_v1 = vmul.f32 -1.442695, %v5280_v7  ;;  %v3105_v22 = vmul.f32 -1.442695, %v5282_v17 }
 0x321   : > { %2895 = vmatpush.bf16.msra.mxu1 %v3268_v55  ;;  %v3106_v5 = vmul.f32 -1.442695, %v5290_v19  ;;  %v3281_v14 = vld [vmem:[%s5399_s4 + $0xc8] sm:$0xff]  ;;  %v3280_v26 = vld [vmem:[%s5399_s4 + $0xc0] sm:$0xff] }
 0x322   : > { %2908 = vmatpush.bf16.msra.mxu2 %v3276_v56  ;;  %4118 = vpow2.f32 %v3103_v13 }
 0x323   : > { %2921 = vmatpush.bf16.msra.mxu3 %v3284_v37  ;;  %4120 = vpow2.f32 %v3104_v1 }
 0x324   : > { %2883 = vmatpush.bf16.msra.mxu0 %v3259_v2  ;;  %4122 = vpow2.f32 %v3105_v22 }
 0x325   : > { %2896 = vmatpush.bf16.msra.mxu1 %v3267_v3  ;;  %4124 = vpow2.f32 %v3106_v5 }
 0x326   : > { %2909 = vmatpush.bf16.msra.mxu2 %v3275_v10 }
 0x327   : > { %2922 = vmatpush.bf16.msra.mxu3 %v3283_v59 }
 0x328   : > { %2884 = vmatpush.bf16.msra.mxu0 %v3258_v6  ;;  %v4119_v62 = vpop.eup %4118 }
 0x329   : > { %2897 = vmatpush.bf16.msra.mxu1 %v3266_v9  ;;  %v4121_v21 = vpop.eup %4120  ;;  %v2547_v23 = vadd.f32 1.0, %v4119_v62 }
 0x32a   : > { %2910 = vmatpush.bf16.msra.mxu2 %v3274_v47  ;;  %v4123_v4 = vpop.eup %4122  ;;  %v2548_v45 = vadd.f32 1.0, %v4121_v21 }
 0x32b   : > { %2923 = vmatpush.bf16.msra.mxu3 %v3282_v8  ;;  %v4125_v0 = vpop.eup %4124  ;;  %4126 = vrcp.f32 %v2547_v23  ;;  %v2549_v28 = vadd.f32 1.0, %v4123_v4  ;;  %v2560_v41 = vand.u32 2147483647, %v2547_v23  ;;  %v2562_v29 = vand.u32 2147483648, %v2547_v23 }
 0x32c   : > { %2885 = vmatpush.bf16.msra.mxu0 %v3257_v42  ;;  %4128 = vrcp.f32 %v2548_v45  ;;  %v2550_v49 = vadd.f32 1.0, %v4125_v0  ;;  %v2575_v34 = vand.u32 2147483647, %v2548_v45  ;;  %v2577_v38 = vand.u32 2147483648, %v2548_v45 }
 0x32d   : > { %2898 = vmatpush.bf16.msra.mxu1 %v3265_v12  ;;  %4130 = vrcp.f32 %v2549_v28  ;;  %vm2556_vm3 = vweird.f32 %v2547_v23  ;;  %vm2571_vm4 = vweird.f32 %v2548_v45  ;;  %vm5332_vm6 = vcmp.eq.f32.partialorder %v2560_v41, 8.507059e+37 }
 0x32e   : > { %2911 = vmatpush.bf16.msra.mxu2 %v3273_v61  ;;  %4132 = vrcp.f32 %v2550_v49  ;;  %v2563_v35 = vor.u32 1.1754944e-38, %v2562_v29  ;;  %vm5336_vm8 = vcmp.eq.f32.partialorder %v2575_v34, 8.507059e+37  ;;  %v2578_v30 = vor.u32 1.1754944e-38, %v2577_v38 }
 0x32f   : > { %2924 = vmatpush.bf16.msra.mxu3 %v3281_v14  ;;  %vm2586_vm9 = vweird.f32 %v2549_v28  ;;  %v2590_v18 = vand.u32 2147483647, %v2549_v28  ;;  %v2592_v56 = vand.u32 2147483648, %v2549_v28  ;;  %vm2601_vm11 = vweird.f32 %v2550_v49 }
 0x330   : > { %2886 = vmatpush.bf16.msra.mxu0 %v3256_v24  ;;  %v2607_v40 = vand.u32 2147483648, %v2550_v49  ;;  %v2605_v27 = vand.u32 2147483647, %v2550_v49 }
 0x331   : > { %2899 = vmatpush.bf16.msra.mxu1 %v3264_v63  ;;  %v4127_v33 = vpop.eup %4126  ;;  %vm5352_vm15 = vcmp.eq.f32.partialorder %v2590_v18, 8.507059e+37  ;;  %v2593_v59 = vor.u32 1.1754944e-38, %v2592_v56 }
 0x332   : > { %2912 = vmatpush.bf16.msra.mxu2 %v3272_v32  ;;  %v4129_v31 = vpop.eup %4128  ;;  %v2552_v44 = vmul.f32 %v4127_v33, %v2547_v23  ;;  %vm2557_vm5 = vweird.f32 %v4127_v33  ;;  %v2608_v6 = vor.u32 1.1754944e-38, %v2607_v40  ;;  %vm2606_vm2 = vcmp.eq.f32.partialorder %v2605_v27, 8.507059e+37 }
 0x333   : > { %2925 = vmatpush.bf16.msra.mxu3 %v3280_v26  ;;  %v2567_v25 = vmul.f32 %v4129_v31, %v2548_v45  ;;  %v4131_v15 = vpop.eup %4130  ;;  %vm2572_vm7 = vweird.f32 %v4129_v31  ;;  %vm5341_vm10 = vmor %vm2556_vm3, %vm2557_vm5 }
 0x334   : > { %v2553_v11 = vsub.f32 1.0, %v2552_v44  ;;  %v4133_v48 = vpop.eup %4132  ;;  %v2582_v53 = vmul.f32 %v4131_v15, %v2549_v28  ;;  %vm5346_vm12 = vmor %vm2571_vm4, %vm2572_vm7  ;;  %vm2587_vm13 = vweird.f32 %v4131_v15 }
 0x335   : > { %v2568_v36 = vsub.f32 1.0, %v2567_v25  ;;  %v2597_v37 = vmul.f32 %v4133_v48, %v2550_v49  ;;  %vm2602_vm14 = vweird.f32 %v4133_v48  ;;  %vm2588_vm0 = vmor %vm2586_vm9, %vm2587_vm13 }
 0x336   : > { %v2554_v43 = vmul.f32 %v4127_v33, %v2553_v11  ;;  %v2583_v52 = vsub.f32 1.0, %v2582_v53  ;;  %vm2603_vm1 = vmor %vm2601_vm11, %vm2602_vm14 }
 0x337   : > { %v2569_v55 = vmul.f32 %v4129_v31, %v2568_v36  ;;  %v2598_v58 = vsub.f32 1.0, %v2597_v37 }
 0x338   : > { %v2555_v57 = vadd.f32 %v4127_v33, %v2554_v43  ;;  %v2584_v60 = vmul.f32 %v4131_v15, %v2583_v52 }
 0x339   : > { %v2570_v46 = vadd.f32 %v4129_v31, %v2569_v55  ;;  %v2599_v13 = vmul.f32 %v4133_v48, %v2598_v58 }
 0x33a   : > { %v2559_v50 = vsel %vm5341_vm10, %v4127_v33, %v2555_v57  ;;  %v2585_v5 = vadd.f32 %v4131_v15, %v2584_v60 }
 0x33b   : > { %v2564_v3 = vsel %vm5332_vm6, %v2563_v35, %v2559_v50  ;;  %v2574_v10 = vsel %vm5346_vm12, %v4129_v31, %v2570_v46  ;;  %v2600_v47 = vadd.f32 %v4133_v48, %v2599_v13 }
 0x33c   : > { %v2611_v1 = vmul.f32 %v2564_v3, %v5278_v16  ;;  %v2579_v22 = vsel %vm5336_vm8, %v2578_v30, %v2574_v10  ;;  %v2589_v42 = vsel %vm2588_vm0, %v4131_v15, %v2585_v5 }
 0x33d   : > { %v2612_v9 = vmul.f32 %v2579_v22, %v5280_v7  ;;  %v2594_v61 = vsel %vm5352_vm15, %v2593_v59, %v2589_v42  ;;  %v2604_v14 = vsel %vm2603_vm1, %v4133_v48, %v2600_v47  ;;  %v4117_v7 = vld [vmem:[%s5400_s5] ss:$0 sm:$0xff] }
 0x33e   : > { %v2615_v8 = vpack.c.bf16 %v2611_v1, %v2611_v1  ;;  %v2613_v16 = vmul.f32 %v2594_v61, %v5282_v17  ;;  %v2609_v62 = vsel %vm2606_vm2, %v2608_v6, %v2604_v14 }
 0x33f   : > { %v2616_v12 = vpack.c.bf16 %v2612_v9, %v2612_v9  ;;  %v2614_v21 = vmul.f32 %v2609_v62, %v5290_v19 }
 0x340   : > { %2887 = vmatmul.bf16.vlgmr.msra.gmra.mxu0 %v2615_v8  ;;  %v2617_v23 = vpack.c.bf16 %v2613_v16, %v2613_v16 }
 0x341   : > { %2900 = vmatmul.bf16.vlgmr.msra.gmra.mxu1 %v2616_v12  ;;  %v2618_v4 = vpack.c.bf16 %v2614_v21, %v2614_v21 }
 0x342   : > { %2913 = vmatmul.bf16.vlgmr.msra.gmra.mxu2 %v2617_v23 }
 0x343   : > { %2926 = vmatmul.bf16.vlgmr.msra.gmra.mxu3 %v2618_v4 }
 0x3bd   : > { %v2888_v24 = vpop.f32.mrf.mxu0 }
 0x3be   : > { %v2901_v63 = vpop.f32.mrf.mxu1  ;;  %v2889_v45 = vadd.f32 %v4117_v7, %v2888_v24 }
 0x3c0   : > { %v2902_v0 = vadd.f32 %v2901_v63, %v2889_v45 }
 0x3c5   : > { %v2890_v32 = vpop.f32.mrf.mxu0  ;;  %v2914_v17 = vpop.f32.mrf.mxu2 }
 0x3c6   : > { %v2903_v26 = vpop.f32.mrf.mxu1  ;;  %v2915_v28 = vadd.f32 %v2914_v17, %v2902_v0  ;;  %v2927_v49 = vpop.f32.mrf.mxu3 }
 0x3c8   : > { %v2928_v41 = vadd.f32 %v2927_v49, %v2915_v28 }
 0x3ca   : > { %2931 = vst [vmem:[%s4563_s17] sm:$0xff] %v2928_v41 }
 0x3cd   : > { %v2916_v19 = vpop.f32.mrf.mxu2 }
 0x3ce   : > { %v2929_v29 = vpop.f32.mrf.mxu3 }
 0x3cf PF: > { %s17_s29 = sadd.s32 1, %s4188_s29   ;;  %s5416_s23 = smov %s4168_s24 }
 0x3d0   : > { %p14_p0 = scmp.ge.s32.totalorder %s17_s29, 6   ;;  %s5417_s24 = smov %s4280_s11 }
 0x3d1   : > { %s5418_s25 = smov %s4180_s27  ;;  %s5419_s26 = smov %s4184_s28 }
 0x3d2   : > { %s5420_s27 = smov %s5423_s0  ;;  %s5421_s28 = smov %s5427_s30 }
 0x3d3   :  { %16 = sbr.rel (!%p14_p0) target bundleno = 6 (0x6), region = 113 }

</bundles_post_ra>
